<compile_context>
chip_gen: v5e
topology: v5e:2x2
jax: 0.10.0
libtpu: 0.0.40
codegen_flags: <defaults>
</compile_context>

<pallas_src>
import numpy as np
import jax
import jax.numpy as jnp
from jax import lax
from jax.experimental import pallas as pl
from jax.experimental.pallas import tpu as pltpu


# ----------------------------- config ("args") ------------------------------ #
class Args:
    tok_size = 50
    pos_size = 20
    post_size = 20
    emb_dim = 32
    pos_dim = 8
    post_dim = 8
    hidden_dim = 32
    num_layers = 2
    input_dropout = 0.0   # TODO(synk): declared in the module but never applied in forward
    gcn_dropout = 0.0     # TODO(synk): declared in the module but never applied in forward
    direct = False
    loop = True


# Keep the f32 MXU contraction exact (lets the test tolerance tighten ~10x).
_PREC = lax.Precision.HIGHEST


# ------------------------------- Pallas kernel ------------------------------ #
def gcn_absa_kernel(adj_ref, we_ref, pe_ref, qe_ref, pool_ref,
                    w0a_ref, w0b_ref, w0c_ref, b0_ref, w1_ref, b1_ref,
                    out_ref):
    """Whole batch in one grid step (everything VMEM resident).

    adj_ref  : (N, N)  f32  block-diagonal adjacency, N = B*L
    we_ref   : (N, De) f32  word embeddings (flattened batch*seq)
    pe_ref   : (N, Dp) f32  pos embeddings
    qe_ref   : (N, Dq) f32  post embeddings
    pool_ref : (B, N)  f32  aspect-mean pooling matrix (rows = mask / asp_wn)
    w0a/b/c  : (De|Dp|Dq, H) f32 row-blocks of W0 (word | pos | post)
    b0, b1   : (1, H)  f32
    w1       : (H, H)  f32
    out_ref  : (B, H)  f32  pooled aspect representation
    """
    adj = adj_ref[...]                                               # (N, N)

    # denom = adj.sum(-1) + 1; EXACT f32 division (review: approx reciprocal
    # compounded through both layers and forced a loose test tolerance).
    inv_denom = 1.0 / (jnp.sum(adj, axis=-1, keepdims=True) + 1.0)   # (N, 1)

    # --- layer 0 ---------------------------------------------------------- #
    # Linear stage first (reassociation: (adj @ x) @ W == adj @ (x @ W)); W0
    # is split row-wise so the host-side embedding concat is not needed -- the
    # three partial products accumulate into one f32 (N, H) result.
    xw = jnp.dot(we_ref[...], w0a_ref[...],
                 preferred_element_type=jnp.float32, precision=_PREC)
    xw = xw + jnp.dot(pe_ref[...], w0b_ref[...],
                      preferred_element_type=jnp.float32, precision=_PREC)
    xw = xw + jnp.dot(qe_ref[...], w0c_ref[...],
                      preferred_element_type=jnp.float32, precision=_PREC)
    # Block-diagonal "bmm": one (N, N) @ (N, H) MXU matmul for the whole batch.
    ax = jnp.dot(adj, xw, preferred_element_type=jnp.float32, precision=_PREC)
    x = jnp.maximum((ax + b0_ref[...]) * inv_denom, 0.0)            # (N, H)

    # --- layer 1 ---------------------------------------------------------- #
    xw = jnp.dot(x, w1_ref[...],
                 preferred_element_type=jnp.float32, precision=_PREC)
    ax = jnp.dot(adj, xw, preferred_element_type=jnp.float32, precision=_PREC)
    x = jnp.maximum((ax + b1_ref[...]) * inv_denom, 0.0)            # (N, H)

    # --- aspect-masked mean pooling as one (B, N) @ (N, H) matmul ---------- #
    # Pool rows are already mask / asp_wn (exact division in the wrapper), so
    # there is no (bt, L, 1) mask block and no cross-sublane reduction here.
    out_ref[...] = jnp.dot(pool_ref[...], x,
                           preferred_element_type=jnp.float32, precision=_PREC)


# --------------------------------- wrapper ----------------------------------- #
def gcn_absa_forward(adj, word_embs, pos_embs, post_embs, mask, w0, b0, w1, b1):
    """GCN layers + aspect pooling in a single-step Pallas kernel.

    adj     : (B, L, L)          dependency adjacency
    *_embs  : (B, L, De|Dp|Dq)   embedding lookups (word / pos / post)
    mask    : (B, L)             aspect mask
    w0, b0  : (De+Dp+Dq, H), (H,)  first GCN layer
    w1, b1  : (H, H), (H,)         second GCN layer
    returns : (B, H) pooled aspect representation
    """
    f32 = jnp.float32
    B, L, _ = adj.shape
    N = B * L
    De = word_embs.shape[-1]
    Dp = pos_embs.shape[-1]
    Dq = post_embs.shape[-1]
    H = w0.shape[-1]

    # Block-diagonal adjacency: adj_bd[b*L+i, b*L+j] = adj[b, i, j].
    # 128x128 f32 = 64 KiB here.  NOTE(v7x): this footprint grows as (B*L)^2
    # and is double-buffered; past B*L ~ 512-1024 (or when scaling L) fall back
    # to the batched layout, re-derive the tile for v7x's 64 MiB VMEM and set
    # vmem_limit_bytes explicitly.
    eye = jnp.eye(B, dtype=f32)
    adj_bd = (eye[:, None, :, None] * adj.astype(f32)[:, :, None, :]).reshape(N, N)

    # Aspect-mean pooling matrix: pool[b, b*L+t] = mask[b, t] / mask[b].sum().
    mask_f = mask.astype(f32)
    asp_wn = jnp.sum(mask_f, axis=1, keepdims=True)                  # exact
    pool = (eye[:, :, None] * (mask_f / asp_wn)[:, None, :]).reshape(B, N)

    we = word_embs.astype(f32).reshape(N, De)
    pe = pos_embs.astype(f32).reshape(N, Dp)
    qe = post_embs.astype(f32).reshape(N, Dq)
    w0a = w0[:De].astype(f32)                    # word rows of W0
    w0b = w0[De:De + Dp].astype(f32)             # pos rows of W0
    w0c = w0[De + Dp:].astype(f32)               # post rows of W0
    b0_2 = b0.reshape(1, H).astype(f32)
    w1_2 = w1.astype(f32)
    b1_2 = b1.reshape(1, H).astype(f32)

    flops = 2 * (N * (De + Dp + Dq) * H          # layer-0 linear (split)
                 + N * N * H                     # layer-0 adjacency matmul
                 + N * H * H                     # layer-1 linear
                 + N * N * H                     # layer-1 adjacency matmul
                 + B * N * H)                    # pooling matmul
    bytes_accessed = 4 * (N * N + N * (De + Dp + Dq) + B * N
                          + (De + Dp + Dq) * H + H * H + 2 * H + B * H)

    out = pl.pallas_call(
        gcn_absa_kernel,
        out_shape=jax.ShapeDtypeStruct((B, H), f32),
        grid_spec=pl.GridSpec(
            # Single grid step: no per-step overhead, no batch padding, and
            # 1-TC friendly (review: splitting this size across cores loses).
            grid=(1,),
            in_specs=[
                pl.BlockSpec((N, N), lambda i: (0, 0)),      # adj (block-diag)
                pl.BlockSpec((N, De), lambda i: (0, 0)),     # word embs
                pl.BlockSpec((N, Dp), lambda i: (0, 0)),     # pos embs
                pl.BlockSpec((N, Dq), lambda i: (0, 0)),     # post embs
                pl.BlockSpec((B, N), lambda i: (0, 0)),      # pooling matrix
                pl.BlockSpec((De, H), lambda i: (0, 0)),     # W0[:De]
                pl.BlockSpec((Dp, H), lambda i: (0, 0)),     # W0[De:De+Dp]
                pl.BlockSpec((Dq, H), lambda i: (0, 0)),     # W0[De+Dp:]
                pl.BlockSpec((1, H), lambda i: (0, 0)),      # b0
                pl.BlockSpec((H, H), lambda i: (0, 0)),      # W1
                pl.BlockSpec((1, H), lambda i: (0, 0)),      # b1
            ],
            out_specs=pl.BlockSpec((B, H), lambda i: (0, 0)),
        ),
        compiler_params=pltpu.CompilerParams(
            dimension_semantics=("arbitrary",)),
        cost_estimate=pl.CostEstimate(flops=flops, transcendentals=N,
                                      bytes_accessed=bytes_accessed),
    )(adj_bd, we, pe, qe, pool, w0a, w0b, w0c, b0_2, w1_2, b1_2)
    return out


# ------------------------------ glue (plain code) ----------------------------- #
def heads_to_adj(head, l, maxlen, directed=False, self_loop=True):
    """numpy equivalent of head_to_tree + tree_to_adj."""
    B = head.shape[0]
    adj = np.zeros((B, maxlen, maxlen), dtype=np.float32)
    for b in range(B):
        n = int(l[b])
        for i in range(n):
            h = int(head[b, i])
            if h > 0:                       # 1-indexed head; 0 == root
                adj[b, h - 1, i] = 1.0
        if not directed:
            adj[b] = adj[b] + adj[b].T
        if self_loop:
            for i in range(n):
                adj[b, i, i] = 1.0
    return adj


def reference_forward_np(adj, embs, mask, w0, b0, w1, b1):
    """float64 numpy gold reference of the same forward math."""
    adj = np.asarray(adj, np.float64)
    x = np.asarray(embs, np.float64)
    mask = np.asarray(mask, np.float64)
    w0, b0 = np.asarray(w0, np.float64), np.asarray(b0, np.float64)
    w1, b1 = np.asarray(w1, np.float64), np.asarray(b1, np.float64)
    denom = adj.sum(axis=2, keepdims=True) + 1.0
    for w, b in ((w0, b0), (w1, b1)):
        ax = adj @ x
        axw = ax @ w + b
        x = np.maximum(axw / denom, 0.0)
    asp_wn = mask.sum(axis=1, keepdims=True)
    return (x * mask[:, :, None]).sum(axis=1) / asp_wn


# ----------------------------------- main ------------------------------------ #
if __name__ == "__main__":
    args = Args()
    B, L = 8, 16
    in_dim = args.emb_dim + args.post_dim + args.pos_dim   # 48
    H = args.hidden_dim                                     # 32

    key = jax.random.PRNGKey(0)
    keys = jax.random.split(key, 10)

    # --- deterministic parameter init (padding_idx=0 rows zeroed) ---
    emb_w = jax.random.normal(keys[0], (args.tok_size, args.emb_dim), jnp.float32) * 0.1
    emb_w = emb_w.at[0].set(0.0)
    pos_w = jax.random.normal(keys[1], (args.pos_size, args.pos_dim), jnp.float32) * 0.1
    pos_w = pos_w.at[0].set(0.0)
    post_w = jax.random.normal(keys[2], (args.post_size, args.post_dim), jnp.float32) * 0.1
    post_w = post_w.at[0].set(0.0)
    W0 = jax.random.normal(keys[3], (in_dim, H), jnp.float32) * 0.1
    b0 = jax.random.normal(keys[4], (H,), jnp.float32) * 0.1
    W1 = jax.random.normal(keys[5], (H, H), jnp.float32) * 0.1
    b1 = jax.random.normal(keys[6], (H,), jnp.float32) * 0.1

    # --- deterministic example inputs ---
    l = np.array([16, 12, 16, 10, 14, 16, 9, 11], dtype=np.int32)   # true seq lengths
    tok = np.array(jax.random.randint(keys[7], (B, L), 1, args.tok_size), dtype=np.int32)
    pos = np.array(jax.random.randint(keys[8], (B, L), 1, args.pos_size), dtype=np.int32)
    post = np.array(jax.random.randint(keys[9], (B, L), 1, args.post_size), dtype=np.int32)
    for b in range(B):                                      # zero out padding positions
        tok[b, l[b]:] = 0
        pos[b, l[b]:] = 0
        post[b, l[b]:] = 0
    # chain dependency tree: token i's head is token i (1-indexed), token 0 is root
    head = np.zeros((B, L), dtype=np.int32)
    for b in range(B):
        for i in range(1, int(l[b])):
            head[b, i] = i
    # aspect mask: a couple of tokens per sentence (always within the true length)
    mask = np.zeros((B, L), dtype=np.float32)
    for b in range(B):
        s = b % 4
        mask[b, s:s + 2] = 1.0

    maxlen = int(l.max())
    assert maxlen == L  # batch is padded to maxlen, as in the original model

    # adjacency from dependency heads (head_to_tree / tree_to_adj equivalent)
    adj = jnp.asarray(heads_to_adj(head, l, maxlen,
                                   directed=args.direct, self_loop=args.loop))

    # embedding lookups (data-dependent gathers stay in plain JAX; no concat --
    # the kernel takes the three tables separately and splits W0 instead)
    word_embs = jnp.take(emb_w, jnp.asarray(tok), axis=0)
    pos_embs = jnp.take(pos_w, jnp.asarray(pos), axis=0)
    post_embs = jnp.take(post_w, jnp.asarray(post), axis=0)
    # TODO(synk): flag=True path (zeroing embs[0, mask_pos]) not exercised; default flag=False.

    mask_j = jnp.asarray(mask)

    out = gcn_absa_forward(adj, word_embs, pos_embs, post_embs, mask_j,
                           W0, b0, W1, b1)
    out = jax.block_until_ready(out)
    assert out.shape == (B, H)

    # float64 numpy gold reference (avoids any XLA matmul-precision ambiguity)
    embs_np = np.concatenate([np.asarray(word_embs), np.asarray(pos_embs),
                              np.asarray(post_embs)], axis=2)
    ref = reference_forward_np(np.asarray(adj), embs_np, mask, np.asarray(W0),
                               np.asarray(b0), np.asarray(W1), np.asarray(b1))

    # exact division + Precision.HIGHEST matmuls -> ~10x tighter than before
    np.testing.assert_allclose(np.asarray(out, np.float64), ref,
                               rtol=1e-3, atol=1e-5)

    print("KERNEL_OK")
</pallas_src>

<mosaic_0001>
module attributes {stable_mosaic.version = 11 : i64} {
  func.func @gcn_absa_kernel(%arg0: i32, %arg1: memref<128x128xf32, #tpu.memory_space<vmem>>, %arg2: memref<128x32xf32, #tpu.memory_space<vmem>>, %arg3: memref<128x8xf32, #tpu.memory_space<vmem>>, %arg4: memref<128x8xf32, #tpu.memory_space<vmem>>, %arg5: memref<8x128xf32, #tpu.memory_space<vmem>>, %arg6: memref<32x32xf32, #tpu.memory_space<vmem>>, %arg7: memref<8x32xf32, #tpu.memory_space<vmem>>, %arg8: memref<8x32xf32, #tpu.memory_space<vmem>>, %arg9: memref<1x32xf32, #tpu.memory_space<vmem>>, %arg10: memref<32x32xf32, #tpu.memory_space<vmem>>, %arg11: memref<1x32xf32, #tpu.memory_space<vmem>>, %arg12: memref<8x32xf32, #tpu.memory_space<vmem>>) attributes {dimension_semantics = [#tpu.dimension_semantics<arbitrary>], iteration_bounds = array<i64: 1>, scalar_prefetch = 0 : i64, scratch_operands = 0 : i64, tpu.core_type = #tpu.core_type<tc>, window_params = [{pipeline_mode = #tpu.pipeline_mode<synchronous>, transform_indices = @transform_0, window_bounds = array<i64: 128, 128>}, {pipeline_mode = #tpu.pipeline_mode<synchronous>, transform_indices = @transform_1, window_bounds = array<i64: 128, 32>}, {pipeline_mode = #tpu.pipeline_mode<synchronous>, transform_indices = @transform_2, window_bounds = array<i64: 128, 8>}, {pipeline_mode = #tpu.pipeline_mode<synchronous>, transform_indices = @transform_3, window_bounds = array<i64: 128, 8>}, {pipeline_mode = #tpu.pipeline_mode<synchronous>, transform_indices = @transform_4, window_bounds = array<i64: 8, 128>}, {pipeline_mode = #tpu.pipeline_mode<synchronous>, transform_indices = @transform_5, window_bounds = array<i64: 32, 32>}, {pipeline_mode = #tpu.pipeline_mode<synchronous>, transform_indices = @transform_6, window_bounds = array<i64: 8, 32>}, {pipeline_mode = #tpu.pipeline_mode<synchronous>, transform_indices = @transform_7, window_bounds = array<i64: 8, 32>}, {pipeline_mode = #tpu.pipeline_mode<synchronous>, transform_indices = @transform_8, window_bounds = array<i64: 1, 32>}, {pipeline_mode = #tpu.pipeline_mode<synchronous>, transform_indices = @transform_9, window_bounds = array<i64: 32, 32>}, {pipeline_mode = #tpu.pipeline_mode<synchronous>, transform_indices = @transform_10, window_bounds = array<i64: 1, 32>}, {pipeline_mode = #tpu.pipeline_mode<synchronous>, transform_indices = @transform_11, window_bounds = array<i64: 8, 32>}]} {
    %c0 = arith.constant 0 : index
    %c0_0 = arith.constant 0 : index
    %0 = vector.load %arg1[%c0, %c0_0] : memref<128x128xf32, #tpu.memory_space<vmem>>, vector<128x128xf32>
    %cst = arith.constant dense<0.000000e+00> : vector<128xf32>
    %1 = vector.multi_reduction <add>, %0, %cst [1] : vector<128x128xf32> to vector<128xf32>
    %2 = vector.shape_cast %1 : vector<128xf32> to vector<128x1xf32>
    %cst_1 = arith.constant 1.000000e+00 : f32
    %3 = vector.broadcast %cst_1 : f32 to vector<128x1xf32>
    %4 = arith.addf %2, %3 : vector<128x1xf32>
    %cst_2 = arith.constant 1.000000e+00 : f32
    %5 = vector.broadcast %cst_2 : f32 to vector<128x1xf32>
    %6 = arith.divf %5, %4 : vector<128x1xf32>
    %c0_3 = arith.constant 0 : index
    %c0_4 = arith.constant 0 : index
    %7 = vector.load %arg2[%c0_3, %c0_4] : memref<128x32xf32, #tpu.memory_space<vmem>>, vector<128x32xf32>
    %c0_5 = arith.constant 0 : index
    %c0_6 = arith.constant 0 : index
    %8 = vector.load %arg6[%c0_5, %c0_6] : memref<32x32xf32, #tpu.memory_space<vmem>>, vector<32x32xf32>
    %cst_7 = arith.constant dense<0.000000e+00> : vector<128x32xf32>
    %9 = tpu.matmul %7, %8, %cst_7 {dimension_numbers = #tpu.dot_dimension_numbers<[1], [0], [0], [1], [0, 0, 1, 1], [], []>, precision = #tpu.contract_precision<fp32>} : vector<128x32xf32>, vector<32x32xf32>, vector<128x32xf32> -> vector<128x32xf32>
    %c0_8 = arith.constant 0 : index
    %c0_9 = arith.constant 0 : index
    %10 = vector.load %arg3[%c0_8, %c0_9] : memref<128x8xf32, #tpu.memory_space<vmem>>, vector<128x8xf32>
    %c0_10 = arith.constant 0 : index
    %c0_11 = arith.constant 0 : index
    %11 = vector.load %arg7[%c0_10, %c0_11] : memref<8x32xf32, #tpu.memory_space<vmem>>, vector<8x32xf32>
    %cst_12 = arith.constant dense<0.000000e+00> : vector<128x32xf32>
    %12 = tpu.matmul %10, %11, %cst_12 {dimension_numbers = #tpu.dot_dimension_numbers<[1], [0], [0], [1], [0, 0, 1, 1], [], []>, precision = #tpu.contract_precision<fp32>} : vector<128x8xf32>, vector<8x32xf32>, vector<128x32xf32> -> vector<128x32xf32>
    %13 = arith.addf %9, %12 : vector<128x32xf32>
    %c0_13 = arith.constant 0 : index
    %c0_14 = arith.constant 0 : index
    %14 = vector.load %arg4[%c0_13, %c0_14] : memref<128x8xf32, #tpu.memory_space<vmem>>, vector<128x8xf32>
    %c0_15 = arith.constant 0 : index
    %c0_16 = arith.constant 0 : index
    %15 = vector.load %arg8[%c0_15, %c0_16] : memref<8x32xf32, #tpu.memory_space<vmem>>, vector<8x32xf32>
    %cst_17 = arith.constant dense<0.000000e+00> : vector<128x32xf32>
    %16 = tpu.matmul %14, %15, %cst_17 {dimension_numbers = #tpu.dot_dimension_numbers<[1], [0], [0], [1], [0, 0, 1, 1], [], []>, precision = #tpu.contract_precision<fp32>} : vector<128x8xf32>, vector<8x32xf32>, vector<128x32xf32> -> vector<128x32xf32>
    %17 = arith.addf %13, %16 : vector<128x32xf32>
    %cst_18 = arith.constant dense<0.000000e+00> : vector<128x32xf32>
    %18 = tpu.matmul %0, %17, %cst_18 {dimension_numbers = #tpu.dot_dimension_numbers<[1], [0], [0], [1], [0, 0, 1, 1], [], []>, precision = #tpu.contract_precision<fp32>} : vector<128x128xf32>, vector<128x32xf32>, vector<128x32xf32> -> vector<128x32xf32>
    %c0_19 = arith.constant 0 : index
    %c0_20 = arith.constant 0 : index
    %19 = vector.load %arg9[%c0_19, %c0_20] : memref<1x32xf32, #tpu.memory_space<vmem>>, vector<1x32xf32>
    %20 = vector.broadcast %19 : vector<1x32xf32> to vector<128x32xf32>
    %21 = arith.addf %18, %20 : vector<128x32xf32>
    %22 = vector.broadcast %6 : vector<128x1xf32> to vector<128x32xf32>
    %23 = arith.mulf %21, %22 : vector<128x32xf32>
    %cst_21 = arith.constant 0.000000e+00 : f32
    %24 = vector.broadcast %cst_21 : f32 to vector<128x32xf32>
    %25 = arith.maximumf %23, %24 : vector<128x32xf32>
    %c0_22 = arith.constant 0 : index
    %c0_23 = arith.constant 0 : index
    %26 = vector.load %arg10[%c0_22, %c0_23] : memref<32x32xf32, #tpu.memory_space<vmem>>, vector<32x32xf32>
    %cst_24 = arith.constant dense<0.000000e+00> : vector<128x32xf32>
    %27 = tpu.matmul %25, %26, %cst_24 {dimension_numbers = #tpu.dot_dimension_numbers<[1], [0], [0], [1], [0, 0, 1, 1], [], []>, precision = #tpu.contract_precision<fp32>} : vector<128x32xf32>, vector<32x32xf32>, vector<128x32xf32> -> vector<128x32xf32>
    %cst_25 = arith.constant dense<0.000000e+00> : vector<128x32xf32>
    %28 = tpu.matmul %0, %27, %cst_25 {dimension_numbers = #tpu.dot_dimension_numbers<[1], [0], [0], [1], [0, 0, 1, 1], [], []>, precision = #tpu.contract_precision<fp32>} : vector<128x128xf32>, vector<128x32xf32>, vector<128x32xf32> -> vector<128x32xf32>
    %c0_26 = arith.constant 0 : index
    %c0_27 = arith.constant 0 : index
    %29 = vector.load %arg11[%c0_26, %c0_27] : memref<1x32xf32, #tpu.memory_space<vmem>>, vector<1x32xf32>
    %30 = vector.broadcast %29 : vector<1x32xf32> to vector<128x32xf32>
    %31 = arith.addf %28, %30 : vector<128x32xf32>
    %32 = vector.broadcast %6 : vector<128x1xf32> to vector<128x32xf32>
    %33 = arith.mulf %31, %32 : vector<128x32xf32>
    %cst_28 = arith.constant 0.000000e+00 : f32
    %34 = vector.broadcast %cst_28 : f32 to vector<128x32xf32>
    %35 = arith.maximumf %33, %34 : vector<128x32xf32>
    %c0_29 = arith.constant 0 : index
    %c0_30 = arith.constant 0 : index
    %36 = vector.load %arg5[%c0_29, %c0_30] : memref<8x128xf32, #tpu.memory_space<vmem>>, vector<8x128xf32>
    %cst_31 = arith.constant dense<0.000000e+00> : vector<8x32xf32>
    %37 = tpu.matmul %36, %35, %cst_31 {dimension_numbers = #tpu.dot_dimension_numbers<[1], [0], [0], [1], [0, 0, 1, 1], [], []>, precision = #tpu.contract_precision<fp32>} : vector<8x128xf32>, vector<128x32xf32>, vector<8x32xf32> -> vector<8x32xf32>
    %c0_32 = arith.constant 0 : index
    %c0_33 = arith.constant 0 : index
    %38 = vector.load %arg12[%c0_32, %c0_33] : memref<8x32xf32, #tpu.memory_space<vmem>>, vector<8x32xf32>
    tpu.vector_store %arg12[%c0_32, %c0_33], %37 {strides = array<i32>} : memref<8x32xf32, #tpu.memory_space<vmem>>, vector<8x32xf32>,
    return
  }
  func.func @transform_0(%arg0: i32) -> (i32, i32) {
    %c0_i32 = arith.constant 0 : i32
    %c0_i32_0 = arith.constant 0 : i32
    %c0_i32_1 = arith.constant 0 : i32
    return %c0_i32, %c0_i32_0 : i32, i32
  }
  func.func @transform_1(%arg0: i32) -> (i32, i32) {
    %c0_i32 = arith.constant 0 : i32
    %c0_i32_0 = arith.constant 0 : i32
    %c0_i32_1 = arith.constant 0 : i32
    return %c0_i32, %c0_i32_0 : i32, i32
  }
  func.func @transform_2(%arg0: i32) -> (i32, i32) {
    %c0_i32 = arith.constant 0 : i32
    %c0_i32_0 = arith.constant 0 : i32
    %c0_i32_1 = arith.constant 0 : i32
    return %c0_i32, %c0_i32_0 : i32, i32
  }
  func.func @transform_3(%arg0: i32) -> (i32, i32) {
    %c0_i32 = arith.constant 0 : i32
    %c0_i32_0 = arith.constant 0 : i32
    %c0_i32_1 = arith.constant 0 : i32
    return %c0_i32, %c0_i32_0 : i32, i32
  }
  func.func @transform_4(%arg0: i32) -> (i32, i32) {
    %c0_i32 = arith.constant 0 : i32
    %c0_i32_0 = arith.constant 0 : i32
    %c0_i32_1 = arith.constant 0 : i32
    return %c0_i32, %c0_i32_0 : i32, i32
  }
  func.func @transform_5(%arg0: i32) -> (i32, i32) {
    %c0_i32 = arith.constant 0 : i32
    %c0_i32_0 = arith.constant 0 : i32
    %c0_i32_1 = arith.constant 0 : i32
    return %c0_i32, %c0_i32_0 : i32, i32
  }
  func.func @transform_6(%arg0: i32) -> (i32, i32) {
    %c0_i32 = arith.constant 0 : i32
    %c0_i32_0 = arith.constant 0 : i32
    %c0_i32_1 = arith.constant 0 : i32
    return %c0_i32, %c0_i32_0 : i32, i32
  }
  func.func @transform_7(%arg0: i32) -> (i32, i32) {
    %c0_i32 = arith.constant 0 : i32
    %c0_i32_0 = arith.constant 0 : i32
    %c0_i32_1 = arith.constant 0 : i32
    return %c0_i32, %c0_i32_0 : i32, i32
  }
  func.func @transform_8(%arg0: i32) -> (i32, i32) {
    %c0_i32 = arith.constant 0 : i32
    %c0_i32_0 = arith.constant 0 : i32
    %c0_i32_1 = arith.constant 0 : i32
    return %c0_i32, %c0_i32_0 : i32, i32
  }
  func.func @transform_9(%arg0: i32) -> (i32, i32) {
    %c0_i32 = arith.constant 0 : i32
    %c0_i32_0 = arith.constant 0 : i32
    %c0_i32_1 = arith.constant 0 : i32
    return %c0_i32, %c0_i32_0 : i32, i32
  }
  func.func @transform_10(%arg0: i32) -> (i32, i32) {
    %c0_i32 = arith.constant 0 : i32
    %c0_i32_0 = arith.constant 0 : i32
    %c0_i32_1 = arith.constant 0 : i32
    return %c0_i32, %c0_i32_0 : i32, i32
  }
  func.func @transform_11(%arg0: i32) -> (i32, i32) {
    %c0_i32 = arith.constant 0 : i32
    %c0_i32_0 = arith.constant 0 : i32
    %c0_i32_1 = arith.constant 0 : i32
    return %c0_i32, %c0_i32_0 : i32, i32
  }
}

</mosaic_0001>

<bundles_post_ra>
// kernel: tpu_custom_call.1
= control target key start
LH: loop header
LB: loop body
LE: loop exit
PB: predicated region body
PF: predicated region fallthrough
CT: control target
= control target key end

     0   :  { %vm380_vm0 = vcmask 64512   ;;  %s8876_s0 = inlined_call_operand.vmem [shape: f32[128,128], index: 0, kind: input, shape index: {}]   ;;  %s8877_s1 = inlined_call_operand.vmem [shape: f32[128,32], index: 1, kind: input, shape index: {}]   ;;  %s8878_s2 = inlined_call_operand.vmem [shape: f32[128,8], index: 2, kind: input, shape index: {}]   ;;  %s8879_s3 = inlined_call_operand.vmem [shape: f32[128,8], index: 3, kind: input, shape index: {}]   ;;  %s8880_s4 = inlined_call_operand.vmem [shape: f32[8,128], index: 4, kind: input, shape index: {}]   ;;  %s8881_s5 = inlined_call_operand.vmem [shape: f32[32,32], index: 5, kind: input, shape index: {}]   ;;  %s8882_s6 = inlined_call_operand.vmem [shape: f32[8,32], index: 6, kind: input, shape index: {}]   ;;  %s8883_s7 = inlined_call_operand.vmem [shape: f32[8,32], index: 7, kind: input, shape index: {}]   ;;  %s8884_s8 = inlined_call_operand.vmem [shape: f32[1,32], index: 8, kind: input, shape index: {}]   ;;  %s8885_s9 = inlined_call_operand.vmem [shape: f32[32,32], index: 9, kind: input, shape index: {}]   ;;  %s8886_s10 = inlined_call_operand.vmem [shape: f32[1,32], index: 10, kind: input, shape index: {}]   ;;  %s8887_s11 = inlined_call_operand.hbm [shape: f32[8,32], index: 11, kind: output, shape index: {}]  }
   0x1   :  { %v379_v0 = vld [vmem:[%s8882_s6] sm:$0xff]  ;;  %v377_v2 = vld [vmem:[%s8878_s2 + $0x70] sm:$0xff]  ;;  %v364_v6 = vld [vmem:[%s8878_s2 + $0x8] sm:$0xff] }
   0x2   :  { %v363_v1 = vld [vmem:[%s8878_s2] sm:$0xff]  ;;  %v444_v3 = vand.u32 4294901760, %v379_v0  ;;  %v424_v5 = vsel %vm380_vm0, %v377_v2, 0  ;;  %v378_v7 = vld [vmem:[%s8878_s2 + $0x78] sm:$0xff]  ;;  %v365_v8 = vld [vmem:[%s8878_s2 + $0x10] sm:$0xff]  ;;  %v385_v11 = vsel %vm380_vm0, %v364_v6, 0 }
   0x3   :  { %v382_v4 = vsel %vm380_vm0, %v363_v1, 0  ;;  %v5323_v10 = vand.u32 4294901760, %v424_v5  ;;  %v427_v12 = vsel %vm380_vm0, %v378_v7, 0  ;;  %v5327_v14 = vand.u32 4294901760, %v385_v11 }
   0x4   :  { %v5321_v9 = vand.u32 4294901760, %v382_v4  ;;  %445 = vmatpush.msra.mxu0 %v444_v3  ;;  %5176 = vmatpush.msra.mxu2 %v444_v3  ;;  %v591_v13 = vsub.f32 %v379_v0, %v444_v3  ;;  %v5329_v15 = vand.u32 4294901760, %v427_v12  ;;  %v388_v18 = vsel %vm380_vm0, %v365_v8, 0 }
   0x5   :  { %v5333_v17 = vsub.f32 %v424_v5, %v5323_v10 }
   0x6   :  { %v447_v16 = vsub.f32 %v382_v4, %v5321_v9 }
   0x7   :  { %16 = vsyncpa [#allocation3], 0  ;;  %v592_v19 = vand.u32 4294901760, %v591_v13  ;;  %v455_v20 = vsub.f32 %v385_v11, %v5327_v14  ;;  %v5338_v21 = vsub.f32 %v427_v12, %v5329_v15  ;;  %678 = vmatpush.msrb.mxu2 %v591_v13  ;;  %v560_v23 = vand.u32 4294901760, %v5333_v17  ;;  %v366_v33 = vld [vmem:[%s8878_s2 + $0x18] sm:$0xff]  ;;  %v367_v42 = vld [vmem:[%s8878_s2 + $0x20] sm:$0xff] }
   0x8   :  { %v448_v22 = vand.u32 4294901760, %v447_v16  ;;  %v5341_v25 = vand.u32 4294901760, %v388_v18  ;;  %v391_v37 = vsel %vm380_vm0, %v366_v33, 0  ;;  %v394_v45 = vsel %vm380_vm0, %v367_v42, 0  ;;  %v368_v49 = vld [vmem:[%s8878_s2 + $0x28] sm:$0xff]  ;;  %v369_v56 = vld [vmem:[%s8878_s2 + $0x30] sm:$0xff] }
   0x9   :  { %v593_v24 = vsub.f32 %v591_v13, %v592_v19  ;;  %892 = vmatpush.msrb.mxu0 %v592_v19  ;;  %v561_v27 = vsub.f32 %v5333_v17, %v560_v23  ;;  %v456_v28 = vand.u32 4294901760, %v455_v20  ;;  %v568_v29 = vand.u32 4294901760, %v5338_v21  ;;  %v370_v63 = vld [vmem:[%s8878_s2 + $0x38] sm:$0xff]  ;;  %v371_v6 = vld [vmem:[%s8878_s2 + $0x40] sm:$0xff]  ;;  %s5167_s30 = sshll.u32 %s8887_s11, 4  ;;  %s5168_s30 = int_to_ptr.hbm [resolvable:$true] %s5167_s30 }
   0xa   :  { %v449_v26 = vsub.f32 %v447_v16, %v448_v22  ;;  %v463_v36 = vsub.f32 %v388_v18, %v5341_v25  ;;  %v5357_v41 = vand.u32 4294901760, %v391_v37  ;;  %v5366_v48 = vand.u32 4294901760, %v394_v45  ;;  %v372_v18 = vld [vmem:[%s8878_s2 + $0x48] sm:$0xff] }
   0xb   :  { %v594_v30 = vand.u32 4294901760, %v593_v24  ;;  %v562_v32 = vand.u32 4294901760, %v561_v27  ;;  %v457_v34 = vsub.f32 %v455_v20, %v456_v28  ;;  %v569_v35 = vsub.f32 %v5338_v21, %v568_v29 }
   0xc   :  { %v450_v31 = vand.u32 4294901760, %v449_v26  ;;  %v464_v40 = vand.u32 4294901760, %v463_v36  ;;  %v471_v44 = vsub.f32 %v391_v37, %v5357_v41  ;;  %v479_v51 = vsub.f32 %v394_v45, %v5366_v48 }
   0xd   :  { %595 = vmatpush.msra.mxu1 %v594_v30  ;;  %5177 = vmatpush.msra.mxu3 %v594_v30  ;;  %v458_v38 = vand.u32 4294901760, %v457_v34  ;;  %v570_v39 = vand.u32 4294901760, %v569_v35  ;;  %v397_v52 = vsel %vm380_vm0, %v368_v49, 0  ;;  %v400_v59 = vsel %vm380_vm0, %v369_v56, 0 }
   0xe   :  { %451 = vmatmul.f32.vlgmr.msra.gmra.mxu0 %v450_v31  ;;  %563 = vmatmul.f32.vlgmr.msra.gmra.mxu2 %v562_v32  ;;  %v465_v43 = vsub.f32 %v463_v36, %v464_v40  ;;  %v472_v47 = vand.u32 4294901760, %v471_v44  ;;  %v480_v54 = vand.u32 4294901760, %v479_v51  ;;  %v5374_v55 = vand.u32 4294901760, %v397_v52 }
   0xf   :  { %597 = vmatmul.f32.vlgmr.msra.gmra.mxu1 %v5321_v9  ;;  %653 = vmatmul.f32.vlgmr.msra.gmra.mxu3 %v5323_v10  ;;  %v5382_v62 = vand.u32 4294901760, %v400_v59  ;;  %v403_v2 = vsel %vm380_vm0, %v370_v63, 0  ;;  %v406_v11 = vsel %vm380_vm0, %v371_v6, 0  ;;  %vm1040_vm1 = vcmask 261120  }
  0x10   :  { %776 = vmatpush.msrb.mxu3 %v444_v3  ;;  %974 = vmatpush.msrb.mxu1 %v444_v3  ;;  %v466_v46 = vand.u32 4294901760, %v465_v43  ;;  %v473_v50 = vsub.f32 %v471_v44, %v472_v47  ;;  %v481_v57 = vsub.f32 %v479_v51, %v480_v54  ;;  %v487_v58 = vsub.f32 %v397_v52, %v5374_v55  ;;  %v376_v52 = vld [vmem:[%s8878_s2 + $0x68] sm:$0xff] }
  0x11   :  { %v495_v1 = vsub.f32 %v400_v59, %v5382_v62  ;;  %v5390_v5 = vand.u32 4294901760, %v403_v2  ;;  %v421_v56 = vsel %vm380_vm0, %v376_v52, 0 }
  0x12   :  { %v474_v53 = vand.u32 4294901760, %v473_v50  ;;  %v482_v60 = vand.u32 4294901760, %v481_v57  ;;  %v488_v61 = vand.u32 4294901760, %v487_v58  ;;  %v5441_v59 = vand.u32 4294901760, %v421_v56 }
  0x13   :  { %v496_v4 = vand.u32 4294901760, %v495_v1  ;;  %v503_v8 = vsub.f32 %v403_v2, %v5390_v5  ;;  %v362_v2 = vld [vmem:[%s8881_s5 + $0x18] sm:$0xff] }
  0x14   :  { %v489_v0 = vsub.f32 %v487_v58, %v488_v61 }
  0x15   :  { %v497_v7 = vsub.f32 %v495_v1, %v496_v4  ;;  %v504_v13 = vand.u32 4294901760, %v503_v8 }
  0x16   :  { %459 = vmatmul.f32.gmra.mxu0 %v458_v38  ;;  %571 = vmatmul.f32.gmra.mxu2 %v570_v39  ;;  %v490_v3 = vand.u32 4294901760, %v489_v0 }
  0x17   :  { %601 = vmatmul.f32.gmra.mxu1 %v5327_v14  ;;  %657 = vmatmul.f32.gmra.mxu3 %v5329_v15  ;;  %v498_v12 = vand.u32 4294901760, %v497_v7  ;;  %v505_v19 = vsub.f32 %v503_v8, %v504_v13 }
  0x19   :  { %v506_v24 = vand.u32 4294901760, %v505_v19  ;;  %v359_v19 = vld [vmem:[%s8881_s5] sm:$0xff] }
  0x1e   :  { %467 = vmatmul.f32.gmra.mxu0 %v466_v46  ;;  %681 = vmatmul.f32.vlgmr.msrb.gmra.mxu2 %v447_v16  ;;  %v5398_v16 = vand.u32 4294901760, %v406_v11 }
  0x1f   :  { %605 = vmatmul.f32.gmra.mxu1 %v5341_v25  ;;  %780 = vmatmul.f32.vlgmr.msrb.gmra.mxu3 %v448_v22  ;;  %v409_v22 = vsel %vm380_vm0, %v372_v18, 0 }
  0x20   :  { %v5406_v27 = vand.u32 4294901760, %v409_v22 }
  0x22   :  { %v519_v31 = vsub.f32 %v409_v22, %v5406_v27 }
  0x24   :  { %v520_v34 = vand.u32 4294901760, %v519_v31 }
  0x26   :  { %475 = vmatmul.f32.gmra.mxu0 %v474_v53  ;;  %686 = vmatmul.f32.gmra.mxu2 %v455_v20  ;;  %v511_v20 = vsub.f32 %v406_v11, %v5398_v16  ;;  %v521_v37 = vsub.f32 %v519_v31, %v520_v34  ;;  %v360_v11 = vld [vmem:[%s8881_s5 + $0x8] sm:$0xff] }
  0x27   :  { %609 = vmatmul.f32.gmra.mxu1 %v5357_v41  ;;  %786 = vmatmul.f32.gmra.mxu3 %v456_v28  ;;  %v373_v28 = vld [vmem:[%s8878_s2 + $0x50] sm:$0xff] }
  0x28   :  { %v512_v26 = vand.u32 4294901760, %v511_v20  ;;  %v412_v32 = vsel %vm380_vm0, %v373_v28, 0 }
  0x29   :  { %v5414_v35 = vand.u32 4294901760, %v412_v32 }
  0x2a   :  { %v513_v30 = vsub.f32 %v511_v20, %v512_v26 }
  0x2b   :  { %v527_v38 = vsub.f32 %v412_v32, %v5414_v35 }
  0x2c   :  { %v514_v33 = vand.u32 4294901760, %v513_v30 }
  0x2d   :  { %v528_v42 = vand.u32 4294901760, %v527_v38 }
  0x2e   :  { %483 = vmatmul.f32.gmra.mxu0 %v482_v60  ;;  %691 = vmatmul.f32.gmra.mxu2 %v463_v36  ;;  %v374_v36 = vld [vmem:[%s8878_s2 + $0x58] sm:$0xff] }
  0x2f   :  { %613 = vmatmul.f32.gmra.mxu1 %v5366_v48  ;;  %792 = vmatmul.f32.gmra.mxu3 %v464_v40  ;;  %v415_v39 = vsel %vm380_vm0, %v374_v36, 0  ;;  %v522_v40 = vand.u32 4294901760, %v521_v37  ;;  %v529_v45 = vsub.f32 %v527_v38, %v528_v42 }
  0x30   :  { %v5422_v43 = vand.u32 4294901760, %v415_v39 }
  0x31   :  { %v530_v49 = vand.u32 4294901760, %v529_v45 }
  0x32   :  { %v535_v46 = vsub.f32 %v415_v39, %v5422_v43 }
  0x34   :  { %v536_v50 = vand.u32 4294901760, %v535_v46 }
  0x36   :  { %491 = vmatmul.f32.gmra.mxu0 %v490_v3  ;;  %696 = vmatmul.f32.gmra.mxu2 %v471_v44  ;;  %v375_v44 = vld [vmem:[%s8878_s2 + $0x60] sm:$0xff]  ;;  %v537_v53 = vsub.f32 %v535_v46, %v536_v50  ;;  %v1101_v3 = vand.u32 4294901760, %v362_v2 }
  0x37   :  { %617 = vmatmul.f32.gmra.mxu1 %v5374_v55  ;;  %798 = vmatmul.f32.gmra.mxu3 %v472_v47  ;;  %v418_v47 = vsel %vm380_vm0, %v375_v44, 0 }
  0x38   :  { %v538_v57 = vand.u32 4294901760, %v537_v53  ;;  %1102 = vmatpush.msra.mxu2 %v1101_v3  ;;  %v1251_v7 = vsub.f32 %v362_v2, %v1101_v3  ;;  %1457 = vmatpush.msra.mxu1 %v1101_v3 }
  0x3a   :  { %1353 = vmatpush.msra.mxu0 %v1251_v7 }
  0x3e   :  { %499 = vmatmul.f32.gmra.mxu0 %v498_v12  ;;  %701 = vmatmul.f32.gmra.mxu2 %v479_v51  ;;  %v5430_v51 = vand.u32 4294901760, %v418_v47  ;;  %v1252_v12 = vand.u32 4294901760, %v1251_v7 }
  0x3f   :  { %621 = vmatmul.f32.gmra.mxu1 %v5382_v62  ;;  %804 = vmatmul.f32.gmra.mxu3 %v480_v54 }
  0x40   :  { %v5436_v54 = vsub.f32 %v418_v47, %v5430_v51 }
  0x46   :  { %507 = vmatmul.f32.gmra.mxu0 %v506_v24  ;;  %706 = vmatmul.f32.gmra.mxu2 %v487_v58  ;;  %v544_v58 = vand.u32 4294901760, %v5436_v54  ;;  %v1107_v24 = vand.u32 4294901760, %v359_v19 }
  0x47   :  { %625 = vmatmul.f32.gmra.mxu1 %v5390_v5  ;;  %810 = vmatmul.f32.gmra.mxu3 %v488_v61  ;;  %v5445_v61 = vsub.f32 %v421_v56, %v5441_v59 }
  0x48   :  { %v545_v60 = vsub.f32 %v5436_v54, %v544_v58  ;;  %v1269_v32 = vsub.f32 %v359_v19, %v1107_v24 }
  0x49   :  { %v552_v0 = vand.u32 4294901760, %v5445_v61 }
  0x4a   :  { %v546_v63 = vand.u32 4294901760, %v545_v60  ;;  %v1270_v36 = vand.u32 4294901760, %v1269_v32 }
  0x4e   :  { %515 = vmatmul.f32.gmra.mxu0 %v514_v33  ;;  %711 = vmatmul.f32.gmra.mxu2 %v495_v1  ;;  %v553_v1 = vsub.f32 %v5445_v61, %v552_v0 }
  0x4f   :  { %629 = vmatmul.f32.gmra.mxu1 %v5398_v16  ;;  %816 = vmatmul.f32.gmra.mxu3 %v496_v4  ;;  %v361_v4 = vld [vmem:[%s8881_s5 + $0x10] sm:$0xff] }
  0x50   :  { %v554_v6 = vand.u32 4294901760, %v553_v1 }
  0x56   :  { %523 = vmatmul.f32.gmra.mxu0 %v522_v40  ;;  %716 = vmatmul.f32.gmra.mxu2 %v503_v8  ;;  %v1103_v8 = vand.u32 4294901760, %v361_v4  ;;  %v343_v40 = vld [vmem:[%s8877_s1] sm:$0xff] }
  0x57   :  { %633 = vmatmul.f32.gmra.mxu1 %v5406_v27  ;;  %822 = vmatmul.f32.gmra.mxu3 %v504_v13  ;;  %v1105_v13 = vand.u32 4294901760, %v360_v11 }
  0x58   :  { %1104 = vmatpush.msra.mxu2 %v1103_v8  ;;  %v1257_v18 = vsub.f32 %v361_v4, %v1103_v8  ;;  %1459 = vmatpush.msra.mxu1 %v1103_v8 }
  0x5a   :  { %v1258_v22 = vand.u32 4294901760, %v1257_v18  ;;  %1106 = vmatpush.msra.mxu2 %v1105_v13  ;;  %1356 = vmatpush.msra.mxu0 %v1257_v18 }
  0x5b   :  { %1461 = vmatpush.msra.mxu1 %v1105_v13 }
  0x5c   :  { %v1259_v30 = vsub.f32 %v1257_v18, %v1258_v22  ;;  %1108 = vmatpush.msra.mxu2 %v1107_v24 }
  0x5d   :  { %1463 = vmatpush.msra.mxu1 %v1107_v24 }
  0x5e   :  { %531 = vmatmul.f32.gmra.mxu0 %v530_v49  ;;  %721 = vmatmul.f32.gmra.mxu2 %v511_v20  ;;  %v1253_v20 = vsub.f32 %v1251_v7, %v1252_v12  ;;  %v1260_v33 = vand.u32 4294901760, %v1259_v30 }
  0x5f   :  { %637 = vmatmul.f32.gmra.mxu1 %v5414_v35  ;;  %828 = vmatmul.f32.gmra.mxu3 %v512_v26  ;;  %v1263_v26 = vsub.f32 %v360_v11, %v1105_v13 }
  0x60   :  { %v1254_v28 = vand.u32 4294901760, %v1253_v20  ;;  %1576 = vmatpush.msrb.mxu2 %v1252_v12 }
  0x61   :  { %1359 = vmatpush.msra.mxu0 %v1263_v26 }
  0x62   :  { %1255 = vmatpush.msra.mxu3 %v1254_v28  ;;  %1580 = vmatpush.msrb.mxu2 %v1258_v22 }
  0x63   :  { %1362 = vmatpush.msra.mxu0 %v1269_v32 }
  0x64   :  { %1261 = vmatpush.msra.mxu3 %v1260_v33 }
  0x66   :  { %539 = vmatmul.f32.gmra.mxu0 %v538_v57  ;;  %726 = vmatmul.f32.gmra.mxu2 %v519_v31  ;;  %v1264_v31 = vand.u32 4294901760, %v1263_v26 }
  0x67   :  { %641 = vmatmul.f32.gmra.mxu1 %v5422_v43  ;;  %834 = vmatmul.f32.gmra.mxu3 %v520_v34 }
  0x68   :  { %v1265_v34 = vsub.f32 %v1263_v26, %v1264_v31  ;;  %1584 = vmatpush.msrb.mxu2 %v1264_v31 }
  0x6a   :  { %v1266_v37 = vand.u32 4294901760, %v1265_v34  ;;  %1588 = vmatpush.msrb.mxu2 %v1270_v36 }
  0x6c   :  { %1267 = vmatpush.msra.mxu3 %v1266_v37 }
  0x6e   :  { %547 = vmatmul.f32.gmra.mxu0 %v546_v63  ;;  %731 = vmatmul.f32.gmra.mxu2 %v527_v38  ;;  %v1271_v38 = vsub.f32 %v1269_v32, %v1270_v36 }
  0x6f   :  { %645 = vmatmul.f32.gmra.mxu1 %v5430_v51  ;;  %840 = vmatmul.f32.gmra.mxu3 %v528_v42 }
  0x70   :  { %v1272_v39 = vand.u32 4294901760, %v1271_v38 }
  0x72   :  { %1273 = vmatpush.msra.mxu3 %v1272_v39 }
  0x74   :  { %1667 = vmatpush.msrb.mxu3 %v1101_v3 }
  0x76   :  { %555 = vmatmul.f32.gmra.mxu0 %v554_v6  ;;  %736 = vmatmul.f32.gmra.mxu2 %v535_v46  ;;  %v344_v46 = vld [vmem:[%s8877_s1 + $0x8] sm:$0xff] }
  0x77   :  { %649 = vmatmul.f32.gmra.mxu1 %v5441_v59  ;;  %846 = vmatmul.f32.gmra.mxu3 %v536_v50  ;;  %v1045_v47 = vsel %vm1040_vm1, %v344_v46, 0 }
  0x78   :  { %1669 = vmatpush.msrb.mxu3 %v1103_v8  ;;  %v5493_v53 = vand.u32 4294901760, %v1045_v47 }
  0x7a   :  { %1671 = vmatpush.msrb.mxu3 %v1105_v13 }
  0x7c   :  { %1673 = vmatpush.msrb.mxu3 %v1107_v24 }
  0x7e   :  { %741 = vmatmul.f32.gmra.mxu2 %v5436_v54  ;;  %894 = vmatmul.f32.vlgmr.msrb.gmra.mxu0 %v5321_v9 }
  0x7f   :  { %976 = vmatmul.f32.vlgmr.msrb.gmra.mxu1 %v5321_v9  ;;  %852 = vmatmul.f32.gmra.mxu3 %v544_v58  ;;  %v1042_v9 = vsel %vm1040_vm1, %v343_v40, 0  ;;  %v345_v58 = vld [vmem:[%s8877_s1 + $0x10] sm:$0xff] }
  0x80   :  { %v5478_v42 = vand.u32 4294901760, %v1042_v9 }
  0x86   :  { %746 = vmatmul.f32.gmra.mxu2 %v5445_v61  ;;  %898 = vmatmul.f32.gmra.mxu0 %v5327_v14 }
  0x87   :  { %980 = vmatmul.f32.gmra.mxu1 %v5327_v14  ;;  %858 = vmatmul.f32.gmra.mxu3 %v552_v0  ;;  %v5486_v14 = vsub.f32 %v1042_v9, %v5478_v42 }
  0x89   :  { %v1111_v52 = vand.u32 4294901760, %v5486_v14 }
  0x8b   :  { %v452_v44 = vpop.f32.mrf.mxu0 }
  0x8c   :  { %v598_v45 = vpop.f32.mrf.mxu1 }
  0x8d   :  { %v599_v7 = vadd.f32 %v598_v45, %v452_v44 }
  0x8e   :  { %751 = vmatmul.f32.gmra.mxu2 %v5333_v17  ;;  %902 = vmatmul.f32.gmra.mxu0 %v5341_v25  ;;  %v1112_v17 = vsub.f32 %v5486_v14, %v1111_v52 }
  0x8f   :  { %984 = vmatmul.f32.gmra.mxu1 %v5341_v25  ;;  %864 = vmatmul.f32.gmra.mxu3 %v560_v23  ;;  %v5506_v23 = vsub.f32 %v1045_v47, %v5493_v53  ;;  %v1048_v25 = vsel %vm1040_vm1, %v345_v58, 0 }
  0x90   :  { %v1113_v63 = vand.u32 4294901760, %v1112_v17  ;;  %v5513_v1 = vand.u32 4294901760, %v1048_v25 }
  0x91   :  { %v564_v49 = vpop.f32.mrf.mxu2  ;;  %v8900_v0 = vand.u32 4294901760, %v5506_v23 }
  0x92   :  { %v654_v50 = vpop.f32.mrf.mxu3 }
  0x93   :  { %v460_v54 = vpop.f32.mrf.mxu0  ;;  %v5495_v56 = vadd.f32 %v654_v50, %v564_v49 }
  0x94   :  { %v602_v57 = vpop.f32.mrf.mxu1 }
  0x95   :  { %v603_v31 = vadd.f32 %v602_v57, %v460_v54 }
  0x96   :  { %756 = vmatmul.f32.gmra.mxu2 %v5338_v21  ;;  %906 = vmatmul.f32.gmra.mxu0 %v5357_v41  ;;  %v1120_v21 = vsub.f32 %v5506_v23, %v8900_v0 }
  0x97   :  { %988 = vmatmul.f32.gmra.mxu1 %v5357_v41  ;;  %870 = vmatmul.f32.gmra.mxu3 %v568_v29  ;;  %v346_v41 = vld [vmem:[%s8877_s1 + $0x18] sm:$0xff]  ;;  %v5525_v29 = vsub.f32 %v1048_v25, %v5513_v1 }
  0x98   :  { %v1051_v6 = vsel %vm1040_vm1, %v346_v41, 0  ;;  %v1121_v13 = vand.u32 4294901760, %v1120_v21 }
  0x99   :  { %v572_v60 = vpop.f32.mrf.mxu2  ;;  %v8898_v18 = vand.u32 4294901760, %v5525_v29  ;;  %v5531_v19 = vand.u32 4294901760, %v1051_v6 }
  0x9a   :  { %v658_v61 = vpop.f32.mrf.mxu3 }
  0x9b   :  { %v468_v2 = vpop.f32.mrf.mxu0  ;;  %v5515_v3 = vadd.f32 %v658_v61, %v572_v60  ;;  %v1128_v26 = vsub.f32 %v5525_v29, %v8898_v18  ;;  %v5543_v28 = vsub.f32 %v1051_v6, %v5531_v19 }
  0x9c   :  { %v606_v4 = vpop.f32.mrf.mxu1 }
  0x9d   :  { %v1129_v36 = vand.u32 4294901760, %v1128_v26  ;;  %v8896_v37 = vand.u32 4294901760, %v5543_v28  ;;  %v607_v47 = vadd.f32 %v606_v4, %v468_v2 }
  0x9e   :  { %910 = vmatmul.f32.gmra.mxu0 %v5366_v48  ;;  %1114 = vmatmul.f32.vlgmr.msra.gmra.mxu2 %v1113_v63 }
  0x9f   :  { %992 = vmatmul.f32.gmra.mxu1 %v5366_v48  ;;  %1275 = vmatmul.f32.vlgmr.msra.gmra.mxu3 %v5478_v42  ;;  %v347_v48 = vld [vmem:[%s8877_s1 + $0x20] sm:$0xff]  ;;  %v1136_v44 = vsub.f32 %v5543_v28, %v8896_v37 }
  0xa0   :  { %v1054_v30 = vsel %vm1040_vm1, %v347_v48, 0 }
  0xa1   :  { %v682_v8 = vpop.f32.mrf.mxu2  ;;  %v5549_v38 = vand.u32 4294901760, %v1054_v30  ;;  %v1137_v57 = vand.u32 4294901760, %v1136_v44 }
  0xa2   :  { %v683_v11 = vadd.f32 %v682_v8, %v599_v7  ;;  %v781_v12 = vpop.f32.mrf.mxu3 }
  0xa3   :  { %v476_v20 = vpop.f32.mrf.mxu0  ;;  %v5561_v45 = vsub.f32 %v1054_v30, %v5549_v38 }
  0xa4   :  { %v610_v22 = vpop.f32.mrf.mxu1  ;;  %v5533_v24 = vadd.f32 %v781_v12, %v683_v11 }
  0xa5   :  { %v8895_v58 = vand.u32 4294901760, %v5561_v45  ;;  %v611_v41 = vadd.f32 %v610_v22, %v476_v20 }
  0xa6   :  { %914 = vmatmul.f32.gmra.mxu0 %v5374_v55  ;;  %1122 = vmatmul.f32.gmra.mxu2 %v1121_v13 }
  0xa7   :  { %996 = vmatmul.f32.gmra.mxu1 %v5374_v55  ;;  %1279 = vmatmul.f32.gmra.mxu3 %v5493_v53  ;;  %v348_v55 = vld [vmem:[%s8877_s1 + $0x28] sm:$0xff]  ;;  %v1144_v63 = vsub.f32 %v5561_v45, %v8895_v58 }
  0xa8   :  { %v1057_v46 = vsel %vm1040_vm1, %v348_v55, 0 }
  0xa9   :  { %v687_v32 = vpop.f32.mrf.mxu2  ;;  %v5567_v17 = vand.u32 4294901760, %v1057_v46  ;;  %v1145_v8 = vand.u32 4294901760, %v1144_v63 }
  0xaa   :  { %v688_v33 = vadd.f32 %v687_v32, %v603_v31  ;;  %v787_v34 = vpop.f32.mrf.mxu3 }
  0xab   :  { %v484_v39 = vpop.f32.mrf.mxu0  ;;  %v5579_v2 = vsub.f32 %v1057_v46, %v5567_v17 }
  0xac   :  { %v614_v40 = vpop.f32.mrf.mxu1  ;;  %v5551_v9 = vadd.f32 %v787_v34, %v688_v33 }
  0xad   :  { %v8893_v11 = vand.u32 4294901760, %v5579_v2  ;;  %v615_v31 = vadd.f32 %v614_v40, %v484_v39 }
  0xae   :  { %918 = vmatmul.f32.gmra.mxu0 %v5382_v62  ;;  %1130 = vmatmul.f32.gmra.mxu2 %v1129_v36 }
  0xaf   :  { %1000 = vmatmul.f32.gmra.mxu1 %v5382_v62  ;;  %1283 = vmatmul.f32.gmra.mxu3 %v5513_v1  ;;  %v349_v62 = vld [vmem:[%s8877_s1 + $0x30] sm:$0xff]  ;;  %v1152_v20 = vsub.f32 %v5579_v2, %v8893_v11 }
  0xb0   :  { %v1060_v4 = vsel %vm1040_vm1, %v349_v62, 0 }
  0xb1   :  { %v692_v49 = vpop.f32.mrf.mxu2  ;;  %v5585_v12 = vand.u32 4294901760, %v1060_v4  ;;  %v1153_v36 = vand.u32 4294901760, %v1152_v20 }
  0xb2   :  { %v693_v50 = vadd.f32 %v692_v49, %v607_v47  ;;  %v793_v54 = vpop.f32.mrf.mxu3 }
  0xb3   :  { %v492_v25 = vpop.f32.mrf.mxu0  ;;  %v5597_v22 = vsub.f32 %v1060_v4, %v5585_v12 }
  0xb4   :  { %v618_v60 = vpop.f32.mrf.mxu1  ;;  %v5569_v61 = vadd.f32 %v793_v54, %v693_v50 }
  0xb5   :  { %v8892_v55 = vand.u32 4294901760, %v5597_v22  ;;  %v619_v54 = vadd.f32 %v618_v60, %v492_v25 }
  0xb6   :  { %922 = vmatmul.f32.gmra.mxu0 %v5390_v5  ;;  %1138 = vmatmul.f32.gmra.mxu2 %v1137_v57 }
  0xb7   :  { %1004 = vmatmul.f32.gmra.mxu1 %v5390_v5  ;;  %1287 = vmatmul.f32.gmra.mxu3 %v5531_v19  ;;  %v350_v5 = vld [vmem:[%s8877_s1 + $0x38] sm:$0xff]  ;;  %v1160_v39 = vsub.f32 %v5597_v22, %v8892_v55 }
  0xb8   :  { %v1063_v30 = vsel %vm1040_vm1, %v350_v5, 0 }
  0xb9   :  { %v697_v21 = vpop.f32.mrf.mxu2  ;;  %v5603_v44 = vand.u32 4294901760, %v1063_v30  ;;  %v1161_v4 = vand.u32 4294901760, %v1160_v39 }
  0xba   :  { %v698_v6 = vadd.f32 %v697_v21, %v611_v41  ;;  %v799_v7 = vpop.f32.mrf.mxu3 }
  0xbb   :  { %v500_v13 = vpop.f32.mrf.mxu0  ;;  %v5615_v40 = vsub.f32 %v1063_v30, %v5603_v44 }
  0xbc   :  { %v622_v48 = vpop.f32.mrf.mxu1  ;;  %v5587_v26 = vadd.f32 %v799_v7, %v698_v6 }
  0xbd   :  { %v8890_v41 = vand.u32 4294901760, %v5615_v40  ;;  %v623_v20 = vadd.f32 %v622_v48, %v500_v13 }
  0xbe   :  { %926 = vmatmul.f32.gmra.mxu0 %v5398_v16  ;;  %1146 = vmatmul.f32.gmra.mxu2 %v1145_v8 }
  0xbf   :  { %1008 = vmatmul.f32.gmra.mxu1 %v5398_v16  ;;  %1291 = vmatmul.f32.gmra.mxu3 %v5549_v38  ;;  %v351_v16 = vld [vmem:[%s8877_s1 + $0x40] sm:$0xff]  ;;  %v1168_v25 = vsub.f32 %v5615_v40, %v8890_v41 }
  0xc0   :  { %v1066_v50 = vsel %vm1040_vm1, %v351_v16, 0 }
  0xc1   :  { %v702_v32 = vpop.f32.mrf.mxu2  ;;  %v5621_v21 = vand.u32 4294901760, %v1066_v50 }
  0xc2   :  { %v703_v33 = vadd.f32 %v702_v32, %v615_v31  ;;  %v805_v34 = vpop.f32.mrf.mxu3 }
  0xc3   :  { %v508_v46 = vpop.f32.mrf.mxu0  ;;  %v5633_v60 = vsub.f32 %v1066_v50, %v5621_v21 }
  0xc4   :  { %v626_v47 = vpop.f32.mrf.mxu1  ;;  %v5605_v49 = vadd.f32 %v805_v34, %v703_v33  ;;  %v1169_v33 = vand.u32 4294901760, %v1168_v25 }
  0xc5   :  { %v8889_v34 = vand.u32 4294901760, %v5633_v60 }
  0xc6   :  { %930 = vmatmul.f32.gmra.mxu0 %v5406_v27  ;;  %1154 = vmatmul.f32.gmra.mxu2 %v1153_v36 }
  0xc7   :  { %1012 = vmatmul.f32.gmra.mxu1 %v5406_v27  ;;  %1295 = vmatmul.f32.gmra.mxu3 %v5567_v17  ;;  %v352_v27 = vld [vmem:[%s8877_s1 + $0x48] sm:$0xff]  ;;  %v1176_v13 = vsub.f32 %v5633_v60, %v8889_v34 }
  0xc8   :  { %v1069_v5 = vsel %vm1040_vm1, %v352_v27, 0 }
  0xc9   :  { %v707_v57 = vpop.f32.mrf.mxu2  ;;  %v5639_v36 = vand.u32 4294901760, %v1069_v5  ;;  %v1177_v27 = vand.u32 4294901760, %v1176_v13 }
  0xca   :  { %v708_v62 = vadd.f32 %v707_v57, %v619_v54  ;;  %v811_v63 = vpop.f32.mrf.mxu3  ;;  %v627_v57 = vadd.f32 %v626_v47, %v508_v46 }
  0xcb   :  { %v516_v6 = vpop.f32.mrf.mxu0  ;;  %v5651_v48 = vsub.f32 %v1069_v5, %v5639_v36 }
  0xcc   :  { %v630_v7 = vpop.f32.mrf.mxu1  ;;  %v5623_v8 = vadd.f32 %v811_v63, %v708_v62 }
  0xcd   :  { %v8888_v25 = vand.u32 4294901760, %v5651_v48 }
  0xce   :  { %934 = vmatmul.f32.gmra.mxu0 %v5414_v35  ;;  %1162 = vmatmul.f32.gmra.mxu2 %v1161_v4 }
  0xcf   :  { %1016 = vmatmul.f32.gmra.mxu1 %v5414_v35  ;;  %1299 = vmatmul.f32.gmra.mxu3 %v5585_v12  ;;  %v353_v35 = vld [vmem:[%s8877_s1 + $0x50] sm:$0xff]  ;;  %v1184_v46 = vsub.f32 %v5651_v48, %v8888_v25 }
  0xd0   :  { %v1072_v50 = vsel %vm1040_vm1, %v353_v35, 0 }
  0xd1   :  { %v712_v30 = vpop.f32.mrf.mxu2 }
  0xd2   :  { %v713_v31 = vadd.f32 %v712_v30, %v623_v20  ;;  %v817_v32 = vpop.f32.mrf.mxu3  ;;  %v5657_v20 = vand.u32 4294901760, %v1072_v50 }
  0xd3   :  { %v524_v16 = vpop.f32.mrf.mxu0 }
  0xd4   :  { %v634_v39 = vpop.f32.mrf.mxu1  ;;  %v5641_v54 = vadd.f32 %v817_v32, %v713_v31  ;;  %v5669_v47 = vsub.f32 %v1072_v50, %v5657_v20 }
  0xd6   :  { %938 = vmatmul.f32.gmra.mxu0 %v5422_v43  ;;  %1170 = vmatmul.f32.gmra.mxu2 %v1169_v33  ;;  %v631_v33 = vadd.f32 %v630_v7, %v516_v6 }
  0xd7   :  { %1020 = vmatmul.f32.gmra.mxu1 %v5422_v43  ;;  %1303 = vmatmul.f32.gmra.mxu3 %v5603_v44  ;;  %v354_v43 = vld [vmem:[%s8877_s1 + $0x58] sm:$0xff] }
  0xd8   :  { %v1075_v5 = vsel %vm1040_vm1, %v354_v43, 0  ;;  %v635_v43 = vadd.f32 %v634_v39, %v524_v16 }
  0xd9   :  { %v717_v62 = vpop.f32.mrf.mxu2 }
  0xda   :  { %v718_v63 = vadd.f32 %v717_v62, %v627_v57  ;;  %v823_v4 = vpop.f32.mrf.mxu3  ;;  %v1185_v62 = vand.u32 4294901760, %v1184_v46 }
  0xdb   :  { %v532_v30 = vpop.f32.mrf.mxu0 }
  0xdc   :  { %v638_v31 = vpop.f32.mrf.mxu1  ;;  %v5659_v32 = vadd.f32 %v823_v4, %v718_v63  ;;  %v8891_v63 = vand.u32 4294901760, %v5669_v47  ;;  %v5675_v4 = vand.u32 4294901760, %v1075_v5 }
  0xde   :  { %942 = vmatmul.f32.gmra.mxu0 %v5430_v51  ;;  %1178 = vmatmul.f32.gmra.mxu2 %v1177_v27  ;;  %v1192_v6 = vsub.f32 %v5669_v47, %v8891_v63  ;;  %v5687_v7 = vsub.f32 %v1075_v5, %v5675_v4 }
  0xdf   :  { %1024 = vmatmul.f32.gmra.mxu1 %v5430_v51  ;;  %1307 = vmatmul.f32.gmra.mxu3 %v5621_v21  ;;  %v355_v51 = vld [vmem:[%s8877_s1 + $0x60] sm:$0xff] }
  0xe0   :  { %v1078_v50 = vsel %vm1040_vm1, %v355_v51, 0  ;;  %v639_v51 = vadd.f32 %v638_v31, %v532_v30 }
  0xe1   :  { %v722_v35 = vpop.f32.mrf.mxu2 }
  0xe2   :  { %v723_v13 = vadd.f32 %v722_v35, %v631_v33  ;;  %v829_v57 = vpop.f32.mrf.mxu3 }
  0xe3   :  { %v540_v27 = vpop.f32.mrf.mxu0 }
  0xe4   :  { %v642_v25 = vpop.f32.mrf.mxu1  ;;  %v5677_v34 = vadd.f32 %v829_v57, %v723_v13  ;;  %v1193_v13 = vand.u32 4294901760, %v1192_v6  ;;  %v8894_v57 = vand.u32 4294901760, %v5687_v7 }
  0xe6   :  { %946 = vmatmul.f32.gmra.mxu0 %v5441_v59  ;;  %1186 = vmatmul.f32.gmra.mxu2 %v1185_v62  ;;  %v5693_v62 = vand.u32 4294901760, %v1078_v50  ;;  %v1200_v16 = vsub.f32 %v5687_v7, %v8894_v57 }
  0xe7   :  { %1028 = vmatmul.f32.gmra.mxu1 %v5441_v59  ;;  %1311 = vmatmul.f32.gmra.mxu3 %v5639_v36  ;;  %v356_v59 = vld [vmem:[%s8877_s1 + $0x68] sm:$0xff] }
  0xe8   :  { %9002 = vst [vmem:[#allocation5_spill] sm:$0xff] %v5693_v62  ;;  %v5705_v39 = vsub.f32 %v1078_v50, %v5693_v62  ;;  %v1081_v5 = vsel %vm1040_vm1, %v356_v59, 0  ;;  %v643_v59 = vadd.f32 %v642_v25, %v540_v27 }
  0xe9   :  { %v727_v46 = vpop.f32.mrf.mxu2 }
  0xea   :  { %v728_v33 = vadd.f32 %v727_v46, %v635_v43  ;;  %v835_v35 = vpop.f32.mrf.mxu3 }
  0xeb   :  { %v548_v41 = vpop.f32.mrf.mxu0 }
  0xec   :  { %v646_v63 = vpop.f32.mrf.mxu1  ;;  %v5695_v55 = vadd.f32 %v835_v35, %v728_v33  ;;  %v1201_v33 = vand.u32 4294901760, %v1200_v16  ;;  %v8897_v35 = vand.u32 4294901760, %v5705_v39 }
  0xee   :  { %950 = vmatmul.f32.gmra.mxu0 %v5323_v10  ;;  %1194 = vmatmul.f32.gmra.mxu2 %v1193_v13  ;;  %v5711_v13 = vand.u32 4294901760, %v1081_v5  ;;  %v1208_v30 = vsub.f32 %v5705_v39, %v8897_v35 }
  0xef   :  { %1032 = vmatmul.f32.gmra.mxu1 %v5323_v10  ;;  %1315 = vmatmul.f32.gmra.mxu3 %v5657_v20  ;;  %v357_v10 = vld [vmem:[%s8877_s1 + $0x70] sm:$0xff] }
  0xf0   :  { %v5723_v31 = vsub.f32 %v1081_v5, %v5711_v13  ;;  %v1084_v50 = vsel %vm1040_vm1, %v357_v10, 0 }
  0xf1   :  { %v732_v6 = vpop.f32.mrf.mxu2 }
  0xf2   :  { %v733_v43 = vadd.f32 %v732_v6, %v639_v51  ;;  %v841_v46 = vpop.f32.mrf.mxu3 }
  0xf3   :  { %v556_v11 = vpop.f32.mrf.mxu0 }
  0xf4   :  { %v650_v57 = vpop.f32.mrf.mxu1  ;;  %v5713_v58 = vadd.f32 %v841_v46, %v733_v43  ;;  %v1209_v43 = vand.u32 4294901760, %v1208_v30  ;;  %v8899_v46 = vand.u32 4294901760, %v5723_v31  ;;  %v647_v30 = vadd.f32 %v646_v63, %v548_v41 }
  0xf5   :  { %v9003_v41 = vand.u32 4294901760, %v5506_v23  ;;  %v651_v63 = vadd.f32 %v650_v57, %v556_v11 }
  0xf6   :  { %954 = vmatmul.f32.gmra.mxu0 %v5329_v15  ;;  %1202 = vmatmul.f32.gmra.mxu2 %v1201_v33  ;;  %v5729_v33 = vand.u32 4294901760, %v1084_v50  ;;  %v1216_v25 = vsub.f32 %v5723_v31, %v8899_v46 }
  0xf7   :  { %1036 = vmatmul.f32.gmra.mxu1 %v5329_v15  ;;  %1319 = vmatmul.f32.gmra.mxu3 %v5675_v4  ;;  %v358_v15 = vld [vmem:[%s8877_s1 + $0x78] sm:$0xff] }
  0xf8   :  { %v5741_v27 = vsub.f32 %v1084_v50, %v5729_v33  ;;  %v1087_v10 = vsel %vm1040_vm1, %v358_v15, 0 }
  0xf9   :  { %v737_v16 = vpop.f32.mrf.mxu2  ;;  %v5748_v18 = vand.u32 4294901760, %v1087_v10 }
  0xfa   :  { %v738_v51 = vadd.f32 %v737_v16, %v643_v59  ;;  %v847_v6 = vpop.f32.mrf.mxu3 }
  0xfb   :  { %v895_v37 = vpop.f32.mrf.mxu0 }
  0xfc   :  { %v5731_v35 = vadd.f32 %v847_v6, %v738_v51  ;;  %v977_v5 = vpop.f32.mrf.mxu1  ;;  %v1217_v6 = vand.u32 4294901760, %v1216_v25 }
  0xfe   :  { %1210 = vmatmul.f32.gmra.mxu2 %v1209_v43  ;;  %1365 = vmatmul.f32.vlgmr.msra.gmra.mxu0 %v5486_v14  ;;  %v1223_v43 = vand.u32 4294901760, %v5741_v27 }
  0xff   :  { %1467 = vmatmul.f32.vlgmr.msra.gmra.mxu1 %v1111_v52  ;;  %1323 = vmatmul.f32.gmra.mxu3 %v5693_v62  ;;  %v5757_v52 = vsub.f32 %v1087_v10, %v5748_v18  ;;  %v9004_v10 = vand.u32 4294901760, %v5525_v29 }
 0x100   :  { %v1224_v14 = vsub.f32 %v5741_v27, %v1223_v43 }
 0x101   :  { %v742_v59 = vpop.f32.mrf.mxu2 }
 0x102   :  { %v743_v16 = vadd.f32 %v742_v59, %v647_v30  ;;  %v853_v51 = vpop.f32.mrf.mxu3  ;;  %v1225_v59 = vand.u32 4294901760, %v1224_v14 }
 0x103   :  { %v899_v46 = vpop.f32.mrf.mxu0 }
 0x104   :  { %v5750_v0 = vadd.f32 %v853_v51, %v743_v16  ;;  %v981_v50 = vpop.f32.mrf.mxu1  ;;  %v8903_v16 = vand.u32 4294901760, %v5757_v52 }
 0x106   :  { %1218 = vmatmul.f32.gmra.mxu2 %v1217_v6  ;;  %1370 = vmatmul.f32.gmra.mxu0 %v5506_v23  ;;  %v1232_v23 = vsub.f32 %v5757_v52, %v8903_v16 }
 0x107   :  { %1473 = vmatmul.f32.gmra.mxu1 %v9003_v41  ;;  %1327 = vmatmul.f32.gmra.mxu3 %v5711_v13 }
 0x108   :  { %v1233_v41 = vand.u32 4294901760, %v1232_v23 }
 0x109   :  { %v747_v15 = vpop.f32.mrf.mxu2 }
 0x10a   :  { %v748_v25 = vadd.f32 %v747_v15, %v651_v63  ;;  %v859_v30 = vpop.f32.mrf.mxu3 }
 0x10b   :  { %v903_v51 = vpop.f32.mrf.mxu0 }
 0x10c   :  { %v5763_v6 = vadd.f32 %v859_v30, %v748_v25  ;;  %v985_v62 = vpop.f32.mrf.mxu1  ;;  %v9005_v30 = vand.u32 4294901760, %v5543_v28 }
 0x10e   :  { %1226 = vmatmul.f32.gmra.mxu2 %v1225_v59  ;;  %1375 = vmatmul.f32.gmra.mxu0 %v5525_v29 }
 0x10f   :  { %1479 = vmatmul.f32.gmra.mxu1 %v9004_v10  ;;  %1331 = vmatmul.f32.gmra.mxu3 %v5729_v33 }
 0x111   :  { %v752_v11 = vpop.f32.mrf.mxu2 }
 0x112   :  { %v753_v57 = vadd.f32 %v752_v11, %v5495_v56  ;;  %v865_v14 = vpop.f32.mrf.mxu3  ;;  %v896_v56 = vadd.f32 %v895_v37, %v5533_v24 }
 0x113   :  { %v907_v63 = vpop.f32.mrf.mxu0 }
 0x114   :  { %v5773_v15 = vadd.f32 %v865_v14, %v753_v57  ;;  %v989_v25 = vpop.f32.mrf.mxu1  ;;  %v9006_v57 = vand.u32 4294901760, %v5561_v45 }
 0x116   :  { %1234 = vmatmul.f32.gmra.mxu2 %v1233_v41  ;;  %1380 = vmatmul.f32.gmra.mxu0 %v5543_v28  ;;  %v978_v28 = vadd.f32 %v977_v5, %v896_v56 }
 0x117   :  { %1485 = vmatmul.f32.gmra.mxu1 %v9005_v30  ;;  %1335 = vmatmul.f32.gmra.mxu3 %v5748_v18 }
 0x119   :  { %v757_v29 = vpop.f32.mrf.mxu2 }
 0x11a   :  { %v758_v59 = vadd.f32 %v757_v29, %v5515_v3  ;;  %v871_v10 = vpop.f32.mrf.mxu3  ;;  %v900_v29 = vadd.f32 %v899_v46, %v5551_v9 }
 0x11b   :  { %v911_v16 = vpop.f32.mrf.mxu0 }
 0x11c   :  { %v5781_v23 = vadd.f32 %v871_v10, %v758_v59  ;;  %v993_v11 = vpop.f32.mrf.mxu1  ;;  %v9007_v59 = vand.u32 4294901760, %v5579_v2 }
 0x11e   :  { %1385 = vmatmul.f32.gmra.mxu0 %v5561_v45  ;;  %1590 = vmatmul.f32.vlgmr.msrb.gmra.mxu2 %v5478_v42 }
 0x11f   :  { %1491 = vmatmul.f32.gmra.mxu1 %v9006_v57  ;;  %1675 = vmatmul.f32.vlgmr.msrb.gmra.mxu3 %v5478_v42  ;;  %v982_v42 = vadd.f32 %v981_v50, %v900_v29  ;;  %v904_v57 = vadd.f32 %v903_v51, %v5569_v61  ;;  %v908_v61 = vadd.f32 %v907_v63, %v5587_v26 }
 0x120   :  { %v912_v26 = vadd.f32 %v911_v16, %v5605_v49 }
 0x121   :  { %v1115_v14 = vpop.f32.mrf.mxu2 }
 0x122   :  { %v1116_v41 = vadd.f32 %v1115_v14, %v978_v28  ;;  %v1276_v3 = vpop.f32.mrf.mxu3 }
 0x123   :  { %v915_v30 = vpop.f32.mrf.mxu0 }
 0x124   :  { %v997_v24 = vpop.f32.mrf.mxu1  ;;  %v5789_v37 = vadd.f32 %v1276_v3, %v1116_v41 }
 0x126   :  { %1390 = vmatmul.f32.gmra.mxu0 %v5579_v2  ;;  %1594 = vmatmul.f32.gmra.mxu2 %v5493_v53  ;;  %v9008_v2 = vand.u32 4294901760, %v5597_v22 }
 0x127   :  { %1497 = vmatmul.f32.gmra.mxu1 %v9007_v59  ;;  %1679 = vmatmul.f32.gmra.mxu3 %v5493_v53  ;;  %v986_v53 = vadd.f32 %v985_v62, %v904_v57 }
 0x129   :  { %v1123_v45 = vpop.f32.mrf.mxu2 }
 0x12a   :  { %v1124_v5 = vadd.f32 %v1123_v45, %v982_v42  ;;  %v1280_v10 = vpop.f32.mrf.mxu3 }
 0x12b   :  { %v919_v56 = vpop.f32.mrf.mxu0 }
 0x12c   :  { %v5797_v9 = vpop.f32.mrf.mxu1  ;;  %v5799_v46 = vadd.f32 %v1280_v10, %v1124_v5 }
 0x12e   :  { %1395 = vmatmul.f32.gmra.mxu0 %v5597_v22  ;;  %1598 = vmatmul.f32.gmra.mxu2 %v5513_v1  ;;  %v9009_v22 = vand.u32 4294901760, %v5615_v40 }
 0x12f   :  { %1503 = vmatmul.f32.gmra.mxu1 %v9008_v2  ;;  %1683 = vmatmul.f32.gmra.mxu3 %v5513_v1  ;;  %v990_v1 = vadd.f32 %v989_v25, %v908_v61  ;;  %v994_v25 = vadd.f32 %v993_v11, %v912_v26 }
 0x131   :  { %v1131_v50 = vpop.f32.mrf.mxu2 }
 0x132   :  { %v1132_v28 = vadd.f32 %v1131_v50, %v986_v53  ;;  %v1284_v14 = vpop.f32.mrf.mxu3  ;;  %v916_v53 = vadd.f32 %v915_v30, %v5623_v8 }
 0x133   :  { %v923_v41 = vpop.f32.mrf.mxu0 }
 0x134   :  { %v5807_v51 = vpop.f32.mrf.mxu1  ;;  %v5809_v3 = vadd.f32 %v1284_v14, %v1132_v28  ;;  %v9011_v28 = vand.u32 4294901760, %v5651_v48  ;;  %v998_v14 = vadd.f32 %v997_v24, %v916_v53 }
 0x136   :  { %1400 = vmatmul.f32.gmra.mxu0 %v5615_v40  ;;  %1602 = vmatmul.f32.gmra.mxu2 %v5531_v19  ;;  %v9010_v40 = vand.u32 4294901760, %v5633_v60 }
 0x137   :  { %1509 = vmatmul.f32.gmra.mxu1 %v9009_v22  ;;  %1687 = vmatmul.f32.gmra.mxu3 %v5531_v19  ;;  %v1755_v19 = vld [vmem:[%s8883_s7] sm:$0xff] }
 0x138   :  { %v1819_v5 = vand.u32 4294901760, %v1755_v19 }
 0x139   :  { %v1139_v62 = vpop.f32.mrf.mxu2 }
 0x13a   :  { %v1140_v29 = vadd.f32 %v1139_v62, %v990_v1  ;;  %v1288_v59 = vpop.f32.mrf.mxu3  ;;  %1820 = vmatpush.msrb.mxu0 %v1819_v5  ;;  %v1966_v57 = vsub.f32 %v1755_v19, %v1819_v5  ;;  %2151 = vmatpush.msra.mxu3 %v1819_v5  ;;  %v920_v62 = vadd.f32 %v919_v56, %v5641_v54 }
 0x13b   :  { %v927_v42 = vpop.f32.mrf.mxu0  ;;  %v924_v54 = vadd.f32 %v923_v41, %v5659_v32 }
 0x13c   :  { %v5817_v63 = vpop.f32.mrf.mxu1  ;;  %v5819_v45 = vadd.f32 %v1288_v59, %v1140_v29  ;;  %2053 = vmatpush.msra.mxu2 %v1966_v57  ;;  %v928_v32 = vadd.f32 %v927_v42, %v5677_v34 }
 0x13e   :  { %1405 = vmatmul.f32.gmra.mxu0 %v5633_v60  ;;  %1606 = vmatmul.f32.gmra.mxu2 %v5549_v38 }
 0x13f   :  { %1515 = vmatmul.f32.gmra.mxu1 %v9010_v40  ;;  %1691 = vmatmul.f32.gmra.mxu3 %v5549_v38  ;;  %v1967_v38 = vand.u32 4294901760, %v1966_v57 }
 0x141   :  { %v1147_v49 = vpop.f32.mrf.mxu2  ;;  %v1968_v11 = vsub.f32 %v1966_v57, %v1967_v38  ;;  %2267 = vmatpush.msra.mxu0 %v1967_v38 }
 0x142   :  { %v1148_v16 = vadd.f32 %v1147_v49, %v994_v25  ;;  %v1292_v10 = vpop.f32.mrf.mxu3 }
 0x143   :  { %v931_v2 = vpop.f32.mrf.mxu0  ;;  %v1969_v61 = vand.u32 4294901760, %v1968_v11 }
 0x144   :  { %v5830_v50 = vpop.f32.mrf.mxu1  ;;  %v5832_v60 = vadd.f32 %v1292_v10, %v1148_v16  ;;  %v932_v34 = vadd.f32 %v931_v2, %v5695_v55 }
 0x145   :  { %1970 = vmatpush.msrb.mxu1 %v1969_v61 }
 0x146   :  { %1410 = vmatmul.f32.gmra.mxu0 %v5651_v48  ;;  %1610 = vmatmul.f32.gmra.mxu2 %v5567_v17  ;;  %v1002_v48 = vadd.f32 %v5797_v9, %v920_v62  ;;  %v1014_v55 = vadd.f32 %v5830_v50, %v932_v34 }
 0x147   :  { %1521 = vmatmul.f32.gmra.mxu1 %v9011_v28  ;;  %1695 = vmatmul.f32.gmra.mxu3 %v5567_v17  ;;  %v9012_v17 = vand.u32 4294901760, %v5669_v47 }
 0x148   :  { %2349 = vmatpush.msra.mxu1 %v1819_v5 }
 0x149   :  { %v1155_v8 = vpop.f32.mrf.mxu2 }
 0x14a   :  { %v1156_v30 = vadd.f32 %v1155_v8, %v998_v14  ;;  %v1296_v22 = vpop.f32.mrf.mxu3 }
 0x14b   :  { %v935_v1 = vpop.f32.mrf.mxu0 }
 0x14c   :  { %v1017_v29 = vpop.f32.mrf.mxu1  ;;  %v5840_v59 = vadd.f32 %v1296_v22, %v1156_v30  ;;  %v936_v30 = vadd.f32 %v935_v1, %v5713_v58 }
 0x14e   :  { %1415 = vmatmul.f32.gmra.mxu0 %v5669_v47  ;;  %1614 = vmatmul.f32.gmra.mxu2 %v5585_v12  ;;  %v9013_v47 = vand.u32 4294901760, %v5687_v7  ;;  %v1018_v50 = vadd.f32 %v1017_v29, %v936_v30 }
 0x14f   :  { %1527 = vmatmul.f32.gmra.mxu1 %v9012_v17  ;;  %1699 = vmatmul.f32.gmra.mxu3 %v5585_v12  ;;  %v1006_v12 = vadd.f32 %v5807_v51, %v924_v54 }
 0x151   :  { %v1163_v24 = vpop.f32.mrf.mxu2 }
 0x152   :  { %v1164_v26 = vadd.f32 %v1163_v24, %v1002_v48  ;;  %v1300_v40 = vpop.f32.mrf.mxu3 }
 0x153   :  { %v939_v19 = vpop.f32.mrf.mxu0 }
 0x154   :  { %v5849_v56 = vpop.f32.mrf.mxu1  ;;  %v5851_v25 = vadd.f32 %v1300_v40, %v1164_v26  ;;  %v940_v54 = vadd.f32 %v939_v19, %v5731_v35  ;;  %v9016_v35 = vand.u32 4294901760, %v5757_v52 }
 0x156   :  { %1420 = vmatmul.f32.gmra.mxu0 %v5687_v7  ;;  %1618 = vmatmul.f32.gmra.mxu2 %v5603_v44  ;;  %v9014_v7 = vand.u32 4294901760, %v5705_v39 }
 0x157   :  { %1533 = vmatmul.f32.gmra.mxu1 %v9013_v47  ;;  %1703 = vmatmul.f32.gmra.mxu3 %v5603_v44  ;;  %v1010_v44 = vadd.f32 %v5817_v63, %v928_v32 }
 0x159   :  { %v1171_v9 = vpop.f32.mrf.mxu2 }
 0x15a   :  { %v1172_v5 = vadd.f32 %v1171_v9, %v1006_v12  ;;  %v1304_v49 = vpop.f32.mrf.mxu3  ;;  %v1022_v12 = vadd.f32 %v5849_v56, %v940_v54  ;;  %v1742_v56 = vld [vmem:[%s8879_s3 + $0x18] sm:$0xff] }
 0x15b   :  { %v5859_v16 = vpop.f32.mrf.mxu0 }
 0x15c   :  { %v5862_v41 = vpop.f32.mrf.mxu1  ;;  %v5864_v10 = vadd.f32 %v1304_v49, %v1172_v5 }
 0x15e   :  { %1425 = vmatmul.f32.gmra.mxu0 %v5705_v39  ;;  %1622 = vmatmul.f32.gmra.mxu2 %v5621_v21  ;;  %v1739_v39 = vld [vmem:[%s8879_s3] sm:$0xff] }
 0x15f   :  { %1539 = vmatmul.f32.gmra.mxu1 %v9014_v7  ;;  %1707 = vmatmul.f32.gmra.mxu3 %v5621_v21  ;;  %v9015_v21 = vand.u32 4294901760, %v5723_v31  ;;  %v1757_v63 = vsel %vm380_vm0, %v1739_v39, 0 }
 0x160   :  { %v5889_v61 = vand.u32 4294901760, %v1757_v63 }
 0x161   :  { %v1179_v51 = vpop.f32.mrf.mxu2 }
 0x162   :  { %v1180_v57 = vadd.f32 %v1179_v51, %v1010_v44  ;;  %v1308_v53 = vpop.f32.mrf.mxu3 }
 0x163   :  { %v5872_v38 = vpop.f32.mrf.mxu0 }
 0x164   :  { %v5875_v42 = vpop.f32.mrf.mxu1  ;;  %v5877_v11 = vadd.f32 %v1308_v53, %v1180_v57  ;;  %v9017_v53 = vld [vmem:[#allocation5_spill] sm:$0xff] }
 0x166   :  { %1430 = vmatmul.f32.gmra.mxu0 %v5723_v31  ;;  %1626 = vmatmul.f32.gmra.mxu2 %v5639_v36  ;;  %v5904_v31 = vsub.f32 %v1757_v63, %v5889_v61 }
 0x167   :  { %1545 = vmatmul.f32.gmra.mxu1 %v9015_v21  ;;  %1711 = vmatmul.f32.gmra.mxu3 %v5639_v36  ;;  %v1740_v36 = vld [vmem:[%s8879_s3 + $0x8] sm:$0xff] }
 0x168   :  { %v1760_v58 = vsel %vm380_vm0, %v1740_v36, 0  ;;  %v1823_v24 = vand.u32 4294901760, %v5904_v31  ;;  %v948_v36 = vadd.f32 %v5872_v38, %v5763_v6 }
 0x169   :  { %v1187_v2 = vpop.f32.mrf.mxu2  ;;  %v5911_v26 = vand.u32 4294901760, %v1760_v58 }
 0x16a   :  { %v1188_v28 = vadd.f32 %v1187_v2, %v1014_v55  ;;  %v1312_v14 = vpop.f32.mrf.mxu3  ;;  %v1030_v38 = vadd.f32 %v5875_v42, %v948_v36  ;;  %v1744_v42 = vld [vmem:[%s8879_s3 + $0x28] sm:$0xff] }
 0x16b   :  { %v5891_v8 = vpop.f32.mrf.mxu0  ;;  %v5929_v29 = vsub.f32 %v1760_v58, %v5911_v26 }
 0x16c   :  { %v5894_v22 = vpop.f32.mrf.mxu1  ;;  %v5896_v62 = vadd.f32 %v1312_v14, %v1188_v28 }
 0x16d   :  { %v1831_v7 = vand.u32 4294901760, %v5929_v29 }
 0x16e   :  { %1435 = vmatmul.f32.gmra.mxu0 %v5741_v27  ;;  %1630 = vmatmul.f32.gmra.mxu2 %v5657_v20 }
 0x16f   :  { %1551 = vmatmul.f32.gmra.mxu1 %v1223_v43  ;;  %1715 = vmatmul.f32.gmra.mxu3 %v5657_v20  ;;  %v1741_v20 = vld [vmem:[%s8879_s3 + $0x10] sm:$0xff]  ;;  %v1824_v43 = vsub.f32 %v5904_v31, %v1823_v24  ;;  %v1832_v34 = vsub.f32 %v5929_v29, %v1831_v7 }
 0x170   :  { %v1763_v19 = vsel %vm380_vm0, %v1741_v20, 0 }
 0x171   :  { %v1195_v1 = vpop.f32.mrf.mxu2  ;;  %v1825_v32 = vand.u32 4294901760, %v1824_v43  ;;  %v5937_v44 = vand.u32 4294901760, %v1763_v19  ;;  %v1833_v2 = vand.u32 4294901760, %v1832_v34 }
 0x172   :  { %v1196_v17 = vadd.f32 %v1195_v1, %v1018_v50  ;;  %v1316_v48 = vpop.f32.mrf.mxu3 }
 0x173   :  { %v5913_v40 = vpop.f32.mrf.mxu0  ;;  %v5955_v39 = vsub.f32 %v1763_v19, %v5937_v44 }
 0x174   :  { %v5916_v47 = vpop.f32.mrf.mxu1  ;;  %v5918_v27 = vadd.f32 %v1316_v48, %v1196_v17 }
 0x175   :  { %v1839_v28 = vand.u32 4294901760, %v5955_v39 }
 0x176   :  { %1440 = vmatmul.f32.gmra.mxu0 %v5757_v52  ;;  %1634 = vmatmul.f32.gmra.mxu2 %v5675_v4  ;;  %v944_v52 = vadd.f32 %v5859_v16, %v5750_v0  ;;  %v1766_v0 = vsel %vm380_vm0, %v1742_v56, 0 }
 0x177   :  { %1557 = vmatmul.f32.gmra.mxu1 %v9016_v35  ;;  %1719 = vmatmul.f32.gmra.mxu3 %v5675_v4  ;;  %v5962_v14 = vand.u32 4294901760, %v1766_v0  ;;  %v1840_v1 = vsub.f32 %v5955_v39, %v1839_v28 }
 0x178   :  { %v1026_v16 = vadd.f32 %v5862_v41, %v944_v52  ;;  %v1743_v41 = vld [vmem:[%s8879_s3 + $0x20] sm:$0xff] }
 0x179   :  { %v1203_v9 = vpop.f32.mrf.mxu2  ;;  %v5980_v17 = vsub.f32 %v1766_v0, %v5962_v14  ;;  %v1769_v6 = vsel %vm380_vm0, %v1743_v41, 0  ;;  %v1841_v43 = vand.u32 4294901760, %v1840_v1 }
 0x17a   :  { %v1204_v5 = vadd.f32 %v1203_v9, %v1022_v12  ;;  %v1320_v49 = vpop.f32.mrf.mxu3  ;;  %v5987_v19 = vand.u32 4294901760, %v1769_v6  ;;  %v952_v9 = vadd.f32 %v5891_v8, %v5773_v15  ;;  %v1772_v15 = vsel %vm380_vm0, %v1744_v42, 0 }
 0x17b   :  { %v5939_v51 = vpop.f32.mrf.mxu0  ;;  %v1847_v35 = vand.u32 4294901760, %v5980_v17 }
 0x17c   :  { %v5943_v57 = vadd.f32 %v1320_v49, %v1204_v5  ;;  %v5945_v4 = vpop.f32.mrf.mxu1  ;;  %v1034_v8 = vadd.f32 %v5894_v22, %v952_v9  ;;  %v1745_v22 = vld [vmem:[%s8879_s3 + $0x30] sm:$0xff] }
 0x17d   :  { %v1848_v49 = vsub.f32 %v5980_v17, %v1847_v35 }
 0x17e   :  { %1638 = vmatmul.f32.gmra.mxu2 %v9017_v53  ;;  %1826 = vmatmul.f32.vlgmr.msrb.gmra.mxu0 %v1825_v32  ;;  %v6005_v32 = vsub.f32 %v1769_v6, %v5987_v19 }
 0x17f   :  { %1972 = vmatmul.f32.vlgmr.msrb.gmra.mxu1 %v5889_v61  ;;  %1723 = vmatmul.f32.gmra.mxu3 %v9017_v53  ;;  %v1849_v34 = vand.u32 4294901760, %v1848_v49 }
 0x180   :  { %v1855_v0 = vand.u32 4294901760, %v6005_v32 }
 0x181   :  { %v1211_v21 = vpop.f32.mrf.mxu2 }
 0x182   :  { %v1212_v63 = vadd.f32 %v1211_v21, %v1026_v16  ;;  %v1324_v55 = vpop.f32.mrf.mxu3  ;;  %v6012_v16 = vand.u32 4294901760, %v1772_v15 }
 0x183   :  { %v5964_v30 = vpop.f32.mrf.mxu0 }
 0x184   :  { %v5968_v58 = vadd.f32 %v1324_v55, %v1212_v63  ;;  %v5970_v50 = vpop.f32.mrf.mxu1  ;;  %v956_v63 = vadd.f32 %v5913_v40, %v5781_v23  ;;  %v6030_v36 = vsub.f32 %v1772_v15, %v6012_v16  ;;  %v1775_v23 = vsel %vm380_vm0, %v1745_v22, 0 }
 0x185   :  { %v1372_v22 = vadd.f32 %v5964_v30, %v5799_v46 }
 0x186   :  { %1642 = vmatmul.f32.gmra.mxu2 %v5711_v13  ;;  %1834 = vmatmul.f32.gmra.mxu0 %v1833_v2  ;;  %v1856_v2 = vsub.f32 %v6005_v32, %v1855_v0  ;;  %v1038_v40 = vadd.f32 %v5916_v47, %v956_v63  ;;  %v1746_v47 = vld [vmem:[%s8879_s3 + $0x38] sm:$0xff] }
 0x187   :  { %1976 = vmatmul.f32.gmra.mxu1 %v5911_v26  ;;  %1727 = vmatmul.f32.gmra.mxu3 %v5711_v13  ;;  %v1475_v30 = vadd.f32 %v5970_v50, %v1372_v22 }
 0x189   :  { %v1219_v48 = vpop.f32.mrf.mxu2 }
 0x18a   :  { %v1220_v54 = vadd.f32 %v1219_v48, %v1030_v38  ;;  %v1328_v20 = vpop.f32.mrf.mxu3  ;;  %v1857_v38 = vand.u32 4294901760, %v1856_v2  ;;  %v1863_v48 = vand.u32 4294901760, %v6030_v36 }
 0x18b   :  { %v5989_v12 = vpop.f32.mrf.mxu0 }
 0x18c   :  { %v5993_v5 = vadd.f32 %v1328_v20, %v1220_v54  ;;  %v5995_v13 = vpop.f32.mrf.mxu1  ;;  %v6037_v54 = vand.u32 4294901760, %v1775_v23  ;;  %v1864_v42 = vsub.f32 %v6030_v36, %v1863_v48 }
 0x18e   :  { %1646 = vmatmul.f32.gmra.mxu2 %v5729_v33  ;;  %1842 = vmatmul.f32.gmra.mxu0 %v1841_v43  ;;  %v1367_v43 = vadd.f32 %v5939_v51, %v5789_v37  ;;  %v6055_v49 = vsub.f32 %v1775_v23, %v6037_v54  ;;  %v1778_v37 = vsel %vm380_vm0, %v1746_v47, 0 }
 0x18f   :  { %1980 = vmatmul.f32.gmra.mxu1 %v5937_v44  ;;  %1731 = vmatmul.f32.gmra.mxu3 %v5729_v33 }
 0x190   :  { %v1469_v51 = vadd.f32 %v5945_v4, %v1367_v43 }
 0x191   :  { %v1227_v52 = vpop.f32.mrf.mxu2 }
 0x192   :  { %v1228_v56 = vadd.f32 %v1227_v52, %v1034_v8  ;;  %v1332_v53 = vpop.f32.mrf.mxu3 }
 0x193   :  { %v6014_v21 = vpop.f32.mrf.mxu0 }
 0x194   :  { %v6018_v55 = vadd.f32 %v1332_v53, %v1228_v56  ;;  %v6020_v33 = vpop.f32.mrf.mxu1  ;;  %v1865_v56 = vand.u32 4294901760, %v1864_v42  ;;  %v1871_v53 = vand.u32 4294901760, %v6055_v49  ;;  %v1377_v42 = vadd.f32 %v5989_v12, %v5809_v3 }
 0x196   :  { %1650 = vmatmul.f32.gmra.mxu2 %v5748_v18  ;;  %1850 = vmatmul.f32.gmra.mxu0 %v1849_v34  ;;  %v6063_v34 = vand.u32 4294901760, %v1778_v37  ;;  %v1872_v4 = vsub.f32 %v6055_v49, %v1871_v53  ;;  %v1481_v12 = vadd.f32 %v5995_v13, %v1377_v42 }
 0x197   :  { %1984 = vmatmul.f32.gmra.mxu1 %v5962_v14  ;;  %1735 = vmatmul.f32.gmra.mxu3 %v5748_v18 }
 0x198   :  { %v6081_v23 = vsub.f32 %v1778_v37, %v6063_v34 }
 0x199   :  { %v1235_v41 = vpop.f32.mrf.mxu2 }
 0x19a   :  { %v1236_v1 = vadd.f32 %v1235_v41, %v1038_v40  ;;  %v1336_v6 = vpop.f32.mrf.mxu3 }
 0x19b   :  { %v6039_v20 = vpop.f32.mrf.mxu0 }
 0x19c   :  { %v6043_v9 = vadd.f32 %v1336_v6, %v1236_v1  ;;  %v6045_v18 = vpop.f32.mrf.mxu1  ;;  %v1873_v6 = vand.u32 4294901760, %v1872_v4 }
 0x19e   :  { %1858 = vmatmul.f32.gmra.mxu0 %v1857_v38  ;;  %2056 = vmatmul.f32.vlgmr.msra.gmra.mxu2 %v5904_v31  ;;  %v1879_v38 = vand.u32 4294901760, %v6081_v23 }
 0x19f   :  { %1988 = vmatmul.f32.gmra.mxu1 %v5987_v19  ;;  %2155 = vmatmul.f32.vlgmr.msra.gmra.mxu3 %v1823_v24  ;;  %v1747_v24 = vld [vmem:[%s8879_s3 + $0x40] sm:$0xff] }
 0x1a0   :  { %v1781_v46 = vsel %vm380_vm0, %v1747_v24, 0  ;;  %v1880_v50 = vsub.f32 %v6081_v23, %v1879_v38 }
 0x1a1   :  { %v1591_v15 = vpop.f32.mrf.mxu2  ;;  %v6089_v43 = vand.u32 4294901760, %v1781_v46 }
 0x1a2   :  { %v1592_v8 = vadd.f32 %v1591_v15, %v1469_v51  ;;  %v1676_v52 = vpop.f32.mrf.mxu3 }
 0x1a3   :  { %v6065_v63 = vpop.f32.mrf.mxu0  ;;  %v6107_v51 = vsub.f32 %v1781_v46, %v6089_v43  ;;  %v1382_v46 = vadd.f32 %v6014_v21, %v5819_v45 }
 0x1a4   :  { %v6069_v2 = vpop.f32.mrf.mxu1  ;;  %v6071_v31 = vadd.f32 %v1676_v52, %v1592_v8 }
 0x1a5   :  { %v1887_v22 = vand.u32 4294901760, %v6107_v51  ;;  %v1487_v21 = vadd.f32 %v6020_v33, %v1382_v46 }
 0x1a6   :  { %9018 = vst [vmem:[#allocation5_spill] sm:$0xff] %v6071_v31  ;;  %1866 = vmatmul.f32.gmra.mxu0 %v1865_v56  ;;  %2061 = vmatmul.f32.gmra.mxu2 %v5929_v29  ;;  %v1881_v56 = vand.u32 4294901760, %v1880_v50 }
 0x1a7   :  { %1992 = vmatmul.f32.gmra.mxu1 %v6012_v16  ;;  %2161 = vmatmul.f32.gmra.mxu3 %v1831_v7  ;;  %v1748_v7 = vld [vmem:[%s8879_s3 + $0x48] sm:$0xff]  ;;  %v1888_v13 = vsub.f32 %v6107_v51, %v1887_v22 }
 0x1a8   :  { %v1784_v3 = vsel %vm380_vm0, %v1748_v7, 0 }
 0x1a9   :  { %v1595_v40 = vpop.f32.mrf.mxu2  ;;  %v6115_v24 = vand.u32 4294901760, %v1784_v3  ;;  %v1889_v42 = vand.u32 4294901760, %v1888_v13 }
 0x1aa   :  { %v1596_v41 = vadd.f32 %v1595_v40, %v1475_v30  ;;  %v1680_v1 = vpop.f32.mrf.mxu3 }
 0x1ab   :  { %v6091_v47 = vpop.f32.mrf.mxu0  ;;  %v6133_v40 = vsub.f32 %v1784_v3, %v6115_v24  ;;  %v1387_v3 = vadd.f32 %v6039_v20, %v5832_v60 }
 0x1ac   :  { %v6095_v37 = vpop.f32.mrf.mxu1  ;;  %v6097_v29 = vadd.f32 %v1680_v1, %v1596_v41 }
 0x1ad   :  { %v1895_v7 = vand.u32 4294901760, %v6133_v40  ;;  %v1493_v20 = vadd.f32 %v6045_v18, %v1387_v3 }
 0x1ae   :  { %9019 = vst [vmem:[#allocation6_spill] sm:$0xff] %v6097_v29  ;;  %1874 = vmatmul.f32.gmra.mxu0 %v1873_v6  ;;  %2066 = vmatmul.f32.gmra.mxu2 %v5955_v39 }
 0x1af   :  { %1996 = vmatmul.f32.gmra.mxu1 %v6037_v54  ;;  %2167 = vmatmul.f32.gmra.mxu3 %v1839_v28  ;;  %v1749_v28 = vld [vmem:[%s8879_s3 + $0x50] sm:$0xff]  ;;  %v1896_v33 = vsub.f32 %v6133_v40, %v1895_v7 }
 0x1b0   :  { %v1787_v45 = vsel %vm380_vm0, %v1749_v28, 0 }
 0x1b1   :  { %v1599_v15 = vpop.f32.mrf.mxu2  ;;  %v6141_v50 = vand.u32 4294901760, %v1787_v45  ;;  %v1897_v28 = vand.u32 4294901760, %v1896_v33 }
 0x1b2   :  { %v1600_v8 = vadd.f32 %v1599_v15, %v1481_v12  ;;  %v1684_v52 = vpop.f32.mrf.mxu3 }
 0x1b3   :  { %v6117_v4 = vpop.f32.mrf.mxu0 }
 0x1b4   :  { %v6121_v30 = vpop.f32.mrf.mxu1  ;;  %v6123_v39 = vadd.f32 %v1684_v52, %v1600_v8  ;;  %v6159_v8 = vsub.f32 %v1787_v45, %v6141_v50  ;;  %v1392_v45 = vadd.f32 %v6065_v63, %v5840_v59 }
 0x1b6   :  { %9020 = vst [vmem:[#allocation7_spill] sm:$0xff] %v6123_v39  ;;  %1882 = vmatmul.f32.gmra.mxu0 %v1881_v56  ;;  %2071 = vmatmul.f32.gmra.mxu2 %v5980_v17  ;;  %v1903_v13 = vand.u32 4294901760, %v6159_v8  ;;  %v1499_v63 = vadd.f32 %v6069_v2, %v1392_v45 }
 0x1b7   :  { %2000 = vmatmul.f32.gmra.mxu1 %v6063_v34  ;;  %2173 = vmatmul.f32.gmra.mxu3 %v1847_v35  ;;  %v1750_v35 = vld [vmem:[%s8879_s3 + $0x58] sm:$0xff] }
 0x1b8   :  { %v1790_v60 = vsel %vm380_vm0, %v1750_v35, 0  ;;  %v1904_v18 = vsub.f32 %v6159_v8, %v1903_v13 }
 0x1b9   :  { %v1603_v41 = vpop.f32.mrf.mxu2 }
 0x1ba   :  { %v1604_v1 = vadd.f32 %v1603_v41, %v1487_v21  ;;  %v1688_v6 = vpop.f32.mrf.mxu3  ;;  %v6167_v21 = vand.u32 4294901760, %v1790_v60  ;;  %v1905_v33 = vand.u32 4294901760, %v1904_v18 }
 0x1bb   :  { %v6143_v12 = vpop.f32.mrf.mxu0 }
 0x1bc   :  { %v6147_v15 = vpop.f32.mrf.mxu1  ;;  %v6149_v17 = vadd.f32 %v1688_v6, %v1604_v1  ;;  %v6185_v6 = vsub.f32 %v1790_v60, %v6167_v21  ;;  %v1397_v60 = vadd.f32 %v6091_v47, %v5851_v25 }
 0x1be   :  { %9021 = vst [vmem:[#allocation8_spill] sm:$0xff] %v6149_v17  ;;  %1890 = vmatmul.f32.gmra.mxu0 %v1889_v42  ;;  %2076 = vmatmul.f32.gmra.mxu2 %v6005_v32  ;;  %v1505_v47 = vadd.f32 %v6095_v37, %v1397_v60 }
 0x1bf   :  { %2004 = vmatmul.f32.gmra.mxu1 %v6089_v43  ;;  %2179 = vmatmul.f32.gmra.mxu3 %v1855_v0  ;;  %v1751_v0 = vld [vmem:[%s8879_s3 + $0x60] sm:$0xff] }
 0x1c0   :  { %v1793_v59 = vsel %vm380_vm0, %v1751_v0, 0 }
 0x1c1   :  { %v1607_v52 = vpop.f32.mrf.mxu2 }
 0x1c2   :  { %v1608_v56 = vadd.f32 %v1607_v52, %v1493_v20  ;;  %v1692_v46 = vpop.f32.mrf.mxu3  ;;  %v8904_v20 = vand.u32 4294901760, %v6185_v6  ;;  %v6193_v52 = vand.u32 4294901760, %v1793_v59 }
 0x1c3   :  { %v6169_v41 = vpop.f32.mrf.mxu0 }
 0x1c4   :  { %v6173_v1 = vpop.f32.mrf.mxu1  ;;  %v6175_v32 = vadd.f32 %v1692_v46, %v1608_v56  ;;  %v1912_v2 = vsub.f32 %v6185_v6, %v8904_v20 }
 0x1c6   :  { %9022 = vst [vmem:[#allocation9_spill] sm:$0xff] %v6175_v32  ;;  %1898 = vmatmul.f32.gmra.mxu0 %v1897_v28  ;;  %2081 = vmatmul.f32.gmra.mxu2 %v6030_v36  ;;  %v6211_v28 = vsub.f32 %v1793_v59, %v6193_v52  ;;  %v1402_v59 = vadd.f32 %v6117_v4, %v5864_v10 }
 0x1c7   :  { %2008 = vmatmul.f32.gmra.mxu1 %v6115_v24  ;;  %2185 = vmatmul.f32.gmra.mxu3 %v1863_v48  ;;  %v1752_v48 = vld [vmem:[%s8879_s3 + $0x68] sm:$0xff] }
 0x1c8   :  { %v1796_v25 = vsel %vm380_vm0, %v1752_v48, 0  ;;  %v1511_v4 = vadd.f32 %v6121_v30, %v1402_v59 }
 0x1c9   :  { %v1611_v42 = vpop.f32.mrf.mxu2 }
 0x1ca   :  { %v1612_v3 = vadd.f32 %v1611_v42, %v1499_v63  ;;  %v1696_v35 = vpop.f32.mrf.mxu3  ;;  %v1913_v63 = vand.u32 4294901760, %v1912_v2  ;;  %v1919_v42 = vand.u32 4294901760, %v6211_v28 }
 0x1cb   :  { %v6195_v56 = vpop.f32.mrf.mxu0 }
 0x1cc   :  { %v6199_v46 = vpop.f32.mrf.mxu1  ;;  %v6201_v36 = vadd.f32 %v1696_v35, %v1612_v3  ;;  %v6219_v3 = vand.u32 4294901760, %v1796_v25  ;;  %v1920_v37 = vsub.f32 %v6211_v28, %v1919_v42 }
 0x1ce   :  { %9023 = vst [vmem:[#allocation10_spill] sm:$0xff] %v6201_v36  ;;  %1906 = vmatmul.f32.gmra.mxu0 %v1905_v33  ;;  %2086 = vmatmul.f32.gmra.mxu2 %v6055_v49  ;;  %v1926_v60 = vsub.f32 %v1796_v25, %v6219_v3 }
 0x1cf   :  { %2012 = vmatmul.f32.gmra.mxu1 %v6141_v50  ;;  %2191 = vmatmul.f32.gmra.mxu3 %v1871_v53  ;;  %v1753_v53 = vld [vmem:[%s8879_s3 + $0x70] sm:$0xff] }
 0x1d0   :  { %v1799_v10 = vsel %vm380_vm0, %v1753_v53, 0 }
 0x1d1   :  { %v1615_v45 = vpop.f32.mrf.mxu2 }
 0x1d2   :  { %v1616_v0 = vadd.f32 %v1615_v45, %v1505_v47  ;;  %v1700_v18 = vpop.f32.mrf.mxu3  ;;  %v1921_v45 = vand.u32 4294901760, %v1920_v37 }
 0x1d3   :  { %v6221_v35 = vpop.f32.mrf.mxu0 }
 0x1d4   :  { %v6225_v33 = vpop.f32.mrf.mxu1  ;;  %v6227_v49 = vadd.f32 %v1700_v18, %v1616_v0  ;;  %v1927_v0 = vand.u32 4294901760, %v1926_v60  ;;  %v6240_v18 = vand.u32 4294901760, %v1799_v10 }
 0x1d6   :  { %9024 = vst [vmem:[#allocation11_spill] sm:$0xff] %v6227_v49  ;;  %1914 = vmatmul.f32.gmra.mxu0 %v1913_v63  ;;  %2091 = vmatmul.f32.gmra.mxu2 %v6081_v23  ;;  %v1754_v23 = vld [vmem:[%s8879_s3 + $0x78] sm:$0xff]  ;;  %v1934_v30 = vsub.f32 %v1799_v10, %v6240_v18 }
 0x1d7   :  { %2016 = vmatmul.f32.gmra.mxu1 %v6167_v21  ;;  %2197 = vmatmul.f32.gmra.mxu3 %v1879_v38  ;;  %v1928_v38 = vsub.f32 %v1926_v60, %v1927_v0  ;;  %v1802_v59 = vsel %vm380_vm0, %v1754_v23, 0 }
 0x1d8   :  { %v1935_v37 = vand.u32 4294901760, %v1934_v30 }
 0x1d9   :  { %v1619_v48 = vpop.f32.mrf.mxu2  ;;  %v1929_v53 = vand.u32 4294901760, %v1928_v38 }
 0x1da   :  { %v1620_v2 = vadd.f32 %v1619_v48, %v1511_v4  ;;  %v1704_v47 = vpop.f32.mrf.mxu3  ;;  %v6257_v4 = vand.u32 4294901760, %v1802_v59 }
 0x1db   :  { %v6242_v63 = vpop.f32.mrf.mxu0 }
 0x1dc   :  { %v6244_v20 = vpop.f32.mrf.mxu1  ;;  %v6246_v25 = vadd.f32 %v1704_v47, %v1620_v2  ;;  %v1936_v47 = vsub.f32 %v1934_v30, %v1935_v37  ;;  %v1942_v10 = vsub.f32 %v1802_v59, %v6257_v4 }
 0x1de   :  { %9025 = vst [vmem:[#allocation12_spill] sm:$0xff] %v6246_v25  ;;  %1922 = vmatmul.f32.gmra.mxu0 %v1921_v45  ;;  %2096 = vmatmul.f32.gmra.mxu2 %v6107_v51  ;;  %v1937_v51 = vand.u32 4294901760, %v1936_v47 }
 0x1df   :  { %2020 = vmatmul.f32.gmra.mxu1 %v6193_v52  ;;  %2203 = vmatmul.f32.gmra.mxu3 %v1887_v22  ;;  %v1943_v22 = vand.u32 4294901760, %v1942_v10 }
 0x1e1   :  { %v1944_v38 = vsub.f32 %v1942_v10, %v1943_v22 }
 0x1e3   :  { %v6259_v48 = vpop.f32.mrf.mxu0  ;;  %v1945_v59 = vand.u32 4294901760, %v1944_v38  ;;  %v6295_v38 = vpop.f32.mrf.mxu2 }
 0x1e4   :  { %v6261_v2 = vpop.f32.mrf.mxu1 }
 0x1e6   :  { %1930 = vmatmul.f32.gmra.mxu0 %v1929_v53  ;;  %2101 = vmatmul.f32.gmra.mxu2 %v6133_v40 }
 0x1e7   :  { %2024 = vmatmul.f32.gmra.mxu1 %v6219_v3  ;;  %2209 = vmatmul.f32.gmra.mxu3 %v1895_v7  ;;  %v9026_v7 = vand.u32 4294901760, %v6185_v6 }
 0x1eb   :  { %v6268_v45 = vpop.f32.mrf.mxu0 }
 0x1ec   :  { %v6270_v23 = vpop.f32.mrf.mxu1 }
 0x1ee   :  { %1938 = vmatmul.f32.gmra.mxu0 %v1937_v51  ;;  %2106 = vmatmul.f32.gmra.mxu2 %v6159_v8 }
 0x1ef   :  { %2028 = vmatmul.f32.gmra.mxu1 %v6240_v18  ;;  %2215 = vmatmul.f32.gmra.mxu3 %v1903_v13 }
 0x1f3   :  { %v6276_v53 = vpop.f32.mrf.mxu0 }
 0x1f4   :  { %v6278_v40 = vpop.f32.mrf.mxu1 }
 0x1f6   :  { %1946 = vmatmul.f32.gmra.mxu0 %v1945_v59  ;;  %2111 = vmatmul.f32.gmra.mxu2 %v6185_v6  ;;  %v6299_v6 = vpop.f32.mrf.mxu3 }
 0x1f7   :  { %2032 = vmatmul.f32.gmra.mxu1 %v6257_v4  ;;  %2221 = vmatmul.f32.gmra.mxu3 %v9026_v7 }
 0x1fb   :  { %v6284_v47 = vpop.f32.mrf.mxu0 }
 0x1fc   :  { %v6286_v51 = vpop.f32.mrf.mxu1 }
 0x1fe   :  { %2116 = vmatmul.f32.gmra.mxu2 %v6211_v28  ;;  %2269 = vmatmul.f32.vlgmr.msra.gmra.mxu0 %v5889_v61 }
 0x1ff   :  { %2227 = vmatmul.f32.gmra.mxu3 %v1919_v42  ;;  %2351 = vmatmul.f32.vlgmr.msra.gmra.mxu1 %v5889_v61  ;;  %v6306_v61 = vpop.f32.mrf.mxu2  ;;  %v6309_v42 = vpop.f32.mrf.mxu3 }
 0x203   :  { %v6291_v8 = vpop.f32.mrf.mxu0 }
 0x204   :  { %v6293_v13 = vpop.f32.mrf.mxu1 }
 0x206   :  { %2121 = vmatmul.f32.gmra.mxu2 %v1926_v60  ;;  %2273 = vmatmul.f32.gmra.mxu0 %v5911_v26 }
 0x207   :  { %2233 = vmatmul.f32.gmra.mxu3 %v1927_v0  ;;  %2355 = vmatmul.f32.gmra.mxu1 %v5911_v26  ;;  %v6317_v26 = vpop.f32.mrf.mxu2 }
 0x20b   :  { %v6301_v28 = vpop.f32.mrf.mxu0 }
 0x20c   :  { %9027 = vst [vmem:[#allocation13_spill] sm:$0xff] %v6301_v28  ;;  %v6303_v59 = vpop.f32.mrf.mxu1 }
 0x20d   :  { %9028 = vst [vmem:[#allocation14_spill] sm:$0xff] %v6303_v59 }
 0x20e   :  { %2126 = vmatmul.f32.gmra.mxu2 %v1934_v30  ;;  %2277 = vmatmul.f32.gmra.mxu0 %v5937_v44 }
 0x20f   :  { %2239 = vmatmul.f32.gmra.mxu3 %v1935_v37  ;;  %2359 = vmatmul.f32.gmra.mxu1 %v5937_v44  ;;  %v6323_v37 = vpop.f32.mrf.mxu3  ;;  %v6327_v44 = vpop.f32.mrf.mxu2 }
 0x213   :  { %v6311_v60 = vpop.f32.mrf.mxu0 }
 0x214   :  { %9029 = vst [vmem:[#allocation15_spill] sm:$0xff] %v6311_v60  ;;  %v6313_v0 = vpop.f32.mrf.mxu1 }
 0x215   :  { %9030 = vst [vmem:[#allocation16_spill] sm:$0xff] %v6313_v0 }
 0x216   :  { %2131 = vmatmul.f32.gmra.mxu2 %v1942_v10  ;;  %2281 = vmatmul.f32.gmra.mxu0 %v5962_v14 }
 0x217   :  { %2245 = vmatmul.f32.gmra.mxu3 %v1943_v22  ;;  %2363 = vmatmul.f32.gmra.mxu1 %v5962_v14  ;;  %v6334_v14 = vpop.f32.mrf.mxu3  ;;  %v6341_v39 = vpop.f32.mrf.mxu2 }
 0x21b   :  { %v6319_v30 = vpop.f32.mrf.mxu0 }
 0x21c   :  { %9031 = vst [vmem:[#allocation17_spill] sm:$0xff] %v6319_v30  ;;  %v6321_v7 = vpop.f32.mrf.mxu1 }
 0x21d   :  { %9032 = vst [vmem:[#allocation18_spill] sm:$0xff] %v6321_v7 }
 0x21e   :  { %2285 = vmatmul.f32.gmra.mxu0 %v5987_v19 }
 0x21f   :  { %2367 = vmatmul.f32.gmra.mxu1 %v5987_v19  ;;  %v6345_v19 = vpop.f32.mrf.mxu3  ;;  %v6352_v36 = vpop.f32.mrf.mxu2 }
 0x223   :  { %v6329_v10 = vpop.f32.mrf.mxu0 }
 0x224   :  { %9033 = vst [vmem:[#allocation19_spill] sm:$0xff] %v6329_v10  ;;  %v6331_v31 = vpop.f32.mrf.mxu1 }
 0x225   :  { %9034 = vst [vmem:[#allocation20_spill] sm:$0xff] %v6331_v31 }
 0x226   :  { %2289 = vmatmul.f32.gmra.mxu0 %v6012_v16 }
 0x227   :  { %2371 = vmatmul.f32.gmra.mxu1 %v6012_v16  ;;  %v6355_v16 = vpop.f32.mrf.mxu3 }
 0x22b   :  { %v6337_v22 = vpop.f32.mrf.mxu0 }
 0x22c   :  { %9035 = vst [vmem:[#allocation21_spill] sm:$0xff] %v6337_v22  ;;  %v6339_v29 = vpop.f32.mrf.mxu1 }
 0x22d   :  { %9036 = vst [vmem:[#allocation22_spill] sm:$0xff] %v6339_v29 }
 0x22e   :  { %2293 = vmatmul.f32.gmra.mxu0 %v6037_v54 }
 0x22f   :  { %2375 = vmatmul.f32.gmra.mxu1 %v6037_v54  ;;  %v6363_v54 = vpop.f32.mrf.mxu2  ;;  %v6369_v29 = vpop.f32.mrf.mxu3 }
 0x230   :  { %9043 = vst [vmem:[#allocation29_spill] sm:$0xff] %v6369_v29 }
 0x233   :  { %v6347_v17 = vpop.f32.mrf.mxu0 }
 0x234   :  { %9037 = vst [vmem:[#allocation23_spill] sm:$0xff] %v6347_v17  ;;  %v6349_v32 = vpop.f32.mrf.mxu1 }
 0x235   :  { %9038 = vst [vmem:[#allocation24_spill] sm:$0xff] %v6349_v32 }
 0x236   :  { %2297 = vmatmul.f32.gmra.mxu0 %v6063_v34 }
 0x237   :  { %2379 = vmatmul.f32.gmra.mxu1 %v6063_v34  ;;  %v6373_v34 = vpop.f32.mrf.mxu2 }
 0x238   :  { %9044 = vst [vmem:[#allocation30_spill] sm:$0xff] %v6373_v34 }
 0x23b   :  { %v6357_v49 = vpop.f32.mrf.mxu0 }
 0x23c   :  { %9039 = vst [vmem:[#allocation25_spill] sm:$0xff] %v6357_v49  ;;  %v6359_v25 = vpop.f32.mrf.mxu1 }
 0x23d   :  { %9040 = vst [vmem:[#allocation26_spill] sm:$0xff] %v6359_v25 }
 0x23e   :  { %2301 = vmatmul.f32.gmra.mxu0 %v6089_v43 }
 0x23f   :  { %2383 = vmatmul.f32.gmra.mxu1 %v6089_v43  ;;  %v6380_v43 = vpop.f32.mrf.mxu3  ;;  %v6387_v17 = vpop.f32.mrf.mxu2 }
 0x240   :  { %9045 = vst [vmem:[#allocation31_spill] sm:$0xff] %v6380_v43 }
 0x241   :  { %9046 = vst [vmem:[#allocation32_spill] sm:$0xff] %v6387_v17 }
 0x243   :  { %v6365_v31 = vpop.f32.mrf.mxu0 }
 0x244   :  { %9041 = vst [vmem:[#allocation27_spill] sm:$0xff] %v6365_v31  ;;  %v6367_v10 = vpop.f32.mrf.mxu1 }
 0x245   :  { %9042 = vst [vmem:[#allocation28_spill] sm:$0xff] %v6367_v10 }
 0x246   :  { %2305 = vmatmul.f32.gmra.mxu0 %v6115_v24 }
 0x247   :  { %2387 = vmatmul.f32.gmra.mxu1 %v6115_v24  ;;  %v6391_v24 = vpop.f32.mrf.mxu3  ;;  %v6398_v43 = vpop.f32.mrf.mxu2 }
 0x248   :  { %9047 = vst [vmem:[#allocation33_spill] sm:$0xff] %v6391_v24 }
 0x249   :  { %9048 = vst [vmem:[#allocation34_spill] sm:$0xff] %v6398_v43 }
 0x24b   :  { %v6375_v22 = vpop.f32.mrf.mxu0 }
 0x24c   :  { %v6377_v7 = vpop.f32.mrf.mxu1 }
 0x24e   :  { %2309 = vmatmul.f32.gmra.mxu0 %v6141_v50 }
 0x24f   :  { %2391 = vmatmul.f32.gmra.mxu1 %v6141_v50  ;;  %v6401_v50 = vpop.f32.mrf.mxu3 }
 0x250   :  { %9049 = vst [vmem:[#allocation35_spill] sm:$0xff] %v6401_v50 }
 0x253   :  { %v6383_v30 = vpop.f32.mrf.mxu0 }
 0x254   :  { %v6385_v32 = vpop.f32.mrf.mxu1 }
 0x256   :  { %2313 = vmatmul.f32.gmra.mxu0 %v6167_v21 }
 0x257   :  { %2395 = vmatmul.f32.gmra.mxu1 %v6167_v21  ;;  %v6409_v21 = vpop.f32.mrf.mxu2  ;;  %v6415_v29 = vpop.f32.mrf.mxu3 }
 0x258   :  { %9050 = vst [vmem:[#allocation36_spill] sm:$0xff] %v6409_v21 }
 0x259   :  { %9051 = vst [vmem:[#allocation37_spill] sm:$0xff] %v6415_v29 }
 0x25b   :  { %v6393_v25 = vpop.f32.mrf.mxu0 }
 0x25c   :  { %v6395_v49 = vpop.f32.mrf.mxu1 }
 0x25e   :  { %2317 = vmatmul.f32.gmra.mxu0 %v6193_v52 }
 0x25f   :  { %2399 = vmatmul.f32.gmra.mxu1 %v6193_v52  ;;  %v6419_v52 = vpop.f32.mrf.mxu2 }
 0x260   :  { %9052 = vst [vmem:[#allocation38_spill] sm:$0xff] %v6419_v52 }
 0x263   :  { %v6403_v0 = vpop.f32.mrf.mxu0 }
 0x264   :  { %v6405_v17 = vpop.f32.mrf.mxu1 }
 0x266   :  { %2321 = vmatmul.f32.gmra.mxu0 %v6219_v3 }
 0x267   :  { %2403 = vmatmul.f32.gmra.mxu1 %v6219_v3  ;;  %v6426_v3 = vpop.f32.mrf.mxu3  ;;  %v6433_v29 = vpop.f32.mrf.mxu2 }
 0x268   :  { %9055 = vst [vmem:[#allocation41_spill] sm:$0xff] %v6426_v3 }
 0x269   :  { %9058 = vst [vmem:[#allocation44_spill] sm:$0xff] %v6433_v29 }
 0x26b   :  { %v6411_v24 = vpop.f32.mrf.mxu0 }
 0x26c   :  { %v6413_v60 = vpop.f32.mrf.mxu1 }
 0x26e   :  { %2325 = vmatmul.f32.gmra.mxu0 %v6240_v18 }
 0x26f   :  { %2407 = vmatmul.f32.gmra.mxu1 %v6240_v18  ;;  %v6435_v28 = vpop.f32.mrf.mxu3 }
 0x270   :  { %9059 = vst [vmem:[#allocation45_spill] sm:$0xff] %v6435_v28 }
 0x273   :  { %v6421_v50 = vpop.f32.mrf.mxu0 }
 0x274   :  { %9053 = vst [vmem:[#allocation39_spill] sm:$0xff] %v6421_v50  ;;  %v6423_v43 = vpop.f32.mrf.mxu1  ;;  %v6441_v50 = vpop.f32.mrf.mxu2 }
 0x275   :  { %9054 = vst [vmem:[#allocation40_spill] sm:$0xff] %v6423_v43 }
 0x276   :  { %2329 = vmatmul.f32.gmra.mxu0 %v6257_v4  ;;  %9062 = vst [vmem:[#allocation48_spill] sm:$0xff] %v6441_v50 }
 0x277   :  { %2411 = vmatmul.f32.gmra.mxu1 %v6257_v4  ;;  %v6443_v43 = vpop.f32.mrf.mxu3 }
 0x278   :  { %9063 = vst [vmem:[#allocation49_spill] sm:$0xff] %v6443_v43 }
 0x27b   :  { %v6429_v21 = vpop.f32.mrf.mxu0 }
 0x27c   :  { %9056 = vst [vmem:[#allocation42_spill] sm:$0xff] %v6429_v21  ;;  %v6431_v59 = vpop.f32.mrf.mxu1  ;;  %v6449_v4 = vpop.f32.mrf.mxu2 }
 0x27d   :  { %9057 = vst [vmem:[#allocation43_spill] sm:$0xff] %v6431_v59 }
 0x27e   :  { %9066 = vst [vmem:[#allocation52_spill] sm:$0xff] %v6449_v4 }
 0x27f   :  { %v6455_v29 = vpop.f32.mrf.mxu3 }
 0x280   :  { %9069 = vst [vmem:[#allocation55_spill] sm:$0xff] %v6455_v29 }
 0x283   :  { %v6437_v18 = vpop.f32.mrf.mxu0 }
 0x284   :  { %9060 = vst [vmem:[#allocation46_spill] sm:$0xff] %v6437_v18  ;;  %v6439_v52 = vpop.f32.mrf.mxu1  ;;  %v6457_v28 = vpop.f32.mrf.mxu2 }
 0x285   :  { %9061 = vst [vmem:[#allocation47_spill] sm:$0xff] %v6439_v52 }
 0x286   :  { %9070 = vst [vmem:[#allocation56_spill] sm:$0xff] %v6457_v28 }
 0x287   :  { %v6463_v50 = vpop.f32.mrf.mxu3 }
 0x288   :  { %9073 = vst [vmem:[#allocation59_spill] sm:$0xff] %v6463_v50 }
 0x28b   :  { %v6445_v10 = vpop.f32.mrf.mxu0 }
 0x28c   :  { %9064 = vst [vmem:[#allocation50_spill] sm:$0xff] %v6445_v10  ;;  %v6447_v3 = vpop.f32.mrf.mxu1 }
 0x28d   :  { %9065 = vst [vmem:[#allocation51_spill] sm:$0xff] %v6447_v3  ;;  %v6469_v3 = vpop.f32.mrf.mxu2 }
 0x28e   :  { %9076 = vst [vmem:[#allocation62_spill] sm:$0xff] %v6469_v3 }
 0x28f   :  { %v6471_v4 = vpop.f32.mrf.mxu3 }
 0x290   :  { %9077 = vst [vmem:[#allocation63_spill] sm:$0xff] %v6471_v4 }
 0x293   :  { %v6451_v21 = vpop.f32.mrf.mxu0 }
 0x294   :  { %9067 = vst [vmem:[#allocation53_spill] sm:$0xff] %v6451_v21  ;;  %v6453_v59 = vpop.f32.mrf.mxu1 }
 0x295   :  { %9068 = vst [vmem:[#allocation54_spill] sm:$0xff] %v6453_v59  ;;  %v6477_v29 = vpop.f32.mrf.mxu2 }
 0x296   :  { %9080 = vst [vmem:[#allocation66_spill] sm:$0xff] %v6477_v29 }
 0x297   :  { %v6479_v28 = vpop.f32.mrf.mxu3 }
 0x298   :  { %9081 = vst [vmem:[#allocation67_spill] sm:$0xff] %v6479_v28 }
 0x29b   :  { %v6459_v18 = vpop.f32.mrf.mxu0 }
 0x29c   :  { %9071 = vst [vmem:[#allocation57_spill] sm:$0xff] %v6459_v18  ;;  %v6461_v52 = vpop.f32.mrf.mxu1 }
 0x29d   :  { %9072 = vst [vmem:[#allocation58_spill] sm:$0xff] %v6461_v52  ;;  %v6485_v50 = vpop.f32.mrf.mxu2 }
 0x29e   :  { %9084 = vst [vmem:[#allocation70_spill] sm:$0xff] %v6485_v50 }
 0x29f   :  { %v6491_v3 = vpop.f32.mrf.mxu3 }
 0x2a0   :  { %9087 = vst [vmem:[#allocation73_spill] sm:$0xff] %v6491_v3  ;;  %v1407_v3 = vadd.f32 %v6143_v12, %v5877_v11 }
 0x2a3   :  { %v6465_v43 = vpop.f32.mrf.mxu0 }
 0x2a4   :  { %9074 = vst [vmem:[#allocation60_spill] sm:$0xff] %v6465_v43  ;;  %v6467_v10 = vpop.f32.mrf.mxu1 }
 0x2a5   :  { %9075 = vst [vmem:[#allocation61_spill] sm:$0xff] %v6467_v10  ;;  %v2112_v4 = vpop.f32.mrf.mxu2 }
 0x2a7   :  { %v6497_v29 = vpop.f32.mrf.mxu3 }
 0x2a8   :  { %9090 = vst [vmem:[#allocation76_spill] sm:$0xff] %v6497_v29 }
 0x2ab   :  { %v6473_v21 = vpop.f32.mrf.mxu0 }
 0x2ac   :  { %9078 = vst [vmem:[#allocation64_spill] sm:$0xff] %v6473_v21  ;;  %v6475_v59 = vpop.f32.mrf.mxu1 }
 0x2ad   :  { %9079 = vst [vmem:[#allocation65_spill] sm:$0xff] %v6475_v59 }
 0x2af   :  { %v2228_v31 = vpop.f32.mrf.mxu3 }
 0x2b3   :  { %v6481_v18 = vpop.f32.mrf.mxu0 }
 0x2b4   :  { %9082 = vst [vmem:[#allocation68_spill] sm:$0xff] %v6481_v18  ;;  %v6483_v52 = vpop.f32.mrf.mxu1 }
 0x2b5   :  { %9083 = vst [vmem:[#allocation69_spill] sm:$0xff] %v6483_v52  ;;  %v2117_v52 = vpop.f32.mrf.mxu2 }
 0x2b7   :  { %v2234_v29 = vpop.f32.mrf.mxu3 }
 0x2bb   :  { %v6487_v43 = vpop.f32.mrf.mxu0 }
 0x2bc   :  { %9085 = vst [vmem:[#allocation71_spill] sm:$0xff] %v6487_v43  ;;  %v6489_v10 = vpop.f32.mrf.mxu1 }
 0x2bd   :  { %9086 = vst [vmem:[#allocation72_spill] sm:$0xff] %v6489_v10  ;;  %v2122_v10 = vpop.f32.mrf.mxu2 }
 0x2c3   :  { %v6493_v21 = vpop.f32.mrf.mxu0 }
 0x2c4   :  { %9088 = vst [vmem:[#allocation74_spill] sm:$0xff] %v6493_v21  ;;  %v6495_v59 = vpop.f32.mrf.mxu1  ;;  %v1412_v21 = vadd.f32 %v6169_v41, %v5896_v62 }
 0x2c5   :  { %9089 = vst [vmem:[#allocation75_spill] sm:$0xff] %v6495_v59  ;;  %v1417_v59 = vadd.f32 %v6195_v56, %v5918_v27  ;;  %v1432_v27 = vadd.f32 %v6259_v48, %v5993_v5 }
 0x2c6   :  { %v1523_v11 = vadd.f32 %v6173_v1, %v1412_v21  ;;  %v1442_v1 = vadd.f32 %v6276_v53, %v6043_v9  ;;  %v9101_v21 = vld [vmem:[#allocation29_spill] sm:$0xff] }
 0x2c7   :  { %v1529_v12 = vadd.f32 %v6199_v46, %v1417_v59  ;;  %v2026_v46 = vadd.f32 %v6405_v17, %v6403_v0  ;;  %v1547_v5 = vadd.f32 %v6261_v2, %v1432_v27  ;;  %v2240_v59 = vpop.f32.mrf.mxu3  ;;  %v2014_v0 = vadd.f32 %v6377_v7, %v6375_v22  ;;  %v9107_v27 = vld [vmem:[#allocation39_spill] sm:$0xff] }
 0x2c8   :  { %v1628_v56 = vadd.f32 %v6306_v61, %v1523_v11 }
 0x2c9   :  { %v2123_v9 = vadd.f32 %v2122_v10, %v2026_v46  ;;  %v9096_v10 = vld [vmem:[#allocation27_spill] sm:$0xff] }
 0x2ca   :  { %v6547_v2 = vadd.f32 %v6309_v42, %v1628_v56 }
 0x2cb   :  { %v6499_v28 = vpop.f32.mrf.mxu0 }
 0x2cc   :  { %9091 = vst [vmem:[#allocation77_spill] sm:$0xff] %v6499_v28  ;;  %v6501_v18 = vpop.f32.mrf.mxu1 }
 0x2cd   :  { %9092 = vst [vmem:[#allocation78_spill] sm:$0xff] %v6501_v18  ;;  %v1517_v18 = vadd.f32 %v6147_v15, %v1407_v3  ;;  %v1437_v15 = vadd.f32 %v6268_v45, %v6018_v55  ;;  %v2022_v45 = vadd.f32 %v6395_v49, %v6393_v25  ;;  %v2018_v49 = vadd.f32 %v6385_v32, %v6383_v30  ;;  %v9105_v3 = vld [vmem:[#allocation26_spill] sm:$0xff] }
 0x2ce   :  { %v2235_v32 = vadd.f32 %v2234_v29, %v2123_v9  ;;  %v9103_v29 = vld [vmem:[#allocation16_spill] sm:$0xff] }
 0x2cf   :  { %v1624_v62 = vadd.f32 %v6295_v38, %v1517_v18  ;;  %v1553_v17 = vadd.f32 %v6270_v23, %v1437_v15  ;;  %v2118_v25 = vadd.f32 %v2117_v52, %v2022_v45  ;;  %v1974_v23 = vadd.f32 %v6286_v51, %v6284_v47  ;;  %v9098_v47 = vld [vmem:[#allocation70_spill] sm:$0xff]  ;;  %v9109_v15 = vld [vmem:[#allocation76_spill] sm:$0xff] }
 0x2d0   :  { %v2108_v51 = vadd.f32 %v9098_v47, %v2014_v0 }
 0x2d1   :  { %v1648_v42 = vadd.f32 %v6363_v54, %v1553_v17  ;;  %v9099_v54 = vld [vmem:[#allocation13_spill] sm:$0xff]  ;;  %v2229_v7 = vadd.f32 %v2228_v31, %v2118_v25 }
 0x2d2   :  { %v9116_v25 = vld [vmem:[#allocation17_spill] sm:$0xff] }
 0x2d3   :  { %v6503_v50 = vpop.f32.mrf.mxu0 }
 0x2d4   :  { %9093 = vst [vmem:[#allocation79_spill] sm:$0xff] %v6503_v50  ;;  %v6505_v43 = vpop.f32.mrf.mxu1  ;;  %v1422_v50 = vadd.f32 %v6221_v35, %v5943_v57  ;;  %v1632_v57 = vadd.f32 %v6317_v26, %v1529_v12  ;;  %v2127_v35 = vpop.f32.mrf.mxu2  ;;  %v2113_v26 = vadd.f32 %v2112_v4, %v2018_v49  ;;  %v9106_v4 = vld [vmem:[#allocation66_spill] sm:$0xff] }
 0x2d5   :  { %9094 = vst [vmem:[#allocation80_spill] sm:$0xff] %v6505_v43  ;;  %v1427_v43 = vadd.f32 %v6242_v63, %v5968_v58 }
 0x2d6   :  { %v1535_v41 = vadd.f32 %v6225_v33, %v1422_v50  ;;  %v6537_v33 = vadd.f32 %v6299_v6, %v1624_v62  ;;  %v6550_v38 = vadd.f32 %v6323_v37, %v1632_v57  ;;  %v1644_v6 = vadd.f32 %v6352_v36, %v1547_v5  ;;  %v9095_v37 = vld [vmem:[#allocation30_spill] sm:$0xff]  ;;  %v9111_v5 = vld [vmem:[#allocation23_spill] sm:$0xff] }
 0x2d7   :  { %v1541_v58 = vadd.f32 %v6244_v20, %v1427_v43  ;;  %v2030_v20 = vadd.f32 %v6413_v60, %v6411_v24  ;;  %v9100_v24 = vld [vmem:[#allocation14_spill] sm:$0xff]  ;;  %v2223_v57 = vadd.f32 %v9109_v15, %v2113_v26  ;;  %v9119_v26 = vld [vmem:[#allocation21_spill] sm:$0xff]  ;;  %v9133_v15 = vld [vmem:[#allocation59_spill] sm:$0xff] }
 0x2d8   :  { %v1636_v63 = vadd.f32 %v6327_v44, %v1535_v41  ;;  %v1729_v30 = vadd.f32 %v6355_v16, %v1644_v6  ;;  %v6574_v50 = vadd.f32 %v9100_v24, %v9099_v54  ;;  %v9104_v16 = vld [vmem:[#allocation25_spill] sm:$0xff]  ;;  %v9108_v41 = vld [vmem:[#allocation40_spill] sm:$0xff] }
 0x2d9   :  { %v1640_v55 = vadd.f32 %v6341_v39, %v1541_v58  ;;  %v1559_v39 = vadd.f32 %v6278_v40, %v1442_v1  ;;  %v2128_v61 = vadd.f32 %v2127_v35, %v2030_v20  ;;  %v1978_v40 = vadd.f32 %v6293_v13, %v6291_v8  ;;  %v9102_v13 = vld [vmem:[#allocation15_spill] sm:$0xff]  ;;  %v9114_v20 = vld [vmem:[#allocation73_spill] sm:$0xff] }
 0x2da   :  { %v6557_v60 = vadd.f32 %v6334_v14, %v1636_v63  ;;  %v9097_v14 = vld [vmem:[#allocation28_spill] sm:$0xff]  ;;  %v1733_v8 = vadd.f32 %v9101_v21, %v1648_v42  ;;  %v1986_v52 = vadd.f32 %v9103_v29, %v9102_v13  ;;  %v2006_v18 = vadd.f32 %v9105_v3, %v9104_v16  ;;  %v9110_v1 = vld [vmem:[#allocation31_spill] sm:$0xff]  ;;  %v9123_v54 = vld [vmem:[#allocation77_spill] sm:$0xff] }
 0x2db   :  { %v2318_v28 = vpop.f32.mrf.mxu0  ;;  %v1725_v36 = vadd.f32 %v6345_v19, %v1640_v55  ;;  %v1652_v44 = vadd.f32 %v9095_v37, %v1559_v39  ;;  %v2010_v43 = vadd.f32 %v9097_v14, %v9096_v10  ;;  %v2241_v22 = vadd.f32 %v2240_v59, %v2128_v61  ;;  %v9112_v63 = vld [vmem:[#allocation24_spill] sm:$0xff]  ;;  %v9113_v55 = vld [vmem:[#allocation62_spill] sm:$0xff]  ;;  %v9115_v6 = vld [vmem:[#allocation79_spill] sm:$0xff]  ;;  %v2246_v14 = vpop.f32.mrf.mxu3 }
 0x2dc   :  { %v6513_v34 = vpop.f32.mrf.mxu1  ;;  %v2132_v12 = vpop.f32.mrf.mxu2  ;;  %v2034_v56 = vadd.f32 %v9108_v41, %v9107_v27  ;;  %v2319_v31 = vadd.f32 %v2318_v28, %v2229_v7  ;;  %v2098_v45 = vadd.f32 %v9113_v55, %v2006_v18  ;;  %v2217_v9 = vadd.f32 %v9114_v20, %v2108_v51  ;;  %v9117_v61 = vld [vmem:[#allocation18_spill] sm:$0xff]  ;;  %v9118_v28 = vld [vmem:[#allocation32_spill] sm:$0xff]  ;;  %v9128_v16 = vld [vmem:[#allocation63_spill] sm:$0xff] }
 0x2dd   :  { %v2103_v11 = vadd.f32 %v9106_v4, %v2010_v43  ;;  %v1737_v46 = vadd.f32 %v9110_v1, %v1652_v44  ;;  %v2315_v59 = vadd.f32 %v9115_v6, %v2223_v57  ;;  %v1990_v42 = vadd.f32 %v9117_v61, %v9116_v25  ;;  %v9121_v44 = vld [vmem:[#allocation56_spill] sm:$0xff]  ;;  %v9122_v43 = vld [vmem:[#allocation67_spill] sm:$0xff]  ;;  %v9126_v21 = vld [vmem:[#allocation34_spill] sm:$0xff] }
 0x2de   :  { %v2133_v17 = vadd.f32 %v2132_v12, %v2034_v56  ;;  %v2058_v0 = vadd.f32 %v9118_v28, %v1974_v23  ;;  %v2311_v51 = vadd.f32 %v9123_v54, %v2217_v9  ;;  %v2401_v24 = vadd.f32 %v6513_v34, %v2319_v31  ;;  %v9127_v29 = vld [vmem:[#allocation52_spill] sm:$0xff]  ;;  %v9131_v27 = vld [vmem:[#allocation33_spill] sm:$0xff]  ;;  %v9134_v31 = vld [vmem:[#allocation71_spill] sm:$0xff] }
 0x2df   :  { %v2211_v47 = vadd.f32 %v9122_v43, %v2103_v11  ;;  %v2063_v13 = vadd.f32 %v9126_v21, %v1978_v40  ;;  %v2205_v3 = vadd.f32 %v9128_v16, %v2098_v45  ;;  %v6608_v18 = vld [vmem:[%s8876_s0] sm:$0xff]  ;;  %v9129_v11 = vld [vmem:[#allocation74_spill] sm:$0xff]  ;;  %v9138_v6 = vld [vmem:[#allocation55_spill] sm:$0xff] }
 0x2e0   :  { %v2247_v4 = vadd.f32 %v2246_v14, %v2133_v17  ;;  %55 = vadd.xlane.f32.xlu0 %v6608_v18  ;;  %v6614_v41 = vadd.f32 %v9131_v27, %v2058_v0  ;;  %v9132_v40 = vld [vmem:[#allocation48_spill] sm:$0xff]  ;;  %v9135_v1 = vld [vmem:[#allocation78_spill] sm:$0xff]  ;;  %v9140_v25 = vld [vmem:[#allocation75_spill] sm:$0xff] }
 0x2e1   :  { %v2307_v12 = vadd.f32 %v9129_v11, %v2211_v47  ;;  %v9137_v9 = vld [vmem:[#allocation44_spill] sm:$0xff] }
 0x2e2   :  { %v2078_v17 = vadd.f32 %v9137_v9, %v1990_v42  ;;  %v9144_v43 = vld [vmem:[#allocation72_spill] sm:$0xff] }
 0x2e3   :  { %v2322_v48 = vpop.f32.mrf.mxu0  ;;  %v2389_v61 = vadd.f32 %v9140_v25, %v2307_v12  ;;  %v9151_v12 = vld [vmem:[#allocation65_spill] sm:$0xff] }
 0x2e4   :  { %v2404_v53 = vpop.f32.mrf.mxu1  ;;  %v2323_v19 = vadd.f32 %v2322_v48, %v2235_v32  ;;  %v2002_v48 = vadd.f32 %v9112_v63, %v9111_v5  ;;  %v9120_v32 = vld [vmem:[#allocation22_spill] sm:$0xff]  ;;  %v2393_v5 = vadd.f32 %v9135_v1, %v2311_v51  ;;  %v2427_v63 = vadd.f32 %v2401_v24, %v1725_v36 }
 0x2e5   :  { %v1998_v37 = vadd.f32 %v9120_v32, %v9119_v26  ;;  %v9141_v36 = vld [vmem:[#allocation38_spill] sm:$0xff] }
 0x2e6   :  { %v2405_v39 = vadd.f32 %v2404_v53, %v2323_v19  ;;  %v2093_v10 = vadd.f32 %v9121_v44, %v2002_v48  ;;  %v9124_v53 = vld [vmem:[#allocation19_spill] sm:$0xff]  ;;  %v2073_v32 = vadd.f32 %v9141_v36, %v1986_v52  ;;  %v2425_v42 = vadd.f32 %v2393_v5, %v6550_v38  ;;  %v9147_v52 = vld [vmem:[#allocation60_spill] sm:$0xff]  ;;  %v9159_v36 = vld [vmem:[#allocation46_spill] sm:$0xff] }
 0x2e7   :  { %v2088_v23 = vadd.f32 %v9127_v29, %v1998_v37  ;;  %v9142_v37 = vld [vmem:[#allocation49_spill] sm:$0xff]  ;;  %v6635_v54 = vand.u32 4294901760, %v2427_v63 }
 0x2e8   :  { %v2199_v57 = vadd.f32 %v9133_v15, %v2093_v10  ;;  %v9143_v10 = vld [vmem:[#allocation64_spill] sm:$0xff] }
 0x2e9   :  { %v6671_v27 = vsub.f32 %v2427_v63, %v6635_v54 }
 0x2eb   :  { %v2326_v62 = vpop.f32.mrf.mxu0 }
 0x2ec   :  { %v2327_v35 = vadd.f32 %v2326_v62, %v2241_v22  ;;  %v2408_v58 = vpop.f32.mrf.mxu1  ;;  %v9125_v22 = vld [vmem:[#allocation20_spill] sm:$0xff] }
 0x2ed   :  { %v1994_v19 = vadd.f32 %v9125_v22, %v9124_v53  ;;  %v9130_v62 = vld [vmem:[#allocation80_spill] sm:$0xff]  ;;  %v9146_v22 = vld [vmem:[#allocation45_spill] sm:$0xff] }
 0x2ee   :  { %v2409_v49 = vadd.f32 %v2408_v58, %v2327_v35  ;;  %v2397_v34 = vadd.f32 %v9130_v62, %v2315_v59  ;;  %v2303_v35 = vadd.f32 %v9134_v31, %v2205_v3  ;;  %v2193_v59 = vadd.f32 %v9138_v6, %v2088_v23  ;;  %v9154_v31 = vld [vmem:[#allocation61_spill] sm:$0xff] }
 0x2ef   :  { %v2083_v56 = vadd.f32 %v9132_v40, %v1994_v19  ;;  %v2181_v19 = vadd.f32 %v9146_v22, %v2078_v17  ;;  %v2424_v23 = vadd.f32 %v2389_v61, %v6547_v2  ;;  %v9157_v17 = vld [vmem:[#allocation58_spill] sm:$0xff] }
 0x2f0   :  { %v2429_v7 = vadd.f32 %v2409_v49, %v1733_v8  ;;  %v2428_v8 = vadd.f32 %v2405_v39, %v1729_v30  ;;  %v9136_v30 = vld [vmem:[#allocation35_spill] sm:$0xff]  ;;  %v9139_v39 = vld [vmem:[#allocation68_spill] sm:$0xff]  ;;  %v2426_v28 = vadd.f32 %v2397_v34, %v6557_v60  ;;  %v2295_v14 = vadd.f32 %v9143_v10, %v2193_v59  ;;  %v9161_v10 = vld [vmem:[#allocation10_spill] sm:$0xff] }
 0x2f1   :  { %v2163_v20 = vadd.f32 %v9136_v30, %v2063_v13  ;;  %v2299_v49 = vadd.f32 %v9139_v39, %v2199_v57  ;;  %v2187_v44 = vadd.f32 %v9142_v37, %v2083_v56  ;;  %v2385_v47 = vadd.f32 %v9144_v43, %v2303_v35  ;;  %v9145_v60 = vld [vmem:[#allocation36_spill] sm:$0xff]  ;;  %v9148_v13 = vld [vmem:[#allocation69_spill] sm:$0xff]  ;;  %v9156_v30 = vld [vmem:[#allocation50_spill] sm:$0xff] }
 0x2f2   :  { %v6620_v48 = vand.u32 4294901760, %v2429_v7  ;;  %v6628_v0 = vand.u32 4294901760, %v2428_v8  ;;  %v2068_v53 = vadd.f32 %v9145_v60, %v6574_v50  ;;  %v6646_v16 = vand.u32 4294901760, %v2426_v28  ;;  %v9149_v50 = vld [vmem:[#allocation41_spill] sm:$0xff]  ;;  %v9158_v59 = vld [vmem:[#allocation11_spill] sm:$0xff]  ;;  %v9160_v37 = vld [vmem:[#allocation54_spill] sm:$0xff] }
 0x2f3   :  { %v2330_v58 = vpop.f32.mrf.mxu0  ;;  %v2291_v21 = vadd.f32 %v9147_v52, %v2187_v44  ;;  %v2381_v29 = vadd.f32 %v9148_v13, %v2299_v49  ;;  %v2175_v3 = vadd.f32 %v9149_v50, %v2073_v32  ;;  %v2377_v62 = vadd.f32 %v9151_v12, %v2295_v14  ;;  %v9152_v56 = vld [vmem:[#allocation37_spill] sm:$0xff]  ;;  %v6723_v60 = vld [vmem:[%s8876_s0 + $0x10] sm:$0xff]  ;;  %v9166_v12 = vld [vmem:[#allocation8_spill] sm:$0xff] }
 0x2f4   :  { %v2331_v55 = vadd.f32 %v2330_v58, %v2247_v4  ;;  %v2412_v45 = vpop.f32.mrf.mxu1  ;;  %v6638_v24 = vsub.f32 %v2429_v7, %v6620_v48  ;;  %v6656_v7 = vld [vmem:[%s8876_s0 + $0x8] sm:$0xff]  ;;  %v2423_v2 = vadd.f32 %v2385_v47, %v6537_v33  ;;  %v6663_v34 = vand.u32 4294901760, %v2425_v42  ;;  %v9155_v58 = vld [vmem:[#allocation12_spill] sm:$0xff]  ;;  %59 = vadd.xlane.f32.xlu1 %v6723_v60 }
 0x2f5   :  { %v9150_v4 = vld [vmem:[#allocation57_spill] sm:$0xff]  ;;  %57 = vadd.xlane.f32.xlu0 %v6656_v7  ;;  %v2169_v15 = vadd.f32 %v9152_v56, %v2068_v53  ;;  %v2373_v35 = vadd.f32 %v9154_v31, %v2291_v21  ;;  %v2422_v1 = vadd.f32 %v2381_v29, %v9155_v58  ;;  %v6678_v5 = vand.u32 4294901760, %v2424_v23  ;;  %v9162_v53 = vld [vmem:[#allocation42_spill] sm:$0xff]  ;;  %v9167_v31 = vld [vmem:[#allocation43_spill] sm:$0xff] }
 0x2f6   :  { %v2413_v26 = vadd.f32 %v2412_v45, %v2331_v55  ;;  %v2287_v11 = vadd.f32 %v9150_v4, %v2181_v19  ;;  %v2604_v40 = vand.u32 4294901760, %v6638_v24  ;;  %v9153_v57 = vld [vmem:[#allocation53_spill] sm:$0xff]  ;;  %v6684_v63 = vsub.f32 %v2426_v28, %v6646_v16  ;;  %v9163_v19 = vld [vmem:[#allocation51_spill] sm:$0xff] }
 0x2f7   :  { %v2283_v33 = vadd.f32 %v9153_v57, %v2175_v3  ;;  %v2279_v9 = vadd.f32 %v9156_v30, %v2169_v15  ;;  %v2421_v39 = vadd.f32 %v2377_v62, %v9158_v59  ;;  %v6690_v49 = vand.u32 4294901760, %v2423_v2  ;;  %v9164_v21 = vld [vmem:[#allocation9_spill] sm:$0xff]  ;;  %v9165_v4 = vld [vmem:[#allocation47_spill] sm:$0xff] }
 0x2f8   :  { %v2430_v51 = vadd.f32 %v2413_v26, %v1737_v46  ;;  %v6651_v46 = vsub.f32 %v2428_v8, %v6628_v0  ;;  %v2369_v6 = vadd.f32 %v9157_v17, %v2287_v11  ;;  %v2605_v61 = vsub.f32 %v6638_v24, %v2604_v40  ;;  %v9168_v58 = vld [vmem:[#allocation7_spill] sm:$0xff] }
 0x2f9   :  { %v6702_v28 = vsub.f32 %v2425_v42, %v6663_v34  ;;  %v2616_v26 = vand.u32 4294901760, %v6671_v27  ;;  %v2275_v32 = vadd.f32 %v9159_v36, %v2163_v20  ;;  %v2365_v44 = vadd.f32 %v9160_v37, %v2283_v33 }
 0x2fa   :  { %v6648_v38 = vand.u32 4294901760, %v2430_v51  ;;  %v2610_v45 = vand.u32 4294901760, %v6651_v46  ;;  %v2420_v14 = vadd.f32 %v2373_v35, %v9161_v10  ;;  %v6708_v43 = vand.u32 4294901760, %v2422_v1 }
 0x2fb   :  { %v2622_v20 = vand.u32 4294901760, %v6684_v63  ;;  %v2271_v22 = vadd.f32 %v9162_v53, %v6614_v41  ;;  %v2361_v52 = vadd.f32 %v9163_v19, %v2279_v9  ;;  %v2419_v13 = vadd.f32 %v2369_v6, %v9164_v21 }
 0x2fc   :  { %v6666_v8 = vsub.f32 %v2430_v51, %v6648_v38  ;;  %2436 = vmatpush.msrb.mxu2 %v6648_v38  ;;  %2887 = vmatpush.msrb.mxu1 %v6648_v38  ;;  %v2611_v42 = vsub.f32 %v6651_v46, %v2610_v45  ;;  %v6717_v51 = vsub.f32 %v2424_v23, %v6678_v5  ;;  %v6729_v29 = vand.u32 4294901760, %v2421_v39 }
 0x2fd   :  { %v2606_v23 = vand.u32 4294901760, %v2605_v61  ;;  %v2617_v50 = vsub.f32 %v6671_v27, %v2616_v26  ;;  %v6738_v41 = vsub.f32 %v2423_v2, %v6690_v49  ;;  %v2628_v3 = vand.u32 4294901760, %v6702_v28  ;;  %v9170_v61 = vld [vmem:[#allocation6_spill] sm:$0xff] }
 0x2fe   :  { %2438 = vmatpush.msrb.mxu2 %v6620_v48  ;;  %2759 = vmatpush.msrb.mxu0 %v6666_v8  ;;  %v2598_v55 = vand.u32 4294901760, %v6666_v8  ;;  %v2357_v11 = vadd.f32 %v9165_v4, %v2275_v32  ;;  %v2418_v62 = vadd.f32 %v2365_v44, %v9166_v12  ;;  %v6743_v56 = vand.u32 4294901760, %v2420_v14 }
 0x2ff   :  { %2889 = vmatpush.msrb.mxu1 %v6620_v48  ;;  %v2612_v15 = vand.u32 4294901760, %v2611_v42  ;;  %v2623_v2 = vsub.f32 %v6684_v63, %v2622_v20  ;;  %v6752_v57 = vsub.f32 %v2422_v1, %v6708_v43  ;;  %v2634_v33 = vand.u32 4294901760, %v6717_v51 }
 0x300   :  { %2440 = vmatpush.msrb.mxu2 %v6628_v0  ;;  %2762 = vmatpush.msrb.mxu0 %v6638_v24  ;;  %v2599_v25 = vsub.f32 %v6666_v8, %v2598_v55  ;;  %v2353_v35 = vadd.f32 %v9167_v31, %v2271_v22  ;;  %v2417_v30 = vadd.f32 %v2361_v52, %v9168_v58  ;;  %v6757_v9 = vand.u32 4294901760, %v2419_v13 }
 0x301   :  { %2891 = vmatpush.msrb.mxu1 %v6628_v0  ;;  %v6762_v17 = vsub.f32 %v2421_v39, %v6729_v29  ;;  %v2618_v1 = vand.u32 4294901760, %v2617_v50  ;;  %v2629_v6 = vsub.f32 %v6702_v28, %v2628_v3  ;;  %v2640_v59 = vand.u32 4294901760, %v6738_v41 }
 0x302   :  { %2442 = vmatpush.msrb.mxu2 %v6635_v54  ;;  %2765 = vmatpush.msrb.mxu0 %v6651_v46  ;;  %v2600_v47 = vand.u32 4294901760, %v2599_v25  ;;  %v6770_v25 = vand.u32 4294901760, %v6608_v18  ;;  %v2416_v36 = vadd.f32 %v2357_v11, %v9170_v61  ;;  %v6773_v32 = vand.u32 4294901760, %v2418_v62  ;;  %v45_v46 = vld [vmem:[%s8876_s0 + $0x30] sm:$0xff] }
 0x303   :  { %2893 = vmatpush.msrb.mxu1 %v6635_v54  ;;  %v2624_v39 = vand.u32 4294901760, %v2623_v2  ;;  %v2635_v37 = vsub.f32 %v6717_v51, %v2634_v33  ;;  %v6782_v44 = vsub.f32 %v2420_v14, %v6743_v56  ;;  %v2646_v10 = vand.u32 4294901760, %v6752_v57  ;;  %67 = vadd.xlane.f32.xlu0 %v45_v46 }
 0x304   :  { %2444 = vmatpush.msrb.mxu2 %v6646_v16  ;;  %2601 = vmatpush.msrb.mxu3 %v2600_v47  ;;  %9169 = vst [vmem:[#allocation30_spill] sm:$0xff] %v6770_v25  ;;  %v9171_v47 = vld [vmem:[#allocation5_spill] sm:$0xff]  ;;  %v6786_v53 = vand.u32 4294901760, %v2417_v30  ;;  %v6791_v22 = vsub.f32 %v2419_v13, %v6757_v9  ;;  %v2630_v19 = vand.u32 4294901760, %v2629_v6  ;;  %v2641_v14 = vsub.f32 %v6738_v41, %v2640_v59 }
 0x305   :  { %2768 = vmatpush.msrb.mxu0 %v6671_v27  ;;  %2895 = vmatpush.msrb.mxu1 %v6646_v16  ;;  %v2415_v42 = vadd.f32 %v2353_v35, %v9171_v47  ;;  %v2652_v52 = vand.u32 4294901760, %v6762_v17  ;;  %v6800_v21 = vsub.f32 %v6608_v18, %v6770_v25  ;;  %v2636_v13 = vand.u32 4294901760, %v2635_v37 }
 0x306   :  { %2446 = vmatpush.msrb.mxu2 %v6663_v34  ;;  %2607 = vmatpush.msrb.mxu3 %v2606_v23  ;;  %v6802_v23 = vand.u32 4294901760, %v2416_v36  ;;  %v2647_v50 = vsub.f32 %v6752_v57, %v2646_v10  ;;  %v6811_v4 = vsub.f32 %v2418_v62, %v6773_v32  ;;  %v2658_v18 = vand.u32 4294901760, %v6782_v44 }
 0x307   :  { %2771 = vmatpush.msrb.mxu0 %v6684_v63  ;;  %2897 = vmatpush.msrb.mxu1 %v6663_v34  ;;  %9172 = vst [vmem:[#allocation27_spill] sm:$0xff] %v6800_v21  ;;  %v6814_v11 = vand.u32 4294901760, %v2415_v42  ;;  %v6819_v12 = vsub.f32 %v2417_v30, %v6786_v53  ;;  %v2642_v2 = vand.u32 4294901760, %v2641_v14  ;;  %v2653_v62 = vsub.f32 %v6762_v17, %v2652_v52 }
 0x308   :  { %2448 = vmatpush.msrb.mxu2 %v6678_v5  ;;  %2613 = vmatpush.msrb.mxu3 %v2612_v15  ;;  %v2664_v15 = vand.u32 4294901760, %v6791_v22  ;;  %v6827_v31 = vand.u32 4294901760, %v6800_v21  ;;  %v6830_v35 = vand.u32 4294901760, %v6656_v7  ;;  %v2648_v58 = vand.u32 4294901760, %v2647_v50 }
 0x309   :  { %2774 = vmatpush.msrb.mxu0 %v6702_v28  ;;  %2899 = vmatpush.msrb.mxu1 %v6678_v5  ;;  %v2659_v30 = vsub.f32 %v6782_v44, %v2658_v18  ;;  %v2670_v6 = vand.u32 4294901760, %v6811_v4  ;;  %v6845_v61 = vsub.f32 %v2415_v42, %v6814_v11  ;;  %v2654_v37 = vand.u32 4294901760, %v2653_v62  ;;  %v46_v28 = vld [vmem:[%s8876_s0 + $0x38] sm:$0xff] }
 0x30a   :  { %2450 = vmatpush.msrb.mxu2 %v6690_v49  ;;  %2619 = vmatpush.msrb.mxu3 %v2618_v1  ;;  %9173 = vst [vmem:[#allocation28_spill] sm:$0xff] %v6827_v31  ;;  %v6839_v1 = vsub.f32 %v2416_v36, %v6802_v23  ;;  %v2665_v36 = vsub.f32 %v6791_v22, %v2664_v15 }
 0x30b   :  { %2777 = vmatpush.msrb.mxu0 %v6717_v51  ;;  %2901 = vmatpush.msrb.mxu1 %v6690_v49  ;;  %9174 = vst [vmem:[#allocation70_spill] sm:$0xff] %v6830_v35  ;;  %v2470_v47 = vsub.f32 %v6800_v21, %v6827_v31  ;;  %v2660_v42 = vand.u32 4294901760, %v2659_v30  ;;  %v2671_v14 = vsub.f32 %v6811_v4, %v2670_v6  ;;  %v8905_v50 = vand.u32 4294901760, %v6845_v61  ;;  %v47_v51 = vld [vmem:[%s8876_s0 + $0x40] sm:$0xff] }
 0x30c   :  { %2452 = vmatpush.msrb.mxu2 %v6708_v43  ;;  %2625 = vmatpush.msrb.mxu3 %v2624_v39  ;;  %v2676_v39 = vand.u32 4294901760, %v6819_v12  ;;  %v6878_v30 = vand.u32 4294901760, %v6723_v60 }
 0x30d   :  { %2780 = vmatpush.msrb.mxu0 %v6738_v41  ;;  %2903 = vmatpush.msrb.mxu1 %v6708_v43  ;;  %v6872_v62 = vand.u32 4294901760, %v2470_v47 }
 0x30e   :  { %2454 = vmatpush.msrb.mxu2 %v6729_v29  ;;  %2631 = vmatpush.msrb.mxu3 %v2630_v19  ;;  %v6856_v19 = vsub.f32 %v6656_v7, %v6830_v35  ;;  %v2677_v7 = vsub.f32 %v6819_v12, %v2676_v39  ;;  %9178 = vst [vmem:[#allocation15_spill] sm:$0xff] %v6878_v30 }
 0x30f   :  { %2783 = vmatpush.msrb.mxu0 %v6752_v57  ;;  %2905 = vmatpush.msrb.mxu1 %v6729_v29  ;;  %9176 = vst [vmem:[#allocation14_spill] sm:$0xff] %v6872_v62 }
 0x310   :  { %2456 = vmatpush.msrb.mxu2 %v6743_v56  ;;  %2637 = vmatpush.msrb.mxu3 %v2636_v13  ;;  %9175 = vst [vmem:[#allocation13_spill] sm:$0xff] %v6856_v19  ;;  %v2682_v13 = vand.u32 4294901760, %v6839_v1  ;;  %v2678_v47 = vand.u32 4294901760, %v2677_v7  ;;  %v42_v7 = vld [vmem:[%s8876_s0 + $0x18] sm:$0xff] }
 0x311   :  { %2786 = vmatpush.msrb.mxu0 %v6762_v17  ;;  %2907 = vmatpush.msrb.mxu1 %v6743_v56  ;;  %v49_v17 = vld [vmem:[%s8876_s0 + $0x50] sm:$0xff] }
 0x312   :  { %2458 = vmatpush.msrb.mxu2 %v6757_v9  ;;  %2643 = vmatpush.msrb.mxu3 %v2642_v2  ;;  %v2666_v2 = vand.u32 4294901760, %v2665_v36  ;;  %v2683_v36 = vsub.f32 %v6839_v1, %v2682_v13 }
 0x313   :  { %2789 = vmatpush.msrb.mxu0 %v6782_v44  ;;  %2909 = vmatpush.msrb.mxu1 %v6757_v9 }
 0x314   :  { %2460 = vmatpush.msrb.mxu2 %v6773_v32  ;;  %2649 = vmatpush.msrb.mxu3 %v2648_v58  ;;  %v6875_v58 = vand.u32 4294901760, %v6856_v19 }
 0x315   :  { %2792 = vmatpush.msrb.mxu0 %v6791_v22  ;;  %2911 = vmatpush.msrb.mxu1 %v6773_v32  ;;  %v50_v22 = vld [vmem:[%s8876_s0 + $0x58] sm:$0xff] }
 0x316   :  { %2462 = vmatpush.msrb.mxu2 %v6786_v53  ;;  %2655 = vmatpush.msrb.mxu3 %v2654_v37  ;;  %9177 = vst [vmem:[#allocation29_spill] sm:$0xff] %v6875_v58  ;;  %v2672_v37 = vand.u32 4294901760, %v2671_v14  ;;  %v6896_v14 = vsub.f32 %v6723_v60, %v6878_v30 }
 0x317   :  { %2795 = vmatpush.msrb.mxu0 %v6811_v4  ;;  %2913 = vmatpush.msrb.mxu1 %v6786_v53 }
 0x318   :  { %2464 = vmatpush.msrb.mxu2 %v6802_v23  ;;  %2661 = vmatpush.msrb.mxu3 %v2660_v42  ;;  %v2689_v42 = vsub.f32 %v6845_v61, %v8905_v50  ;;  %9179 = vst [vmem:[#allocation16_spill] sm:$0xff] %v6896_v14  ;;  %v6911_v8 = vand.u32 4294901760, %v6896_v14 }
 0x319   :  { %2798 = vmatpush.msrb.mxu0 %v6819_v12  ;;  %2915 = vmatpush.msrb.mxu1 %v6802_v23  ;;  %v51_v12 = vld [vmem:[%s8876_s0 + $0x60] sm:$0xff] }
 0x31a   :  { %2466 = vmatpush.msrb.mxu2 %v6814_v11  ;;  %2667 = vmatpush.msrb.mxu3 %v2666_v2  ;;  %v2478_v2 = vsub.f32 %v6856_v19, %v6875_v58  ;;  %v2690_v60 = vand.u32 4294901760, %v2689_v42  ;;  %9181 = vst [vmem:[#allocation26_spill] sm:$0xff] %v6911_v8  ;;  %v2486_v24 = vsub.f32 %v6896_v14, %v6911_v8 }
 0x31b   :  { %2801 = vmatpush.msrb.mxu0 %v6839_v1  ;;  %2917 = vmatpush.msrb.mxu1 %v6814_v11 }
 0x31c   :  { %2472 = vmatmul.f32.vlgmr.msrb.gmra.mxu2 %v6872_v62  ;;  %2673 = vmatpush.msrb.mxu3 %v2672_v37  ;;  %v2684_v37 = vand.u32 4294901760, %v2683_v36  ;;  %v6908_v50 = vand.u32 4294901760, %v2478_v2  ;;  %v43_v36 = vld [vmem:[%s8876_s0 + $0x20] sm:$0xff] }
 0x31d   :  { %3018 = vmatpush.msra.mxu2 %v2598_v55  ;;  %2804 = vmatpush.msrb.mxu0 %v6845_v61  ;;  %v6913_v55 = vand.u32 4294901760, %v42_v7 }
 0x31e   :  { %2679 = vmatpush.msrb.mxu3 %v2678_v47  ;;  %2807 = vmatmul.f32.vlgmr.msrb.gmra.mxu0 %v6800_v21  ;;  %9180 = vst [vmem:[#allocation25_spill] sm:$0xff] %v6908_v50 }
 0x31f   :  { %3022 = vmatpush.msra.mxu2 %v2604_v40  ;;  %2921 = vmatmul.f32.vlgmr.msrb.gmra.mxu1 %v6827_v31  ;;  %9182 = vst [vmem:[#allocation66_spill] sm:$0xff] %v6913_v55  ;;  %v6928_v40 = vsub.f32 %v42_v7, %v6913_v55 }
 0x320   :  { %2685 = vmatpush.msrb.mxu3 %v2684_v37  ;;  %61 = vadd.xlane.f32.xlu1 %v42_v7  ;;  %v7115_v37 = vand.u32 4294901760, %v50_v22 }
 0x321   :  { %3026 = vmatpush.msra.mxu2 %v2610_v45  ;;  %63 = vadd.xlane.f32.xlu2 %v43_v36  ;;  %9183 = vst [vmem:[#allocation39_spill] sm:$0xff] %v6928_v40  ;;  %v6944_v27 = vand.u32 4294901760, %v6928_v40  ;;  %v6946_v45 = vand.u32 4294901760, %v43_v36 }
 0x322   :  { %2691 = vmatpush.msrb.mxu3 %v2690_v60  ;;  %9215 = vst [vmem:[#allocation55_spill] sm:$0xff] %v7115_v37  ;;  %v53_v60 = vld [vmem:[%s8876_s0 + $0x70] sm:$0xff] }
 0x323   :  { %3030 = vmatpush.msra.mxu2 %v2616_v26  ;;  %2693 = vmatmul.f32.vlgmr.msrb.gmra.mxu3 %v6770_v25  ;;  %9185 = vst [vmem:[#allocation76_spill] sm:$0xff] %v6944_v27  ;;  %v6962_v63 = vsub.f32 %v43_v36, %v6946_v45 }
 0x324   :  { %2480 = vmatmul.f32.gmra.mxu2 %v6908_v50  ;;  %3145 = vmatpush.msra.mxu3 %v6648_v38  ;;  %v6941_v38 = vand.u32 4294901760, %v2486_v24  ;;  %9186 = vst [vmem:[#allocation31_spill] sm:$0xff] %v6946_v45  ;;  %v7125_v24 = vsub.f32 %v50_v22, %v7115_v37 }
 0x325   :  { %3034 = vmatpush.msra.mxu2 %v2622_v20  ;;  %9187 = vst [vmem:[#allocation23_spill] sm:$0xff] %v6962_v63  ;;  %v7011_v20 = vand.u32 4294901760, %v45_v46 }
 0x326   :  { %3147 = vmatpush.msra.mxu3 %v6620_v48  ;;  %2812 = vmatmul.f32.gmra.mxu0 %v6856_v19  ;;  %9184 = vst [vmem:[#allocation40_spill] sm:$0xff] %v6941_v38  ;;  %v44_v48 = vld [vmem:[%s8876_s0 + $0x28] sm:$0xff] }
 0x327   :  { %3038 = vmatpush.msra.mxu2 %v2628_v3  ;;  %2927 = vmatmul.f32.gmra.mxu1 %v6875_v58  ;;  %v6980_v26 = vand.u32 4294901760, %v44_v48  ;;  %9194 = vst [vmem:[#allocation32_spill] sm:$0xff] %v7011_v20  ;;  %v7024_v3 = vsub.f32 %v45_v46, %v7011_v20 }
 0x328   :  { %3149 = vmatpush.msra.mxu3 %v6628_v0  ;;  %v2494_v0 = vsub.f32 %v6928_v40, %v6944_v27  ;;  %69 = vadd.xlane.f32.xlu1 %v46_v28  ;;  %9216 = vst [vmem:[#allocation68_spill] sm:$0xff] %v7125_v24 }
 0x329   :  { %3042 = vmatpush.msra.mxu2 %v2634_v33  ;;  %65 = vadd.xlane.f32.xlu2 %v44_v48  ;;  %9190 = vst [vmem:[#allocation73_spill] sm:$0xff] %v6980_v26  ;;  %v7036_v33 = vand.u32 4294901760, %v7024_v3 }
 0x32a   :  { %3151 = vmatpush.msra.mxu3 %v6635_v54  ;;  %v6975_v54 = vand.u32 4294901760, %v2494_v0  ;;  %9196 = vst [vmem:[#allocation21_spill] sm:$0xff] %v7024_v3  ;;  %v7134_v0 = vand.u32 4294901760, %v51_v12 }
 0x32b   :  { %3046 = vmatpush.msra.mxu2 %v2640_v59  ;;  %2697 = vmatmul.f32.gmra.mxu3 %v6830_v35  ;;  %9198 = vst [vmem:[#allocation56_spill] sm:$0xff] %v7036_v33  ;;  %v2518_v59 = vsub.f32 %v7024_v3, %v7036_v33 }
 0x32c   :  { %2488 = vmatmul.f32.gmra.mxu2 %v6941_v38  ;;  %3153 = vmatpush.msra.mxu3 %v6646_v16  ;;  %9188 = vst [vmem:[#allocation24_spill] sm:$0xff] %v6975_v54  ;;  %v6978_v16 = vand.u32 4294901760, %v6962_v63 }
 0x32d   :  { %3050 = vmatpush.msra.mxu2 %v2646_v10  ;;  %v7053_v44 = vand.u32 4294901760, %v2518_v59  ;;  %9219 = vst [vmem:[#allocation49_spill] sm:$0xff] %v7134_v0 }
 0x32e   :  { %3155 = vmatpush.msra.mxu3 %v6663_v34  ;;  %2817 = vmatmul.f32.gmra.mxu0 %v6896_v14  ;;  %9189 = vst [vmem:[#allocation62_spill] sm:$0xff] %v6978_v16  ;;  %v2502_v34 = vsub.f32 %v6962_v63, %v6978_v16 }
 0x32f   :  { %3054 = vmatpush.msra.mxu2 %v2652_v52  ;;  %2933 = vmatmul.f32.gmra.mxu1 %v6911_v8  ;;  %9201 = vst [vmem:[#allocation19_spill] sm:$0xff] %v7053_v44 }
 0x330   :  { %3157 = vmatpush.msra.mxu3 %v6678_v5  ;;  %v6993_v5 = vsub.f32 %v44_v48, %v6980_v26  ;;  %75 = vadd.xlane.f32.xlu1 %v49_v17  ;;  %v7132_v48 = vand.u32 4294901760, %v7125_v24 }
 0x331   :  { %3058 = vmatpush.msra.mxu2 %v2658_v18  ;;  %71 = vadd.xlane.f32.xlu2 %v47_v51 }
 0x332   :  { %3159 = vmatpush.msra.mxu3 %v6690_v49  ;;  %9191 = vst [vmem:[#allocation79_spill] sm:$0xff] %v6993_v5  ;;  %v7006_v49 = vand.u32 4294901760, %v2502_v34  ;;  %v2558_v34 = vsub.f32 %v7125_v24, %v7132_v48 }
 0x333   :  { %3062 = vmatpush.msra.mxu2 %v2664_v15  ;;  %2701 = vmatmul.f32.gmra.mxu3 %v6878_v30  ;;  %9218 = vst [vmem:[#allocation38_spill] sm:$0xff] %v7132_v48 }
 0x334   :  { %2496 = vmatmul.f32.gmra.mxu2 %v6975_v54  ;;  %3161 = vmatpush.msra.mxu3 %v6708_v43  ;;  %9192 = vst [vmem:[#allocation17_spill] sm:$0xff] %v7006_v49  ;;  %v7009_v43 = vand.u32 4294901760, %v6993_v5 }
 0x335   :  { %3066 = vmatpush.msra.mxu2 %v2670_v6 }
 0x336   :  { %3163 = vmatpush.msra.mxu3 %v6729_v29  ;;  %2822 = vmatmul.f32.gmra.mxu0 %v6928_v40  ;;  %9193 = vst [vmem:[#allocation18_spill] sm:$0xff] %v7009_v43  ;;  %v9195_v29 = vand.u32 4294901760, %v6845_v61  ;;  %v2510_v41 = vsub.f32 %v6993_v5, %v7009_v43 }
 0x337   :  { %3070 = vmatpush.msra.mxu2 %v2676_v39  ;;  %2939 = vmatmul.f32.gmra.mxu1 %v6944_v27  ;;  %v7096_v39 = vand.u32 4294901760, %v49_v17 }
 0x338   :  { %3165 = vmatpush.msra.mxu3 %v6743_v56  ;;  %v48_v56 = vld [vmem:[%s8876_s0 + $0x48] sm:$0xff]  ;;  %v7033_v57 = vand.u32 4294901760, %v2510_v41 }
 0x339   :  { %3074 = vmatpush.msra.mxu2 %v2682_v13  ;;  %73 = vadd.xlane.f32.xlu0 %v48_v56  ;;  %9211 = vst [vmem:[#allocation71_spill] sm:$0xff] %v7096_v39  ;;  %v52_v13 = vld [vmem:[%s8876_s0 + $0x68] sm:$0xff]  ;;  %v7106_v42 = vsub.f32 %v49_v17, %v7096_v39 }
 0x33a   :  { %3167 = vmatpush.msra.mxu3 %v6757_v9  ;;  %9197 = vst [vmem:[#allocation22_spill] sm:$0xff] %v7033_v57  ;;  %v7038_v9 = vand.u32 4294901760, %v46_v28  ;;  %77 = vadd.xlane.f32.xlu2 %v50_v22 }
 0x33b   :  { %3078 = vmatpush.msra.mxu2 %v9195_v29  ;;  %2705 = vmatmul.f32.gmra.mxu3 %v6913_v55  ;;  %9212 = vst [vmem:[#allocation78_spill] sm:$0xff] %v7106_v42  ;;  %v7113_v7 = vand.u32 4294901760, %v7106_v42  ;;  %v7148_v29 = vand.u32 4294901760, %v2558_v34 }
 0x33c   :  { %2504 = vmatmul.f32.gmra.mxu2 %v7006_v49  ;;  %3169 = vmatpush.msra.mxu3 %v6773_v32  ;;  %9199 = vst [vmem:[#allocation67_spill] sm:$0xff] %v7038_v9  ;;  %v7049_v32 = vsub.f32 %v46_v28, %v7038_v9  ;;  %v54_v28 = vld [vmem:[%s8876_s0 + $0x78] sm:$0xff] }
 0x33d   :  { %81 = vadd.xlane.f32.xlu1 %v52_v13  ;;  %9214 = vst [vmem:[#allocation44_spill] sm:$0xff] %v7113_v7  ;;  %v2550_v36 = vsub.f32 %v7106_v42, %v7113_v7  ;;  %v7185_v34 = vand.u32 4294901760, %v54_v28 }
 0x33e   :  { %3171 = vmatpush.msra.mxu3 %v6786_v53  ;;  %2827 = vmatmul.f32.gmra.mxu0 %v6962_v63  ;;  %9200 = vst [vmem:[#allocation77_spill] sm:$0xff] %v7049_v32  ;;  %v7056_v10 = vand.u32 4294901760, %v7049_v32  ;;  %v7058_v53 = vand.u32 4294901760, %v47_v51 }
 0x33f   :  { %2945 = vmatmul.f32.gmra.mxu1 %v6978_v16  ;;  %v7129_v46 = vand.u32 4294901760, %v2550_v36  ;;  %9221 = vst [vmem:[#allocation72_spill] sm:$0xff] %v7148_v29 }
 0x340   :  { %3173 = vmatpush.msra.mxu3 %v6802_v23  ;;  %9202 = vst [vmem:[#allocation20_spill] sm:$0xff] %v7056_v10  ;;  %v2526_v52 = vsub.f32 %v7049_v32, %v7056_v10  ;;  %v7068_v23 = vsub.f32 %v47_v51, %v7058_v53  ;;  %v7144_v51 = vsub.f32 %v51_v12, %v7134_v0 }
 0x341   :  { %9203 = vst [vmem:[#allocation34_spill] sm:$0xff] %v7058_v53  ;;  %79 = vadd.xlane.f32.xlu0 %v51_v12  ;;  %v7169_v12 = vand.u32 4294901760, %v53_v60 }
 0x342   :  { %3175 = vmatpush.msra.mxu3 %v6814_v11  ;;  %9204 = vst [vmem:[#allocation52_spill] sm:$0xff] %v7068_v23  ;;  %v7072_v4 = vand.u32 4294901760, %v2526_v52  ;;  %v7075_v18 = vand.u32 4294901760, %v7068_v23  ;;  %v7077_v11 = vand.u32 4294901760, %v48_v56  ;;  %83 = vadd.xlane.f32.xlu2 %v53_v60  ;;  %v7151_v41 = vand.u32 4294901760, %v7144_v51 }
 0x343   :  { %2709 = vmatmul.f32.gmra.mxu3 %v6946_v45  ;;  %9217 = vst [vmem:[#allocation75_spill] sm:$0xff] %v7129_v46 }
 0x344   :  { %2512 = vmatmul.f32.gmra.mxu2 %v7033_v57  ;;  %9205 = vst [vmem:[#allocation63_spill] sm:$0xff] %v7072_v4  ;;  %v2534_v15 = vsub.f32 %v7068_v23, %v7075_v18  ;;  %v7087_v1 = vsub.f32 %v48_v56, %v7077_v11  ;;  %v7153_v56 = vand.u32 4294901760, %v52_v13  ;;  %v2566_v17 = vsub.f32 %v7144_v51, %v7151_v41 }
 0x345   :  { %9206 = vst [vmem:[#allocation74_spill] sm:$0xff] %v7075_v18 }
 0x346   :  { %2832 = vmatmul.f32.gmra.mxu0 %v6993_v5  ;;  %9207 = vst [vmem:[#allocation80_spill] sm:$0xff] %v7077_v11  ;;  %v7091_v6 = vand.u32 4294901760, %v2534_v15  ;;  %v7094_v61 = vand.u32 4294901760, %v7087_v1  ;;  %v7160_v59 = vsub.f32 %v52_v13, %v7153_v56  ;;  %v7164_v22 = vand.u32 4294901760, %v2566_v17 }
 0x347   :  { %2951 = vmatmul.f32.gmra.mxu1 %v7009_v43  ;;  %9208 = vst [vmem:[#allocation33_spill] sm:$0xff] %v7087_v1  ;;  %v7176_v13 = vsub.f32 %v53_v60, %v7169_v12  ;;  %v7192_v60 = vsub.f32 %v54_v28, %v7185_v34 }
 0x348   :  { %9209 = vst [vmem:[#allocation48_spill] sm:$0xff] %v7091_v6  ;;  %v2542_v47 = vsub.f32 %v7087_v1, %v7094_v61  ;;  %v7167_v52 = vand.u32 4294901760, %v7160_v59 }
 0x349   :  { %9210 = vst [vmem:[#allocation59_spill] sm:$0xff] %v7094_v61  ;;  %85 = vadd.xlane.f32.xlu0 %v54_v28  ;;  %v7183_v36 = vand.u32 4294901760, %v7176_v13 }
 0x34a   :  { %v7110_v2 = vand.u32 4294901760, %v2542_v47  ;;  %9220 = vst [vmem:[#allocation64_spill] sm:$0xff] %v7144_v51  ;;  %v2574_v15 = vsub.f32 %v7160_v59, %v7167_v52 }
 0x34b   :  { %2713 = vmatmul.f32.gmra.mxu3 %v6980_v26  ;;  %9222 = vst [vmem:[#allocation36_spill] sm:$0xff] %v7151_v41  ;;  %v2582_v17 = vsub.f32 %v7176_v13, %v7183_v36 }
 0x34c   :  { %2520 = vmatmul.f32.gmra.mxu2 %v7053_v44  ;;  %9213 = vst [vmem:[#allocation35_spill] sm:$0xff] %v7110_v2  ;;  %v7180_v47 = vand.u32 4294901760, %v2574_v15 }
 0x34d   :  { %9223 = vst [vmem:[#allocation45_spill] sm:$0xff] %v7153_v56  ;;  %v7196_v15 = vand.u32 4294901760, %v2582_v17  ;;  %v7218_v17 = vld [vmem:[%s8884_s8] ss:$0 sm:$0xff] }
 0x34e   :  { %2837 = vmatmul.f32.gmra.mxu0 %v7024_v3  ;;  %9224 = vst [vmem:[#allocation60_spill] sm:$0xff] %v7160_v59 }
 0x34f   :  { %2957 = vmatmul.f32.gmra.mxu1 %v7036_v33  ;;  %9225 = vst [vmem:[#allocation69_spill] sm:$0xff] %v7164_v22 }
 0x350   :  { %9226 = vst [vmem:[#allocation41_spill] sm:$0xff] %v7167_v52 }
 0x351   :  { %9227 = vst [vmem:[#allocation57_spill] sm:$0xff] %v7169_v12 }
 0x352   :  { %9228 = vst [vmem:[#allocation65_spill] sm:$0xff] %v7176_v13 }
 0x353   :  { %2717 = vmatmul.f32.gmra.mxu3 %v7011_v20  ;;  %9229 = vst [vmem:[#allocation37_spill] sm:$0xff] %v7180_v47 }
 0x354   :  { %2528 = vmatmul.f32.gmra.mxu2 %v7072_v4  ;;  %9230 = vst [vmem:[#allocation53_spill] sm:$0xff] %v7183_v36 }
 0x355   :  { %9231 = vst [vmem:[#allocation61_spill] sm:$0xff] %v7185_v34 }
 0x356   :  { %2842 = vmatmul.f32.gmra.mxu0 %v7049_v32  ;;  %9232 = vst [vmem:[#allocation12_spill] sm:$0xff] %v7192_v60 }
 0x357   :  { %2963 = vmatmul.f32.gmra.mxu1 %v7056_v10  ;;  %9233 = vst [vmem:[#allocation50_spill] sm:$0xff] %v7196_v15 }
 0x35b   :  { %2721 = vmatmul.f32.gmra.mxu3 %v7038_v9 }
 0x35c   :  { %2536 = vmatmul.f32.gmra.mxu2 %v7091_v6  ;;  %v3275_v6 = vld [vmem:[%s8885_s9 + $0x10] sm:$0xff] }
 0x35e   :  { %2847 = vmatmul.f32.gmra.mxu0 %v7068_v23 }
 0x35f   :  { %2969 = vmatmul.f32.gmra.mxu1 %v7075_v18 }
 0x363   :  { %2725 = vmatmul.f32.gmra.mxu3 %v7058_v53 }
 0x364   :  { %2544 = vmatmul.f32.gmra.mxu2 %v7110_v2 }
 0x366   :  { %2852 = vmatmul.f32.gmra.mxu0 %v7087_v1 }
 0x367   :  { %2975 = vmatmul.f32.gmra.mxu1 %v7094_v61  ;;  %v60_v63 = vpop.xlane.xlu1 %59 }
 0x36b   :  { %2729 = vmatmul.f32.gmra.mxu3 %v7077_v11 }
 0x36c   :  { %2552 = vmatmul.f32.gmra.mxu2 %v7129_v46 }
 0x36e   :  { %2857 = vmatmul.f32.gmra.mxu0 %v7106_v42 }
 0x36f   :  { %2981 = vmatmul.f32.gmra.mxu1 %v7113_v7 }
 0x373   :  { %2733 = vmatmul.f32.gmra.mxu3 %v7096_v39 }
 0x374   :  { %2560 = vmatmul.f32.gmra.mxu2 %v7148_v29 }
 0x376   :  { %2862 = vmatmul.f32.gmra.mxu0 %v7125_v24 }
 0x377   :  { %2987 = vmatmul.f32.gmra.mxu1 %v7132_v48 }
 0x37b   :  { %2737 = vmatmul.f32.gmra.mxu3 %v7115_v37 }
 0x37c   :  { %2568 = vmatmul.f32.gmra.mxu2 %v7164_v22 }
 0x37e   :  { %2867 = vmatmul.f32.gmra.mxu0 %v7144_v51 }
 0x37f   :  { %2993 = vmatmul.f32.gmra.mxu1 %v7151_v41  ;;  %v7199_v41 = vand.u32 4294901760, %v7192_v60 }
 0x381   :  { %9234 = vst [vmem:[#allocation58_spill] sm:$0xff] %v7199_v41 }
 0x383   :  { %2741 = vmatmul.f32.gmra.mxu3 %v7134_v0 }
 0x384   :  { %2576 = vmatmul.f32.gmra.mxu2 %v7180_v47  ;;  %v2590_v47 = vsub.f32 %v7192_v60, %v7199_v41 }
 0x386   :  { %2872 = vmatmul.f32.gmra.mxu0 %v7160_v59  ;;  %v7207_v28 = vand.u32 4294901760, %v2590_v47 }
 0x387   :  { %2999 = vmatmul.f32.gmra.mxu1 %v7167_v52 }
 0x388   :  { %9235 = vst [vmem:[#allocation11_spill] sm:$0xff] %v7207_v28 }
 0x38b   :  { %2745 = vmatmul.f32.gmra.mxu3 %v7153_v56 }
 0x38c   :  { %2584 = vmatmul.f32.gmra.mxu2 %v7196_v15 }
 0x38e   :  { %2877 = vmatmul.f32.gmra.mxu0 %v7176_v13 }
 0x38f   :  { %3005 = vmatmul.f32.gmra.mxu1 %v7183_v36 }
 0x393   :  { %2749 = vmatmul.f32.gmra.mxu3 %v7169_v12 }
 0x394   :  { %2592 = vmatmul.f32.gmra.mxu2 %v7207_v28 }
 0x396   :  { %2882 = vmatmul.f32.gmra.mxu0 %v7192_v60 }
 0x397   :  { %3011 = vmatmul.f32.gmra.mxu1 %v7199_v41 }
 0x39b   :  { %2753 = vmatmul.f32.gmra.mxu3 %v7185_v34 }
 0x39c   :  { %3080 = vmatmul.f32.vlgmr.msra.gmra.mxu2 %v6770_v25  ;;  %v7296_v18 = vpop.f32.mrf.mxu1 }
 0x39f   :  { %v2473_v36 = vpop.f32.mrf.mxu2 }
 0x3a0   :  { %v2474_v47 = vadd.f32 %v7218_v17, %v2473_v36 }
 0x3a3   :  { %3177 = vmatmul.f32.vlgmr.msra.gmra.mxu3 %v6770_v25 }
 0x3a4   :  { %3084 = vmatmul.f32.gmra.mxu2 %v6830_v35 }
 0x3a6   :  { %v2694_v28 = vpop.f32.mrf.mxu3 }
 0x3a7   :  { %v2481_v60 = vpop.f32.mrf.mxu2  ;;  %v7223_v13 = vadd.f32 %v2694_v28, %v2474_v47 }
 0x3a8   :  { %v2482_v41 = vadd.f32 %v7218_v17, %v2481_v60 }
 0x3ab   :  { %3181 = vmatmul.f32.gmra.mxu3 %v6830_v35 }
 0x3ac   :  { %3088 = vmatmul.f32.gmra.mxu2 %v6878_v30 }
 0x3ae   :  { %v2698_v15 = vpop.f32.mrf.mxu3 }
 0x3af   :  { %v2489_v52 = vpop.f32.mrf.mxu2  ;;  %v7228_v59 = vadd.f32 %v2698_v15, %v2482_v41 }
 0x3b0   :  { %v2490_v36 = vadd.f32 %v7218_v17, %v2489_v52 }
 0x3b3   :  { %3185 = vmatmul.f32.gmra.mxu3 %v6878_v30 }
 0x3b4   :  { %3092 = vmatmul.f32.gmra.mxu2 %v6913_v55 }
 0x3b6   :  { %v2702_v51 = vpop.f32.mrf.mxu3 }
 0x3b7   :  { %v2497_v22 = vpop.f32.mrf.mxu2  ;;  %v7233_v28 = vadd.f32 %v2702_v51, %v2490_v36 }
 0x3b8   :  { %v2498_v60 = vadd.f32 %v7218_v17, %v2497_v22 }
 0x3bb   :  { %3189 = vmatmul.f32.gmra.mxu3 %v6913_v55 }
 0x3bc   :  { %3096 = vmatmul.f32.gmra.mxu2 %v6946_v45 }
 0x3be   :  { %v2706_v47 = vpop.f32.mrf.mxu3 }
 0x3bf   :  { %v2505_v48 = vpop.f32.mrf.mxu2  ;;  %v7238_v41 = vadd.f32 %v2706_v47, %v2498_v60 }
 0x3c0   :  { %v2506_v52 = vadd.f32 %v7218_v17, %v2505_v48 }
 0x3c3   :  { %3193 = vmatmul.f32.gmra.mxu3 %v6946_v45 }
 0x3c4   :  { %3100 = vmatmul.f32.gmra.mxu2 %v6980_v26 }
 0x3c6   :  { %v2710_v15 = vpop.f32.mrf.mxu3 }
 0x3c7   :  { %v2513_v24 = vpop.f32.mrf.mxu2  ;;  %v7243_v51 = vadd.f32 %v2710_v15, %v2506_v52 }
 0x3c8   :  { %v2514_v22 = vadd.f32 %v7218_v17, %v2513_v24 }
 0x3cb   :  { %3197 = vmatmul.f32.gmra.mxu3 %v6980_v26 }
 0x3cc   :  { %3104 = vmatmul.f32.gmra.mxu2 %v7011_v20 }
 0x3ce   :  { %v2714_v36 = vpop.f32.mrf.mxu3 }
 0x3cf   :  { %v2521_v29 = vpop.f32.mrf.mxu2  ;;  %v7248_v60 = vadd.f32 %v2714_v36, %v2514_v22 }
 0x3d0   :  { %v2522_v48 = vadd.f32 %v7218_v17, %v2521_v29 }
 0x3d3   :  { %3201 = vmatmul.f32.gmra.mxu3 %v7011_v20 }
 0x3d4   :  { %3108 = vmatmul.f32.gmra.mxu2 %v7038_v9 }
 0x3d6   :  { %v2718_v47 = vpop.f32.mrf.mxu3 }
 0x3d7   :  { %v2529_v7 = vpop.f32.mrf.mxu2  ;;  %v7253_v52 = vadd.f32 %v2718_v47, %v2522_v48 }
 0x3d8   :  { %v2530_v24 = vadd.f32 %v7218_v17, %v2529_v7 }
 0x3db   :  { %3205 = vmatmul.f32.gmra.mxu3 %v7038_v9  ;;  %v3274_v9 = vld [vmem:[%s8885_s9 + $0x8] sm:$0xff] }
 0x3dc   :  { %3112 = vmatmul.f32.gmra.mxu2 %v7058_v53 }
 0x3de   :  { %v2722_v15 = vpop.f32.mrf.mxu3 }
 0x3df   :  { %v7258_v42 = vpop.f32.mrf.mxu2  ;;  %v7260_v22 = vadd.f32 %v2722_v15, %v2530_v24  ;;  %v3276_v15 = vld [vmem:[%s8885_s9 + $0x18] sm:$0xff] }
 0x3e0   :  { %v7283_v46 = vand.u32 4294901760, %v3276_v15 }
 0x3e2   :  { %3338 = vmatpush.msra.mxu0 %v7283_v46  ;;  %3693 = vmatpush.msrb.mxu3 %v7283_v46 }
 0x3e3   :  { %3209 = vmatmul.f32.gmra.mxu3 %v7058_v53 }
 0x3e4   :  { %3116 = vmatmul.f32.gmra.mxu2 %v7077_v11 }
 0x3e6   :  { %v7264_v29 = vpop.f32.mrf.mxu3 }
 0x3e7   :  { %v7266_v36 = vpop.f32.mrf.mxu2 }
 0x3eb   :  { %3213 = vmatmul.f32.gmra.mxu3 %v7077_v11  ;;  %v7290_v11 = vpop.f32.mrf.mxu0 }
 0x3ec   :  { %3120 = vmatmul.f32.gmra.mxu2 %v7096_v39 }
 0x3ee   :  { %v7270_v7 = vpop.f32.mrf.mxu3 }
 0x3ef   :  { %v7272_v48 = vpop.f32.mrf.mxu2 }
 0x3f3   :  { %3217 = vmatmul.f32.gmra.mxu3 %v7096_v39  ;;  %v3487_v39 = vsub.f32 %v3276_v15, %v7283_v46  ;;  %v3339_v15 = vand.u32 4294901760, %v3275_v6 }
 0x3f4   :  { %3124 = vmatmul.f32.gmra.mxu2 %v7115_v37 }
 0x3f5   :  { %v3488_v1 = vand.u32 4294901760, %v3487_v39  ;;  %3589 = vmatpush.msrb.mxu2 %v3487_v39  ;;  %v3493_v10 = vsub.f32 %v3275_v6, %v3339_v15  ;;  %3695 = vmatpush.msrb.mxu3 %v3339_v15 }
 0x3f6   :  { %v7276_v47 = vpop.f32.mrf.mxu3  ;;  %3340 = vmatpush.msra.mxu0 %v3339_v15 }
 0x3f7   :  { %v7278_v24 = vpop.f32.mrf.mxu2  ;;  %v3489_v53 = vsub.f32 %v3487_v39, %v3488_v1  ;;  %v3341_v39 = vand.u32 4294901760, %v3274_v9  ;;  %3592 = vmatpush.msrb.mxu2 %v3493_v10 }
 0x3f9   :  { %v3490_v23 = vand.u32 4294901760, %v3489_v53  ;;  %v3273_v53 = vld [vmem:[%s8885_s9] sm:$0xff]  ;;  %v3499_v20 = vsub.f32 %v3274_v9, %v3341_v39  ;;  %3697 = vmatpush.msrb.mxu3 %v3341_v39  ;;  %3342 = vmatpush.msra.mxu0 %v3341_v39  ;;  %v7318_v9 = vpop.f32.mrf.mxu1 }
 0x3fa   :  { %v3343_v6 = vand.u32 4294901760, %v3273_v53 }
 0x3fb   :  { %3221 = vmatmul.f32.gmra.mxu3 %v7115_v37  ;;  %v56_v37 = vpop.xlane.xlu0 %55  ;;  %3491 = vmatpush.msra.mxu1 %v3490_v23  ;;  %v7313_v23 = vpop.f32.mrf.mxu0  ;;  %v3500_v44 = vand.u32 4294901760, %v3499_v20 }
 0x3fc   :  { %3128 = vmatmul.f32.gmra.mxu2 %v7134_v0  ;;  %v7315_v33 = vadd.f32 1.0, %v56_v37  ;;  %v3505_v26 = vsub.f32 %v3273_v53, %v3343_v6  ;;  %3699 = vmatpush.msrb.mxu3 %v3343_v6 }
 0x3fd   :  { %3595 = vmatpush.msrb.mxu2 %v3499_v20  ;;  %3344 = vmatpush.msra.mxu0 %v3343_v6  ;;  %v3501_v5 = vsub.f32 %v3499_v20, %v3500_v44 }
 0x3fe   :  { %v7292_v61 = vpop.f32.mrf.mxu3  ;;  %5181 = vrcp.f32 %v7315_v33  ;;  %v3506_v57 = vand.u32 4294901760, %v3505_v26  ;;  %vm108_vm2 = vweird.f32 %v7315_v33  ;;  %v114_v49 = vand.u32 2147483648, %v7315_v33 }
 0x3ff   :  { %v7294_v2 = vpop.f32.mrf.mxu2  ;;  %3812 = vmatpush.msrb.mxu0 %v3488_v1  ;;  %3598 = vmatpush.msrb.mxu2 %v3505_v26 }
 0x400   :  { %v3507_v53 = vsub.f32 %v3505_v26, %v3506_v57  ;;  %v115_v40 = vor.u32 1.1754944e-38, %v114_v49 }
 0x402   :  { %v3508_v20 = vand.u32 4294901760, %v3507_v53 }
 0x403   :  { %3225 = vmatmul.f32.gmra.mxu3 %v7134_v0  ;;  %v3494_v0 = vand.u32 4294901760, %v3493_v10  ;;  %v58_v37 = vpop.xlane.xlu0 %57 }
 0x404   :  { %3132 = vmatmul.f32.gmra.mxu2 %v7153_v56  ;;  %v5182_v1 = vpop.eup %5181 }
 0x405   :  { %v3495_v3 = vsub.f32 %v3493_v10, %v3494_v0  ;;  %v3502_v10 = vand.u32 4294901760, %v3501_v5  ;;  %3816 = vmatpush.msrb.mxu0 %v3494_v0  ;;  %v104_v26 = vmul.f32 %v5182_v1, %v7315_v33  ;;  %v7335_v5 = vpop.f32.mrf.mxu1  ;;  %vm109_vm3 = vweird.f32 %v5182_v1 }
 0x406   :  { %v7306_v32 = vpop.f32.mrf.mxu3  ;;  %vm7364_vm4 = vmor %vm108_vm2, %vm109_vm3 }
 0x407   :  { %v7311_v4 = vpop.f32.mrf.mxu2  ;;  %v3496_v43 = vand.u32 4294901760, %v3495_v3  ;;  %v7326_v3 = vadd.f32 1.0, %v58_v37  ;;  %3820 = vmatpush.msrb.mxu0 %v3500_v44  ;;  %v7339_v44 = vadd.f32 1.0, %v60_v63  ;;  %v105_v37 = vsub.f32 1.0, %v104_v26 }
 0x409   :  { %3497 = vmatpush.msra.mxu1 %v3496_v43  ;;  %3824 = vmatpush.msrb.mxu0 %v3506_v57  ;;  %5183 = vrcp.f32 %v7326_v3  ;;  %v106_v53 = vmul.f32 %v5182_v1, %v105_v37  ;;  %v112_v37 = vand.u32 2147483647, %v7315_v33  ;;  %vm123_vm6 = vweird.f32 %v7326_v3 }
 0x40a   :  { %5185 = vrcp.f32 %v7339_v44  ;;  %v127_v27 = vand.u32 2147483647, %v7326_v3  ;;  %vm138_vm10 = vweird.f32 %v7339_v44 }
 0x40b   :  { %3229 = vmatmul.f32.gmra.mxu3 %v7153_v56  ;;  %3503 = vmatpush.msra.mxu1 %v3502_v10  ;;  %v7328_v56 = vpop.f32.mrf.mxu0  ;;  %v62_v10 = vpop.xlane.xlu1 %61  ;;  %v107_v55 = vadd.f32 %v5182_v1, %v106_v53  ;;  %vm113_vm5 = vcmp.eq.f32.partialorder %v112_v37, 8.507059e+37 }
 0x40c   :  { %3136 = vmatmul.f32.gmra.mxu2 %v7169_v12  ;;  %vm7405_vm9 = vcmp.eq.f32.partialorder %v127_v27, 8.507059e+37 }
 0x40d   :  { %3509 = vmatpush.msra.mxu1 %v3508_v20  ;;  %v7360_v26 = vpop.f32.mrf.mxu1  ;;  %v111_v53 = vsel %vm7364_vm4, %v5182_v1, %v107_v55  ;;  %v129_v1 = vand.u32 2147483648, %v7326_v3 }
 0x40e   :  { %v7322_v45 = vpop.f32.mrf.mxu3 }
 0x40f   :  { %v7324_v16 = vpop.f32.mrf.mxu2  ;;  %3903 = vmatpush.msrb.mxu1 %v7283_v46  ;;  %v7343_v57 = vpop.eup %5183 }
 0x410   :  { %vm124_vm7 = vweird.f32 %v7343_v57 }
 0x411   :  { %3905 = vmatpush.msrb.mxu1 %v3339_v15  ;;  %v119_v15 = vmul.f32 %v7343_v57, %v7326_v3  ;;  %vm7391_vm8 = vmor %vm123_vm6, %vm124_vm7 }
 0x413   :  { %3233 = vmatmul.f32.gmra.mxu3 %v7169_v12  ;;  %3907 = vmatpush.msrb.mxu1 %v3341_v39  ;;  %v7347_v46 = vpop.f32.mrf.mxu0  ;;  %v2809_v39 = vadd.f32 %v7290_v11, %v7223_v13  ;;  %v7355_v12 = vadd.f32 1.0, %v62_v10  ;;  %v64_v10 = vpop.xlane.xlu2 %63 }
 0x414   :  { %3140 = vmatmul.f32.gmra.mxu2 %v7185_v34  ;;  %v7381_v14 = vadd.f32 1.0, %v64_v10  ;;  %v130_v10 = vor.u32 1.1754944e-38, %v129_v1  ;;  %v142_v1 = vand.u32 2147483647, %v7339_v44 }
 0x415   :  { %3909 = vmatpush.msrb.mxu1 %v3343_v6  ;;  %v7358_v6 = vpop.eup %5185  ;;  %v2923_v11 = vadd.f32 %v7296_v18, %v2809_v39  ;;  %5187 = vrcp.f32 %v7355_v12  ;;  %v2814_v18 = vadd.f32 %v7313_v23, %v7228_v59  ;;  %v7395_v59 = vpop.f32.mrf.mxu1  ;;  %vm153_vm14 = vweird.f32 %v7355_v12 }
 0x416   :  { %v7337_v43 = vpop.f32.mrf.mxu3  ;;  %v134_v13 = vmul.f32 %v7358_v6, %v7339_v44  ;;  %5189 = vrcp.f32 %v7381_v14  ;;  %vm139_vm11 = vweird.f32 %v7358_v6  ;;  %vm7444_vm13 = vcmp.eq.f32.partialorder %v142_v1, 8.507059e+37 }
 0x417   :  { %v7341_v0 = vpop.f32.mrf.mxu2  ;;  %vm7433_vm12 = vmor %vm138_vm10, %vm139_vm11  ;;  %vm168_vm3 = vweird.f32 %v7381_v14 }
 0x418   :  { %v135_v39 = vsub.f32 1.0, %v134_v13 }
 0x41b   :  { %3237 = vmatmul.f32.gmra.mxu3 %v7185_v34  ;;  %v120_v34 = vsub.f32 1.0, %v119_v15  ;;  %v7375_v33 = vpop.f32.mrf.mxu0 }
 0x41d   :  { %v121_v15 = vmul.f32 %v7343_v57, %v120_v34  ;;  %v7383_v34 = vsel %vm113_vm5, %v115_v40, %v111_v53  ;;  %v66_v53 = vpop.xlane.xlu2 %65 }
 0x41e   :  { %v7351_v63 = vpop.f32.mrf.mxu3  ;;  %9238 = vst [vmem:[#allocation46_spill] sm:$0xff] %v7383_v34 }
 0x41f   :  { %v3081_v20 = vpop.f32.mrf.mxu2  ;;  %v122_v55 = vadd.f32 %v7343_v57, %v121_v15 }
 0x420   :  { %v3082_v54 = vadd.f32 %v3081_v20, %v2923_v11  ;;  %v7388_v20 = vpop.eup %5187 }
 0x421   :  { %v149_v23 = vmul.f32 %v7388_v20, %v7355_v12  ;;  %v126_v3 = vsel %vm7391_vm8, %v7343_v57, %v122_v55  ;;  %vm154_vm15 = vweird.f32 %v7388_v20 }
 0x422   :  { %vm7473_vm0 = vmor %vm153_vm14, %vm154_vm15 }
 0x423   :  { %v150_v11 = vsub.f32 1.0, %v149_v23 }
 0x426   :  { %v3178_v30 = vpop.f32.mrf.mxu3 }
 0x427   :  { %v3085_v8 = vpop.f32.mrf.mxu2  ;;  %v3179_v49 = vadd.f32 %v3178_v30, %v3082_v54  ;;  %v2929_v30 = vadd.f32 %v7318_v9, %v2814_v18  ;;  %v136_v54 = vmul.f32 %v7358_v6, %v135_v39  ;;  %v2819_v18 = vadd.f32 %v7328_v56, %v7233_v28 }
 0x428   :  { %v7426_v56 = vadd.f32 1.0, %v66_v53  ;;  %v7448_v53 = vpop.f32.mrf.mxu1 }
 0x429   :  { %v3241_v37 = vmul.f32 %v3179_v49, %v7383_v34  ;;  %v3086_v15 = vadd.f32 %v3085_v8, %v2929_v30  ;;  %v137_v27 = vadd.f32 %v7358_v6, %v136_v54  ;;  %v144_v8 = vand.u32 2147483648, %v7339_v44  ;;  %v7437_v54 = vpop.eup %5189 }
 0x42a   :  { %v2935_v13 = vadd.f32 %v7335_v5, %v2819_v18  ;;  %5191 = vrcp.f32 %v7426_v56  ;;  %v68_v5 = vpop.xlane.xlu0 %67  ;;  %v151_v18 = vmul.f32 %v7388_v20, %v150_v11  ;;  %vm169_vm4 = vweird.f32 %v7437_v54 }
 0x42b   :  { %v3257_v40 = vmax.f32 %v3241_v37, 0.0  ;;  %v7419_v37 = vpop.f32.mrf.mxu0  ;;  %v145_v44 = vor.u32 1.1754944e-38, %v144_v8  ;;  %v7465_v34 = vadd.f32 1.0, %v68_v5  ;;  %vm7517_vm5 = vmor %vm168_vm3, %vm169_vm4  ;;  %vm183_vm7 = vweird.f32 %v7426_v56 }
 0x42d   :  { %v3278_v9 = vsel %vm1040_vm1, %v3257_v40, 0  ;;  %v7424_v40 = vsel %vm7405_vm9, %v130_v10, %v126_v3  ;;  %5193 = vrcp.f32 %v7465_v34  ;;  %vm198_vm11 = vweird.f32 %v7465_v34 }
 0x42e   :  { %v7414_v39 = vand.u32 4294901760, %v3278_v9  ;;  %v3182_v49 = vpop.f32.mrf.mxu3  ;;  %9243 = vst [vmem:[#allocation54_spill] sm:$0xff] %v7424_v40 }
 0x42f   :  { %v3089_v57 = vpop.f32.mrf.mxu2  ;;  %v3183_v55 = vadd.f32 %v3182_v49, %v3086_v15  ;;  %v141_v15 = vsel %vm7433_vm12, %v7358_v6, %v137_v27  ;;  %v2824_v6 = vadd.f32 %v7347_v46, %v7238_v41  ;;  %v159_v41 = vand.u32 2147483648, %v7355_v12 }
 0x430   :  { %v3346_v30 = vsub.f32 %v3278_v9, %v7414_v39  ;;  %3511 = vmatmul.f32.vlgmr.msra.gmra.mxu1 %v7414_v39  ;;  %v3090_v27 = vadd.f32 %v3089_v57, %v2935_v13  ;;  %v152_v13 = vadd.f32 %v7388_v20, %v151_v18  ;;  %v7477_v9 = vpop.eup %5191 }
 0x431   :  { %v3242_v23 = vmul.f32 %v3183_v55, %v7424_v40  ;;  %v164_v55 = vmul.f32 %v7437_v54, %v7381_v14  ;;  %v2941_v5 = vadd.f32 %v7360_v26, %v2824_v6  ;;  %v160_v18 = vor.u32 1.1754944e-38, %v159_v41  ;;  %v7495_v41 = vpop.f32.mrf.mxu1 }
 0x432   :  { %v3347_v3 = vand.u32 4294901760, %v3346_v30  ;;  %3601 = vmatmul.f32.vlgmr.msrb.gmra.mxu2 %v3346_v30  ;;  %v179_v26 = vmul.f32 %v7477_v9, %v7426_v56  ;;  %vm184_vm8 = vweird.f32 %v7477_v9 }
 0x433   :  { %v3258_v10 = vmax.f32 %v3242_v23, 0.0  ;;  %v165_v46 = vsub.f32 1.0, %v164_v55  ;;  %vm7555_vm9 = vmor %vm183_vm7, %vm184_vm8 }
 0x434   :  { %v3348_v49 = vsub.f32 %v3346_v30, %v3347_v3  ;;  %3703 = vmatmul.f32.vlgmr.msrb.gmra.mxu3 %v3347_v3  ;;  %v7463_v3 = vsel %vm7444_vm13, %v145_v44, %v141_v15  ;;  %v7479_v44 = vpop.f32.mrf.mxu0 }
 0x435   :  { %v3281_v1 = vsel %vm1040_vm1, %v3258_v10, 0  ;;  %9248 = vst [vmem:[#allocation10_spill] sm:$0xff] %v7463_v3  ;;  %v157_v10 = vand.u32 2147483647, %v7355_v12  ;;  %v156_v12 = vsel %vm7473_vm0, %v7388_v20, %v152_v13 }
 0x436   :  { %v7457_v28 = vand.u32 4294901760, %v3281_v1  ;;  %v3186_v8 = vpop.f32.mrf.mxu3  ;;  %v3349_v23 = vand.u32 4294901760, %v3348_v49 }
 0x437   :  { %v3093_v30 = vpop.f32.mrf.mxu2  ;;  %v3187_v11 = vadd.f32 %v3186_v8, %v3090_v27  ;;  %vm7486_vm2 = vcmp.eq.f32.partialorder %v157_v10, 8.507059e+37 }
 0x438   :  { %3350 = vmatmul.f32.vlgmr.msra.gmra.mxu0 %v3349_v23  ;;  %3515 = vmatmul.f32.gmra.mxu1 %v7457_v28  ;;  %v3354_v57 = vsub.f32 %v3281_v1, %v7457_v28  ;;  %v70_v1 = vpop.xlane.xlu1 %69  ;;  %v3094_v6 = vadd.f32 %v3093_v30, %v2941_v5  ;;  %v7506_v30 = vsel %vm7486_vm2, %v160_v18, %v156_v12  ;;  %v172_v18 = vand.u32 2147483647, %v7381_v14 }
 0x439   :  { %v3243_v49 = vmul.f32 %v3187_v11, %v7463_v3  ;;  %v166_v11 = vmul.f32 %v7437_v54, %v165_v46  ;;  %v7499_v13 = vadd.f32 1.0, %v70_v1  ;;  %v2829_v46 = vadd.f32 %v7375_v33, %v7243_v51  ;;  %9253 = vst [vmem:[#allocation42_spill] sm:$0xff] %v7506_v30  ;;  %v7512_v1 = vpop.eup %5193 }
 0x43a   :  { %3606 = vmatmul.f32.gmra.mxu2 %v3354_v57  ;;  %v3355_v55 = vand.u32 4294901760, %v3354_v57  ;;  %vm173_vm6 = vcmp.eq.f32.partialorder %v172_v18, 8.507059e+37  ;;  %vm199_vm12 = vweird.f32 %v7512_v1 }
 0x43b   :  { %v3259_v27 = vmax.f32 %v3243_v49, 0.0  ;;  %v167_v5 = vadd.f32 %v7437_v54, %v166_v11  ;;  %5195 = vrcp.f32 %v7499_v13  ;;  %v2947_v8 = vadd.f32 %v7395_v59, %v2829_v46  ;;  %vm7590_vm13 = vmor %vm198_vm11, %vm199_vm12 }
 0x43c   :  { %3709 = vmatmul.f32.gmra.mxu3 %v3355_v55  ;;  %v3356_v23 = vsub.f32 %v3354_v57, %v3355_v55  ;;  %v2834_v46 = vadd.f32 %v7419_v37, %v7248_v60  ;;  %v189_v37 = vand.u32 2147483648, %v7426_v56  ;;  %vm213_vm15 = vweird.f32 %v7499_v13 }
 0x43d   :  { %v3284_v49 = vsel %vm1040_vm1, %v3259_v27, 0  ;;  %v174_v27 = vand.u32 2147483648, %v7381_v14 }
 0x43e   :  { %v7497_v40 = vand.u32 4294901760, %v3284_v49  ;;  %v3190_v20 = vpop.f32.mrf.mxu3  ;;  %v3357_v10 = vand.u32 4294901760, %v3356_v23  ;;  %v180_v23 = vsub.f32 1.0, %v179_v26  ;;  %v194_v26 = vmul.f32 %v7512_v1, %v7465_v34 }
 0x43f   :  { %v3097_v57 = vpop.f32.mrf.mxu2  ;;  %v3191_v15 = vadd.f32 %v3190_v20, %v3094_v6  ;;  %v7524_v6 = vpop.f32.mrf.mxu0  ;;  %v175_v20 = vor.u32 1.1754944e-38, %v174_v27 }
 0x440   :  { %3358 = vmatmul.f32.gmra.mxu0 %v3357_v10  ;;  %3519 = vmatmul.f32.gmra.mxu1 %v7497_v40  ;;  %v3362_v55 = vsub.f32 %v3284_v49, %v7497_v40  ;;  %v171_v49 = vsel %vm7517_vm5, %v7437_v54, %v167_v5  ;;  %v72_v10 = vpop.xlane.xlu2 %71  ;;  %v181_v59 = vmul.f32 %v7477_v9, %v180_v23  ;;  %v187_v23 = vand.u32 2147483647, %v7426_v56 }
 0x441   :  { %v3244_v51 = vmul.f32 %v3191_v15, %v7506_v30  ;;  %v3098_v15 = vadd.f32 %v3097_v57, %v2947_v8  ;;  %v7537_v33 = vadd.f32 1.0, %v72_v10  ;;  %v7541_v54 = vpop.eup %5195  ;;  %v7543_v57 = vpop.f32.mrf.mxu1  ;;  %v7545_v5 = vsel %vm173_vm6, %v175_v20, %v171_v49 }
 0x442   :  { %3611 = vmatmul.f32.gmra.mxu2 %v3362_v55  ;;  %v3363_v12 = vand.u32 4294901760, %v3362_v55  ;;  %9256 = vst [vmem:[#allocation51_spill] sm:$0xff] %v7545_v5  ;;  %v182_v27 = vadd.f32 %v7477_v9, %v181_v59  ;;  %vm188_vm10 = vcmp.eq.f32.partialorder %v187_v23, 8.507059e+37  ;;  %vm214_vm0 = vweird.f32 %v7541_v54 }
 0x443   :  { %v3260_v11 = vmax.f32 %v3244_v51, 0.0  ;;  %5197 = vrcp.f32 %v7537_v33  ;;  %vm7634_vm2 = vmor %vm213_vm15, %vm214_vm0  ;;  %vm228_vm4 = vweird.f32 %v7537_v33 }
 0x444   :  { %3715 = vmatmul.f32.gmra.mxu3 %v3363_v12  ;;  %v3364_v14 = vsub.f32 %v3362_v55, %v3363_v12  ;;  %v195_v55 = vsub.f32 1.0, %v194_v26  ;;  %v74_v26 = vpop.xlane.xlu0 %73 }
 0x445   :  { %v3287_v3 = vsel %vm1040_vm1, %v3260_v11, 0  ;;  %v190_v11 = vor.u32 1.1754944e-38, %v189_v37 }
 0x446   :  { %v7535_v51 = vand.u32 4294901760, %v3287_v3  ;;  %v3194_v30 = vpop.f32.mrf.mxu3  ;;  %v3365_v38 = vand.u32 4294901760, %v3364_v14  ;;  %v196_v56 = vmul.f32 %v7512_v1, %v195_v55  ;;  %v7576_v55 = vadd.f32 1.0, %v74_v26 }
 0x447   :  { %v3101_v35 = vpop.f32.mrf.mxu2  ;;  %v3195_v58 = vadd.f32 %v3194_v30, %v3098_v15  ;;  %v7570_v14 = vpop.f32.mrf.mxu0 }
 0x448   :  { %3366 = vmatmul.f32.gmra.mxu0 %v3365_v38  ;;  %3523 = vmatmul.f32.gmra.mxu1 %v7535_v51  ;;  %v3370_v60 = vsub.f32 %v3287_v3, %v7535_v51  ;;  %v2953_v38 = vadd.f32 %v7448_v53, %v2834_v46  ;;  %v209_v3 = vmul.f32 %v7541_v54, %v7499_v13  ;;  %5199 = vrcp.f32 %v7576_v55 }
 0x449   :  { %v3245_v30 = vmul.f32 %v3195_v58, %v7545_v5  ;;  %v2839_v58 = vadd.f32 %v7479_v44, %v7253_v52  ;;  %v186_v53 = vsel %vm7555_vm9, %v7477_v9, %v182_v27  ;;  %v202_v27 = vand.u32 2147483647, %v7465_v34  ;;  %v7585_v23 = vpop.eup %5197 }
 0x44a   :  { %3616 = vmatmul.f32.gmra.mxu2 %v3370_v60  ;;  %v3371_v18 = vand.u32 4294901760, %v3370_v60  ;;  %v3102_v20 = vadd.f32 %v3101_v35, %v2953_v38  ;;  %v210_v44 = vsub.f32 1.0, %v209_v3  ;;  %v7579_v37 = vsel %vm188_vm10, %v190_v11, %v186_v53  ;;  %v76_v53 = vpop.xlane.xlu1 %75 }
 0x44b   :  { %v3261_v8 = vmax.f32 %v3245_v30, 0.0  ;;  %9259 = vst [vmem:[#allocation9_spill] sm:$0xff] %v7579_v37  ;;  %v197_v30 = vadd.f32 %v7512_v1, %v196_v56  ;;  %v2959_v38 = vadd.f32 %v7495_v41, %v2839_v58  ;;  %v2538_v3 = vadd.f32 %v7218_v17, %v7258_v42 }
 0x44c   :  { %3721 = vmatmul.f32.gmra.mxu3 %v3371_v18  ;;  %v3372_v49 = vsub.f32 %v3370_v60, %v3371_v18  ;;  %v204_v60 = vand.u32 2147483648, %v7465_v34  ;;  %v211_v56 = vmul.f32 %v7541_v54, %v210_v44  ;;  %v224_v34 = vmul.f32 %v7585_v23, %v7537_v33 }
 0x44d   :  { %v3290_v10 = vsel %vm1040_vm1, %v3261_v8, 0  ;;  %v7597_v8 = vpop.f32.mrf.mxu1  ;;  %v201_v41 = vsel %vm7590_vm13, %v7512_v1, %v197_v30  ;;  %vm7606_vm14 = vcmp.eq.f32.partialorder %v202_v27, 8.507059e+37  ;;  %vm229_vm5 = vweird.f32 %v7585_v23 }
 0x44e   :  { %v7572_v15 = vand.u32 4294901760, %v3290_v10  ;;  %v3198_v59 = vpop.f32.mrf.mxu3  ;;  %v3373_v52 = vand.u32 4294901760, %v3372_v49  ;;  %v205_v49 = vor.u32 1.1754944e-38, %v204_v60  ;;  %v212_v30 = vadd.f32 %v7541_v54, %v211_v56  ;;  %vm7676_vm6 = vmor %vm228_vm4, %vm229_vm5 }
 0x44f   :  { %v3105_v46 = vpop.f32.mrf.mxu2  ;;  %v3199_v35 = vadd.f32 %v3198_v59, %v3102_v20  ;;  %v2844_v59 = vadd.f32 %v7524_v6, %v7260_v22  ;;  %v7620_v27 = vpop.f32.mrf.mxu0  ;;  %v7626_v22 = vadd.f32 1.0, %v76_v53  ;;  %vm243_vm8 = vweird.f32 %v7576_v55 }
 0x450   :  { %3374 = vmatmul.f32.gmra.mxu0 %v3373_v52  ;;  %3527 = vmatmul.f32.gmra.mxu1 %v7572_v15  ;;  %v3378_v9 = vsub.f32 %v3290_v10, %v7572_v15  ;;  %v3106_v20 = vadd.f32 %v3105_v46, %v2959_v38  ;;  %v217_v46 = vand.u32 2147483647, %v7499_v13  ;;  %v7624_v12 = vsel %vm7606_vm14, %v205_v49, %v201_v41 }
 0x451   :  { %v3246_v18 = vmul.f32 %v3199_v35, %v7579_v37  ;;  %9264 = vst [vmem:[#allocation47_spill] sm:$0xff] %v7624_v12  ;;  %v2965_v56 = vadd.f32 %v7543_v57, %v2844_v59  ;;  %v216_v42 = vsel %vm7634_vm2, %v7541_v54, %v212_v30  ;;  %5201 = vrcp.f32 %v7626_v22  ;;  %v78_v57 = vpop.xlane.xlu2 %77 }
 0x452   :  { %3621 = vmatmul.f32.gmra.mxu2 %v3378_v9  ;;  %v3379_v11 = vand.u32 4294901760, %v3378_v9  ;;  %vm7646_vm3 = vcmp.eq.f32.partialorder %v217_v46, 8.507059e+37  ;;  %v2546_v54 = vadd.f32 %v7218_v17, %v7266_v36  ;;  %v7668_v36 = vadd.f32 1.0, %v78_v57 }
 0x453   :  { %v3262_v26 = vmax.f32 %v3246_v18, 0.0  ;;  %v225_v18 = vsub.f32 1.0, %v224_v34  ;;  %vm258_vm12 = vweird.f32 %v7626_v22 }
 0x454   :  { %3727 = vmatmul.f32.gmra.mxu3 %v3379_v11  ;;  %v3380_v58 = vsub.f32 %v3378_v9, %v3379_v11  ;;  %v219_v9 = vand.u32 2147483648, %v7499_v13  ;;  %v7638_v11 = vpop.eup %5199  ;;  %5203 = vrcp.f32 %v7668_v36  ;;  %vm273_vm0 = vweird.f32 %v7668_v36 }
 0x455   :  { %v3293_v10 = vsel %vm1040_vm1, %v3262_v26, 0  ;;  %v2727_v26 = vadd.f32 %v7264_v29, %v2538_v3  ;;  %v239_v29 = vmul.f32 %v7638_v11, %v7576_v55  ;;  %vm244_vm9 = vweird.f32 %v7638_v11 }
 0x456   :  { %v7615_v52 = vand.u32 4294901760, %v3293_v10  ;;  %v3202_v44 = vpop.f32.mrf.mxu3  ;;  %v3381_v1 = vand.u32 4294901760, %v3380_v58  ;;  %v220_v58 = vor.u32 1.1754944e-38, %v219_v9  ;;  %vm7718_vm10 = vmor %vm243_vm8, %vm244_vm9 }
 0x457   :  { %v3109_v35 = vpop.f32.mrf.mxu2  ;;  %v3203_v60 = vadd.f32 %v3202_v44, %v3106_v20  ;;  %v7650_v20 = vpop.f32.mrf.mxu1  ;;  %v2849_v53 = vadd.f32 %v7570_v14, %v2727_v26  ;;  %v234_v14 = vand.u32 2147483648, %v7537_v33  ;;  %v232_v26 = vand.u32 2147483647, %v7537_v33 }
 0x458   :  { %3382 = vmatmul.f32.gmra.mxu0 %v3381_v1  ;;  %3531 = vmatmul.f32.gmra.mxu1 %v7615_v52  ;;  %v3386_v6 = vsub.f32 %v3293_v10, %v7615_v52  ;;  %v226_v10 = vmul.f32 %v7585_v23, %v225_v18  ;;  %v3110_v59 = vadd.f32 %v3109_v35, %v2965_v56  ;;  %v240_v35 = vsub.f32 1.0, %v239_v29  ;;  %v2858_v13 = vpop.f32.mrf.mxu0 }
 0x459   :  { %v3247_v49 = vmul.f32 %v3203_v60, %v7624_v12  ;;  %v7666_v9 = vsel %vm7646_vm3, %v220_v58, %v216_v42  ;;  %v2731_v42 = vadd.f32 %v7270_v7, %v2546_v54  ;;  %v2554_v29 = vadd.f32 %v7218_v17, %v7272_v48 }
 0x45a   :  { %3626 = vmatmul.f32.gmra.mxu2 %v3386_v6  ;;  %v3387_v34 = vand.u32 4294901760, %v3386_v6  ;;  %9269 = vst [vmem:[#allocation8_spill] sm:$0xff] %v7666_v9  ;;  %v227_v38 = vadd.f32 %v7585_v23, %v226_v10  ;;  %v235_v33 = vor.u32 1.1754944e-38, %v234_v14  ;;  %vm7690_vm7 = vcmp.eq.f32.partialorder %v232_v26, 8.507059e+37 }
 0x45b   :  { %v3263_v41 = vmax.f32 %v3247_v49, 0.0  ;;  %v241_v54 = vmul.f32 %v7638_v11, %v240_v35  ;;  %v2854_v14 = vadd.f32 %v7620_v27, %v2731_v42 }
 0x45c   :  { %3733 = vmatmul.f32.gmra.mxu3 %v3387_v34  ;;  %v3388_v3 = vsub.f32 %v3386_v6, %v3387_v34  ;;  %v7680_v34 = vpop.eup %5201  ;;  %v231_v10 = vsel %vm7676_vm6, %v7585_v23, %v227_v38 }
 0x45d   :  { %v3296_v44 = vsel %vm1040_vm1, %v3263_v41, 0  ;;  %v2971_v41 = vadd.f32 %v7597_v8, %v2849_v53  ;;  %v254_v48 = vmul.f32 %v7680_v34, %v7626_v22  ;;  %v242_v26 = vadd.f32 %v7638_v11, %v241_v54  ;;  %v7713_v56 = vpop.eup %5203 }
 0x45e   :  { %v7660_v1 = vand.u32 4294901760, %v3296_v44  ;;  %v3206_v60 = vpop.f32.mrf.mxu3  ;;  %v3389_v30 = vand.u32 4294901760, %v3388_v3  ;;  %v80_v3 = vpop.xlane.xlu0 %79  ;;  %v269_v54 = vmul.f32 %v7713_v56, %v7668_v36  ;;  %vm259_vm13 = vweird.f32 %v7680_v34 }
 0x45f   :  { %v3113_v46 = vpop.f32.mrf.mxu2  ;;  %v3207_v18 = vadd.f32 %v3206_v60, %v3110_v59  ;;  %v7701_v23 = vadd.f32 1.0, %v80_v3  ;;  %vm7756_vm14 = vmor %vm258_vm12, %vm259_vm13  ;;  %vm274_vm2 = vweird.f32 %v7713_v56 }
 0x460   :  { %3390 = vmatmul.f32.gmra.mxu0 %v3389_v30  ;;  %3535 = vmatmul.f32.gmra.mxu1 %v7660_v1  ;;  %v3394_v6 = vsub.f32 %v3296_v44, %v7660_v1  ;;  %v3114_v53 = vadd.f32 %v3113_v46, %v2971_v41  ;;  %v2982_v44 = vpop.f32.mrf.mxu1  ;;  %v7707_v46 = vsel %vm7690_vm7, %v235_v33, %v231_v10  ;;  %v255_v41 = vsub.f32 1.0, %v254_v48  ;;  %vm7793_vm3 = vmor %vm273_vm0, %vm274_vm2 }
 0x461   :  { %v3248_v49 = vmul.f32 %v3207_v18, %v7666_v9  ;;  %9274 = vst [vmem:[#allocation43_spill] sm:$0xff] %v7707_v46  ;;  %v2735_v33 = vadd.f32 %v7276_v47, %v2554_v29  ;;  %5205 = vrcp.f32 %v7701_v23  ;;  %v2977_v10 = vadd.f32 %v7650_v20, %v2854_v14 }
 0x462   :  { %3631 = vmatmul.f32.gmra.mxu2 %v3394_v6  ;;  %v3395_v58 = vand.u32 4294901760, %v3394_v6  ;;  %vm288_vm5 = vweird.f32 %v7701_v23 }
 0x463   :  { %v3264_v57 = vmax.f32 %v3248_v49, 0.0  ;;  %v249_v49 = vand.u32 2147483648, %v7576_v55  ;;  %v2859_v20 = vadd.f32 %v2858_v13, %v2735_v33  ;;  %v264_v13 = vand.u32 2147483648, %v7626_v22 }
 0x464   :  { %3739 = vmatmul.f32.gmra.mxu3 %v3395_v58  ;;  %v3396_v7 = vsub.f32 %v3394_v6, %v3395_v58  ;;  %v247_v58 = vand.u32 2147483647, %v7576_v55  ;;  %v246_v55 = vsel %vm7718_vm10, %v7638_v11, %v242_v26 }
 0x465   :  { %v3299_v59 = vsel %vm1040_vm1, %v3264_v57, 0  ;;  %v2562_v57 = vadd.f32 %v7218_v17, %v7278_v24  ;;  %v250_v48 = vor.u32 1.1754944e-38, %v249_v49  ;;  %v82_v17 = vpop.xlane.xlu1 %81 }
 0x466   :  { %v7699_v60 = vand.u32 4294901760, %v3299_v59  ;;  %v3210_v30 = vpop.f32.mrf.mxu3  ;;  %v3397_v18 = vand.u32 4294901760, %v3396_v7  ;;  %v2863_v7 = vpop.f32.mrf.mxu0  ;;  %vm248_vm11 = vcmp.eq.f32.partialorder %v247_v58, 8.507059e+37  ;;  %v7738_v42 = vadd.f32 1.0, %v82_v17 }
 0x467   :  { %v3117_v35 = vpop.f32.mrf.mxu2  ;;  %v3211_v6 = vadd.f32 %v3210_v30, %v3114_v53  ;;  %v256_v53 = vmul.f32 %v7680_v34, %v255_v41  ;;  %v7742_v11 = vpop.eup %5205  ;;  %v7744_v26 = vsel %vm248_vm11, %v250_v48, %v246_v55  ;;  %v262_v58 = vand.u32 2147483647, %v7626_v22 }
 0x468   :  { %3398 = vmatmul.f32.gmra.mxu0 %v3397_v18  ;;  %3539 = vmatmul.f32.gmra.mxu1 %v7699_v60  ;;  %v3402_v38 = vsub.f32 %v3299_v59, %v7699_v60  ;;  %v3118_v47 = vadd.f32 %v3117_v35, %v2977_v10  ;;  %v2739_v59 = vadd.f32 %v7292_v61, %v2562_v57  ;;  %v2988_v35 = vpop.f32.mrf.mxu1  ;;  %v7763_v10 = vld [vmem:[%s8884_s8] ss:$0 sm:$0xff]  ;;  %5207 = vrcp.f32 %v7738_v42  ;;  %v84_v48 = vpop.xlane.xlu2 %83 }
 0x469   :  { %v3249_v27 = vmul.f32 %v3211_v6, %v7707_v46  ;;  %9277 = vst [vmem:[#allocation7_spill] sm:$0xff] %v7744_v26  ;;  %v257_v41 = vadd.f32 %v7680_v34, %v256_v53  ;;  %v2983_v57 = vadd.f32 %v2982_v44, %v2859_v20  ;;  %v284_v44 = vmul.f32 %v7742_v11, %v7701_v23 }
 0x46a   :  { %3636 = vmatmul.f32.gmra.mxu2 %v3402_v38  ;;  %v3403_v3 = vand.u32 4294901760, %v3402_v38  ;;  %v2864_v55 = vadd.f32 %v2863_v7, %v2739_v59  ;;  %v265_v22 = vor.u32 1.1754944e-38, %v264_v13  ;;  %vm263_vm15 = vcmp.eq.f32.partialorder %v262_v58, 8.507059e+37 }
 0x46b   :  { %v3265_v8 = vmax.f32 %v3249_v27, 0.0  ;;  %v285_v7 = vsub.f32 1.0, %v284_v44  ;;  %vm289_vm6 = vweird.f32 %v7742_v11  ;;  %vm303_vm9 = vweird.f32 %v7738_v42 }
 0x46c   :  { %3745 = vmatmul.f32.gmra.mxu3 %v3403_v3  ;;  %v3404_v24 = vsub.f32 %v3402_v38, %v3403_v3  ;;  %v270_v38 = vsub.f32 1.0, %v269_v54  ;;  %vm7831_vm7 = vmor %vm288_vm5, %vm289_vm6 }
 0x46d   :  { %v3302_v29 = vsel %vm1040_vm1, %v3265_v8, 0  ;;  %v2570_v8 = vadd.f32 %v7763_v10, %v7294_v2  ;;  %v261_v2 = vsel %vm7756_vm14, %v7680_v34, %v257_v41 }
 0x46e   :  { %v7736_v30 = vand.u32 4294901760, %v3302_v29  ;;  %v3214_v18 = vpop.f32.mrf.mxu3  ;;  %v3405_v14 = vand.u32 4294901760, %v3404_v24  ;;  %v271_v24 = vmul.f32 %v7713_v56, %v270_v38  ;;  %v2868_v53 = vpop.f32.mrf.mxu0  ;;  %v279_v38 = vand.u32 2147483648, %v7668_v36 }
 0x46f   :  { %v3121_v6 = vpop.f32.mrf.mxu2  ;;  %v3215_v27 = vadd.f32 %v3214_v18, %v3118_v47  ;;  %v7788_v41 = vpop.eup %5207  ;;  %v2743_v3 = vadd.f32 %v7306_v32, %v2570_v8 }
 0x470   :  { %3406 = vmatmul.f32.gmra.mxu0 %v3405_v14  ;;  %3543 = vmatmul.f32.gmra.mxu1 %v7736_v30  ;;  %v3410_v61 = vsub.f32 %v3302_v29, %v7736_v30  ;;  %v3122_v47 = vadd.f32 %v3121_v6, %v2983_v57  ;;  %v7779_v6 = vadd.f32 1.0, %v84_v48  ;;  %v272_v13 = vadd.f32 %v7713_v56, %v271_v24  ;;  %v2994_v44 = vpop.f32.mrf.mxu1 }
 0x471   :  { %v3250_v49 = vmul.f32 %v3215_v27, %v7744_v26  ;;  %v280_v48 = vor.u32 1.1754944e-38, %v279_v38  ;;  %v299_v24 = vmul.f32 %v7788_v41, %v7738_v42  ;;  %vm304_vm10 = vweird.f32 %v7788_v41 }
 0x472   :  { %3641 = vmatmul.f32.gmra.mxu2 %v3410_v61  ;;  %v3411_v33 = vand.u32 4294901760, %v3410_v61  ;;  %5209 = vrcp.f32 %v7779_v6  ;;  %vm7866_vm11 = vmor %vm303_vm9, %vm304_vm10  ;;  %vm318_vm13 = vweird.f32 %v7779_v6 }
 0x473   :  { %v3266_v54 = vmax.f32 %v3250_v49, 0.0  ;;  %v277_v49 = vand.u32 2147483647, %v7668_v36  ;;  %v276_v36 = vsel %vm7793_vm3, %v7713_v56, %v272_v13 }
 0x474   :  { %3751 = vmatmul.f32.gmra.mxu3 %v3411_v33  ;;  %v3412_v17 = vsub.f32 %v3410_v61, %v3411_v33  ;;  %v7782_v61 = vsel %vm263_vm15, %v265_v22, %v261_v2  ;;  %v2989_v33 = vadd.f32 %v2988_v35, %v2864_v55  ;;  %v2869_v2 = vadd.f32 %v2868_v53, %v2743_v3 }
 0x475   :  { %v3305_v29 = vsel %vm1040_vm1, %v3266_v54, 0  ;;  %9280 = vst [vmem:[#allocation6_spill] sm:$0xff] %v7782_v61  ;;  %vm7805_vm4 = vcmp.eq.f32.partialorder %v277_v49, 8.507059e+37  ;;  %v300_v49 = vsub.f32 1.0, %v299_v24 }
 0x476   :  { %v7775_v20 = vand.u32 4294901760, %v3305_v29  ;;  %v3218_v18 = vpop.f32.mrf.mxu3  ;;  %v3413_v14 = vand.u32 4294901760, %v3412_v17  ;;  %v286_v17 = vmul.f32 %v7742_v11, %v285_v7  ;;  %v2873_v13 = vpop.f32.mrf.mxu0 }
 0x477   :  { %v3125_v59 = vpop.f32.mrf.mxu2  ;;  %v3219_v27 = vadd.f32 %v3218_v18, %v3122_v47  ;;  %v86_v47 = vpop.xlane.xlu0 %85 }
 0x478   :  { %3414 = vmatmul.f32.gmra.mxu0 %v3413_v14  ;;  %3547 = vmatmul.f32.gmra.mxu1 %v7775_v20  ;;  %v3418_v34 = vsub.f32 %v3305_v29, %v7775_v20  ;;  %v3126_v8 = vadd.f32 %v3125_v59, %v2989_v33  ;;  %v2578_v29 = vadd.f32 %v7763_v10, %v7311_v4  ;;  %v292_v59 = vand.u32 2147483647, %v7701_v23  ;;  %v7835_v33 = vpop.eup %5209  ;;  %v3000_v35 = vpop.f32.mrf.mxu1 }
 0x479   :  { %v3251_v58 = vmul.f32 %v3219_v27, %v7782_v61  ;;  %v287_v38 = vadd.f32 %v7742_v11, %v286_v17  ;;  %v7823_v4 = vadd.f32 1.0, %v86_v47  ;;  %vm319_vm14 = vweird.f32 %v7835_v33 }
 0x47a   :  { %3646 = vmatmul.f32.gmra.mxu2 %v3418_v34  ;;  %v3419_v54 = vand.u32 4294901760, %v3418_v34  ;;  %vm7842_vm8 = vcmp.eq.f32.partialorder %v292_v59, 8.507059e+37  ;;  %vm7894_vm15 = vmor %vm318_vm13, %vm319_vm14 }
 0x47b   :  { %v3267_v22 = vmax.f32 %v3251_v58, 0.0  ;;  %v7821_v58 = vsel %vm7805_vm4, %v280_v48, %v276_v36  ;;  %v291_v24 = vsel %vm7831_vm7, %v7742_v11, %v287_v38  ;;  %5211 = vrcp.f32 %v7823_v4 }
 0x47c   :  { %3757 = vmatmul.f32.gmra.mxu3 %v3419_v54  ;;  %v3420_v32 = vsub.f32 %v3418_v34, %v3419_v54  ;;  %v294_v34 = vand.u32 2147483648, %v7701_v23  ;;  %9285 = vst [vmem:[#allocation5_spill] sm:$0xff] %v7821_v58  ;;  %v2995_v54 = vadd.f32 %v2994_v44, %v2869_v2  ;;  %v301_v44 = vmul.f32 %v7788_v41, %v300_v49 }
 0x47d   :  { %v3308_v55 = vsel %vm1040_vm1, %v3267_v22, 0  ;;  %v2747_v22 = vadd.f32 %v7322_v45, %v2578_v29  ;;  %v2586_v2 = vadd.f32 %v7763_v10, %v7324_v16  ;;  %v309_v49 = vand.u32 2147483648, %v7738_v42 }
 0x47e   :  { %v7814_v18 = vand.u32 4294901760, %v3308_v55  ;;  %v3222_v56 = vpop.f32.mrf.mxu3  ;;  %v3421_v14 = vand.u32 4294901760, %v3420_v32  ;;  %v295_v36 = vor.u32 1.1754944e-38, %v294_v34  ;;  %v314_v32 = vmul.f32 %v7835_v33, %v7779_v6 }
 0x47f   :  { %v3129_v7 = vpop.f32.mrf.mxu2  ;;  %v3223_v27 = vadd.f32 %v3222_v56, %v3126_v8  ;;  %v2874_v56 = vadd.f32 %v2873_v13, %v2747_v22  ;;  %v302_v34 = vadd.f32 %v7788_v41, %v301_v44  ;;  %v307_v13 = vand.u32 2147483647, %v7738_v42 }
 0x480   :  { %3422 = vmatmul.f32.gmra.mxu0 %v3421_v14  ;;  %3551 = vmatmul.f32.gmra.mxu1 %v7814_v18  ;;  %v3426_v53 = vsub.f32 %v3308_v55, %v7814_v18  ;;  %v3130_v8 = vadd.f32 %v3129_v7, %v2995_v54  ;;  %v315_v38 = vsub.f32 1.0, %v314_v32  ;;  %v310_v23 = vor.u32 1.1754944e-38, %v309_v49 }
 0x481   :  { %v3252_v3 = vmul.f32 %v3223_v27, %v7821_v58  ;;  %v7859_v27 = vsel %vm7842_vm8, %v295_v36, %v291_v24  ;;  %v7871_v57 = vpop.eup %5211  ;;  %v3001_v22 = vadd.f32 %v3000_v35, %v2874_v56  ;;  %v306_v24 = vsel %vm7866_vm11, %v7788_v41, %v302_v34  ;;  %v3006_v35 = vpop.f32.mrf.mxu1 }
 0x482   :  { %3651 = vmatmul.f32.gmra.mxu2 %v3426_v53  ;;  %v3427_v48 = vand.u32 4294901760, %v3426_v53  ;;  %9290 = vst [vmem:[#allocation81_spill] sm:$0xff] %v7859_v27  ;;  %v316_v32 = vmul.f32 %v7835_v33, %v315_v38  ;;  %v329_v42 = vmul.f32 %v7871_v57, %v7823_v4  ;;  %vm308_vm12 = vcmp.eq.f32.partialorder %v307_v13, 8.507059e+37 }
 0x483   :  { %v3268_v17 = vmax.f32 %v3252_v3, 0.0  ;;  %v2878_v3 = vpop.f32.mrf.mxu0  ;;  %v2594_v41 = vadd.f32 %v7763_v10, %v7341_v0  ;;  %v7887_v56 = vsel %vm308_vm12, %v310_v23, %v306_v24  ;;  %v324_v38 = vand.u32 2147483648, %v7779_v6 }
 0x484   :  { %3763 = vmatmul.f32.gmra.mxu3 %v3427_v48  ;;  %v3428_v45 = vsub.f32 %v3426_v53, %v3427_v48  ;;  %v2751_v48 = vadd.f32 %v7337_v43, %v2586_v2  ;;  %9293 = vst [vmem:[#allocation82_spill] sm:$0xff] %v7887_v56  ;;  %v322_v0 = vand.u32 2147483647, %v7779_v6  ;;  %vm333_vm2 = vweird.f32 %v7823_v4 }
 0x485   :  { %v3311_v55 = vsel %vm1040_vm1, %v3268_v17, 0  ;;  %v2755_v16 = vadd.f32 %v7351_v63, %v2594_v41  ;;  %vm334_vm3 = vweird.f32 %v7871_v57  ;;  %v337_v41 = vand.u32 2147483647, %v7823_v4 }
 0x486   :  { %v7851_v47 = vand.u32 4294901760, %v3311_v55  ;;  %v3226_v11 = vpop.f32.mrf.mxu3  ;;  %v3429_v29 = vand.u32 4294901760, %v3428_v45  ;;  %vm323_vm0 = vcmp.eq.f32.partialorder %v322_v0, 8.507059e+37  ;;  %vm335_vm4 = vmor %vm333_vm2, %vm334_vm3 }
 0x487   :  { %v3133_v14 = vpop.f32.mrf.mxu2  ;;  %v3227_v7 = vadd.f32 %v3226_v11, %v3130_v8  ;;  %v2879_v11 = vadd.f32 %v2878_v3, %v2751_v48  ;;  %vm338_vm5 = vcmp.eq.f32.partialorder %v337_v41, 8.507059e+37 }
 0x488   :  { %3430 = vmatmul.f32.gmra.mxu0 %v3429_v29  ;;  %3555 = vmatmul.f32.gmra.mxu1 %v7851_v47  ;;  %v3434_v59 = vsub.f32 %v3311_v55, %v7851_v47  ;;  %v3134_v45 = vadd.f32 %v3133_v14, %v3001_v22  ;;  %v325_v22 = vor.u32 1.1754944e-38, %v324_v38 }
 0x489   :  { %v3253_v53 = vmul.f32 %v3227_v7, %v7859_v27  ;;  %v317_v7 = vadd.f32 %v7835_v33, %v316_v32 }
 0x48a   :  { %3656 = vmatmul.f32.gmra.mxu2 %v3434_v59  ;;  %v3435_v54 = vand.u32 4294901760, %v3434_v59 }
 0x48b   :  { %v3269_v17 = vmax.f32 %v3253_v53, 0.0  ;;  %v3007_v53 = vadd.f32 %v3006_v35, %v2879_v11  ;;  %v2883_v3 = vpop.f32.mrf.mxu0  ;;  %v339_v35 = vand.u32 2147483648, %v7823_v4 }
 0x48c   :  { %3769 = vmatmul.f32.gmra.mxu3 %v3435_v54  ;;  %v3436_v36 = vsub.f32 %v3434_v59, %v3435_v54  ;;  %v330_v59 = vsub.f32 1.0, %v329_v42  ;;  %v321_v54 = vsel %vm7894_vm15, %v7835_v33, %v317_v7  ;;  %v2884_v63 = vadd.f32 %v2883_v3, %v2755_v16 }
 0x48d   :  { %v3314_v44 = vsel %vm1040_vm1, %v3269_v17, 0  ;;  %v7909_v33 = vsel %vm323_vm0, %v325_v22, %v321_v54  ;;  %v340_v7 = vor.u32 1.1754944e-38, %v339_v35 }
 0x48e   :  { %v7881_v8 = vand.u32 4294901760, %v3314_v44  ;;  %v3230_v43 = vpop.f32.mrf.mxu3  ;;  %v3437_v55 = vand.u32 4294901760, %v3436_v36  ;;  %v331_v6 = vmul.f32 %v7871_v57, %v330_v59  ;;  %9296 = vst [vmem:[#allocation83_spill] sm:$0xff] %v7909_v33 }
 0x48f   :  { %v3231_v29 = vadd.f32 %v3230_v43, %v3134_v45  ;;  %v3137_v2 = vpop.f32.mrf.mxu2  ;;  %v3012_v45 = vpop.f32.mrf.mxu1 }
 0x490   :  { %3438 = vmatmul.f32.gmra.mxu0 %v3437_v55  ;;  %3559 = vmatmul.f32.gmra.mxu1 %v7881_v8  ;;  %v3442_v14 = vsub.f32 %v3314_v44, %v7881_v8  ;;  %v3138_v17 = vadd.f32 %v3137_v2, %v3007_v53  ;;  %v332_v55 = vadd.f32 %v7871_v57, %v331_v6 }
 0x491   :  { %v3254_v34 = vmul.f32 %v3231_v29, %v7887_v56  ;;  %v3013_v2 = vadd.f32 %v3012_v45, %v2884_v63 }
 0x492   :  { %3661 = vmatmul.f32.gmra.mxu2 %v3442_v14  ;;  %v3443_v10 = vand.u32 4294901760, %v3442_v14  ;;  %v336_v49 = vsel %vm335_vm4, %v7871_v57, %v332_v55 }
 0x493   :  { %v3270_v13 = vmax.f32 %v3254_v34, 0.0  ;;  %v7921_v16 = vsel %vm338_vm5, %v340_v7, %v336_v49 }
 0x494   :  { %3775 = vmatmul.f32.gmra.mxu3 %v3443_v10  ;;  %v3444_v48 = vsub.f32 %v3442_v14, %v3443_v10  ;;  %9297 = vst [vmem:[#allocation84_spill] sm:$0xff] %v7921_v16 }
 0x495   :  { %v3317_v24 = vsel %vm1040_vm1, %v3270_v13, 0 }
 0x496   :  { %v7905_v23 = vand.u32 4294901760, %v3317_v24  ;;  %v3234_v36 = vpop.f32.mrf.mxu3  ;;  %v3445_v32 = vand.u32 4294901760, %v3444_v48 }
 0x497   :  { %v3235_v42 = vadd.f32 %v3234_v36, %v3138_v17  ;;  %v3141_v11 = vpop.f32.mrf.mxu2 }
 0x498   :  { %3446 = vmatmul.f32.gmra.mxu0 %v3445_v32  ;;  %3563 = vmatmul.f32.gmra.mxu1 %v7905_v23  ;;  %v3450_v44 = vsub.f32 %v3317_v24, %v7905_v23  ;;  %v3142_v59 = vadd.f32 %v3141_v11, %v3013_v2 }
 0x499   :  { %v3255_v43 = vmul.f32 %v3235_v42, %v7909_v33 }
 0x49a   :  { %3666 = vmatmul.f32.gmra.mxu2 %v3450_v44  ;;  %v3451_v29 = vand.u32 4294901760, %v3450_v44 }
 0x49b   :  { %v3271_v14 = vmax.f32 %v3255_v43, 0.0 }
 0x49c   :  { %3781 = vmatmul.f32.gmra.mxu3 %v3451_v29  ;;  %v3452_v38 = vsub.f32 %v3450_v44, %v3451_v29 }
 0x49d   :  { %v3320_v34 = vsel %vm1040_vm1, %v3271_v14, 0 }
 0x49e   :  { %v7919_v0 = vand.u32 4294901760, %v3320_v34  ;;  %v3238_v10 = vpop.f32.mrf.mxu3  ;;  %v3453_v53 = vand.u32 4294901760, %v3452_v38 }
 0x49f   :  { %v3239_v4 = vadd.f32 %v3238_v10, %v3142_v59 }
 0x4a0   :  { %3454 = vmatmul.f32.gmra.mxu0 %v3453_v53  ;;  %3567 = vmatmul.f32.gmra.mxu1 %v7919_v0  ;;  %v3458_v13 = vsub.f32 %v3320_v34, %v7919_v0 }
 0x4a1   :  { %v3256_v3 = vmul.f32 %v3239_v4, %v7921_v16 }
 0x4a2   :  { %3671 = vmatmul.f32.gmra.mxu2 %v3458_v13  ;;  %v3459_v54 = vand.u32 4294901760, %v3458_v13 }
 0x4a3   :  { %v3272_v22 = vmax.f32 %v3256_v3, 0.0 }
 0x4a4   :  { %3787 = vmatmul.f32.gmra.mxu3 %v3459_v54  ;;  %v3460_v57 = vsub.f32 %v3458_v13, %v3459_v54 }
 0x4a5   :  { %v3323_v48 = vsel %vm1040_vm1, %v3272_v22, 0 }
 0x4a6   :  { %v7927_v17 = vand.u32 4294901760, %v3323_v48  ;;  %v3461_v24 = vand.u32 4294901760, %v3460_v57 }
 0x4a8   :  { %3462 = vmatmul.f32.gmra.mxu0 %v3461_v24  ;;  %3571 = vmatmul.f32.gmra.mxu1 %v7927_v17  ;;  %v3466_v6 = vsub.f32 %v3323_v48, %v7927_v17 }
 0x4aa   :  { %3676 = vmatmul.f32.gmra.mxu2 %v3466_v6  ;;  %v3467_v36 = vand.u32 4294901760, %v3466_v6 }
 0x4ac   :  { %3793 = vmatmul.f32.gmra.mxu3 %v3467_v36  ;;  %v3468_v32 = vsub.f32 %v3466_v6, %v3467_v36 }
 0x4ad   :  { %v7931_v63 = vpop.f32.mrf.mxu1 }
 0x4ae   :  { %v3469_v42 = vand.u32 4294901760, %v3468_v32 }
 0x4b0   :  { %3470 = vmatmul.f32.gmra.mxu0 %v3469_v42  ;;  %3911 = vmatmul.f32.vlgmr.msrb.gmra.mxu1 %v7414_v39 }
 0x4b5   :  { %v7934_v45 = vpop.f32.mrf.mxu0  ;;  %v7936_v44 = vpop.f32.mrf.mxu1 }
 0x4b6   :  { %v8004_v10 = vpop.f32.mrf.mxu2 }
 0x4b8   :  { %3826 = vmatmul.f32.vlgmr.msrb.gmra.mxu0 %v7414_v39  ;;  %3915 = vmatmul.f32.gmra.mxu1 %v7457_v28 }
 0x4bd   :  { %v7940_v35 = vpop.f32.mrf.mxu0  ;;  %v7942_v43 = vpop.f32.mrf.mxu1 }
 0x4be   :  { %9298 = vst [vmem:[#allocation85_spill] sm:$0xff] %v7942_v43 }
 0x4c0   :  { %3830 = vmatmul.f32.gmra.mxu0 %v7457_v28  ;;  %3919 = vmatmul.f32.gmra.mxu1 %v7497_v40 }
 0x4c5   :  { %v7946_v55 = vpop.f32.mrf.mxu0  ;;  %v7948_v41 = vpop.f32.mrf.mxu1 }
 0x4c6   :  { %9299 = vst [vmem:[#allocation86_spill] sm:$0xff] %v7946_v55 }
 0x4c7   :  { %9300 = vst [vmem:[#allocation87_spill] sm:$0xff] %v7948_v41 }
 0x4c8   :  { %3834 = vmatmul.f32.gmra.mxu0 %v7497_v40  ;;  %3923 = vmatmul.f32.gmra.mxu1 %v7535_v51 }
 0x4cd   :  { %v7952_v11 = vpop.f32.mrf.mxu0  ;;  %v7954_v39 = vpop.f32.mrf.mxu1 }
 0x4d0   :  { %3838 = vmatmul.f32.gmra.mxu0 %v7535_v51  ;;  %3927 = vmatmul.f32.gmra.mxu1 %v7572_v15 }
 0x4d5   :  { %v7958_v29 = vpop.f32.mrf.mxu0  ;;  %v7960_v28 = vpop.f32.mrf.mxu1 }
 0x4d8   :  { %3842 = vmatmul.f32.gmra.mxu0 %v7572_v15  ;;  %3931 = vmatmul.f32.gmra.mxu1 %v7615_v52 }
 0x4dd   :  { %v7964_v2 = vpop.f32.mrf.mxu0  ;;  %v7966_v40 = vpop.f32.mrf.mxu1 }
 0x4e0   :  { %3846 = vmatmul.f32.gmra.mxu0 %v7615_v52  ;;  %3935 = vmatmul.f32.gmra.mxu1 %v7660_v1 }
 0x4e5   :  { %v7970_v14 = vpop.f32.mrf.mxu0  ;;  %v7972_v51 = vpop.f32.mrf.mxu1 }
 0x4e8   :  { %3850 = vmatmul.f32.gmra.mxu0 %v7660_v1  ;;  %3939 = vmatmul.f32.gmra.mxu1 %v7699_v60 }
 0x4ed   :  { %v7976_v7 = vpop.f32.mrf.mxu0  ;;  %v7978_v15 = vpop.f32.mrf.mxu1 }
 0x4f0   :  { %3854 = vmatmul.f32.gmra.mxu0 %v7699_v60  ;;  %3943 = vmatmul.f32.gmra.mxu1 %v7736_v30 }
 0x4f5   :  { %v7982_v38 = vpop.f32.mrf.mxu0  ;;  %v7984_v52 = vpop.f32.mrf.mxu1 }
 0x4f8   :  { %3858 = vmatmul.f32.gmra.mxu0 %v7736_v30  ;;  %3947 = vmatmul.f32.gmra.mxu1 %v7775_v20 }
 0x4fd   :  { %v7988_v59 = vpop.f32.mrf.mxu0  ;;  %v7990_v1 = vpop.f32.mrf.mxu1 }
 0x4fe   :  { %v3549_v41 = vadd.f32 %v7984_v52, %v7988_v59 }
 0x500   :  { %3862 = vmatmul.f32.gmra.mxu0 %v7775_v20  ;;  %3951 = vmatmul.f32.gmra.mxu1 %v7814_v18  ;;  %v8008_v20 = vpop.f32.mrf.mxu3 }
 0x501   :  { %9301 = vst [vmem:[#allocation88_spill] sm:$0xff] %v8008_v20 }
 0x505   :  { %v7994_v34 = vpop.f32.mrf.mxu0  ;;  %v7996_v60 = vpop.f32.mrf.mxu1 }
 0x508   :  { %3866 = vmatmul.f32.gmra.mxu0 %v7814_v18  ;;  %3955 = vmatmul.f32.gmra.mxu1 %v7851_v47  ;;  %v8016_v18 = vpop.f32.mrf.mxu2  ;;  %v8018_v54 = vpop.f32.mrf.mxu3 }
 0x509   :  { %9302 = vst [vmem:[#allocation89_spill] sm:$0xff] %v8018_v54 }
 0x50d   :  { %v8000_v49 = vpop.f32.mrf.mxu0  ;;  %v8002_v30 = vpop.f32.mrf.mxu1 }
 0x50e   :  { %v3557_v43 = vadd.f32 %v7996_v60, %v8000_v49 }
 0x510   :  { %3870 = vmatmul.f32.gmra.mxu0 %v7851_v47  ;;  %3959 = vmatmul.f32.gmra.mxu1 %v7881_v8  ;;  %v8022_v47 = vpop.f32.mrf.mxu2  ;;  %v8026_v48 = vpop.f32.mrf.mxu3 }
 0x511   :  { %9303 = vst [vmem:[#allocation90_spill] sm:$0xff] %v8022_v47 }
 0x512   :  { %9304 = vst [vmem:[#allocation91_spill] sm:$0xff] %v8026_v48 }
 0x515   :  { %v8010_v53 = vpop.f32.mrf.mxu0  ;;  %v8012_v4 = vpop.f32.mrf.mxu1 }
 0x518   :  { %3874 = vmatmul.f32.gmra.mxu0 %v7881_v8  ;;  %3963 = vmatmul.f32.gmra.mxu1 %v7905_v23  ;;  %v8034_v6 = vpop.f32.mrf.mxu2 }
 0x519   :  { %9306 = vst [vmem:[#allocation93_spill] sm:$0xff] %v8034_v6 }
 0x51d   :  { %v3455_v13 = vpop.f32.mrf.mxu0  ;;  %v3568_v3 = vpop.f32.mrf.mxu1 }
 0x51e   :  { %v3565_v6 = vadd.f32 %v8012_v4, %v3455_v13 }
 0x520   :  { %3878 = vmatmul.f32.gmra.mxu0 %v7905_v23  ;;  %3967 = vmatmul.f32.gmra.mxu1 %v7919_v0  ;;  %v8037_v23 = vpop.f32.mrf.mxu3  ;;  %v8043_v42 = vpop.f32.mrf.mxu2 }
 0x521   :  { %9307 = vst [vmem:[#allocation94_spill] sm:$0xff] %v8037_v23 }
 0x522   :  { %9310 = vst [vmem:[#allocation97_spill] sm:$0xff] %v8043_v42  ;;  %v3561_v42 = vadd.f32 %v8002_v30, %v8010_v53  ;;  %v3545_v30 = vadd.f32 %v7978_v15, %v7982_v38  ;;  %v3517_v15 = vadd.f32 %v7936_v44, %v7940_v35 }
 0x525   :  { %v3463_v22 = vpop.f32.mrf.mxu0  ;;  %v8024_v57 = vpop.f32.mrf.mxu1 }
 0x528   :  { %3882 = vmatmul.f32.gmra.mxu0 %v7919_v0  ;;  %3971 = vmatmul.f32.gmra.mxu1 %v7927_v17  ;;  %v8045_v5 = vpop.f32.mrf.mxu3  ;;  %v8051_v12 = vpop.f32.mrf.mxu2 }
 0x529   :  { %9311 = vst [vmem:[#allocation98_spill] sm:$0xff] %v8045_v5 }
 0x52a   :  { %9314 = vst [vmem:[#allocation101_spill] sm:$0xff] %v8051_v12 }
 0x52d   :  { %v8030_v8 = vpop.f32.mrf.mxu0  ;;  %v8032_v24 = vpop.f32.mrf.mxu1 }
 0x52e   :  { %9305 = vst [vmem:[#allocation92_spill] sm:$0xff] %v8032_v24 }
 0x530   :  { %3886 = vmatmul.f32.gmra.mxu0 %v7927_v17  ;;  %v8057_v17 = vpop.f32.mrf.mxu3  ;;  %v8059_v16 = vpop.f32.mrf.mxu2 }
 0x531   :  { %9317 = vst [vmem:[#allocation104_spill] sm:$0xff] %v8057_v17 }
 0x535   :  { %v8039_v36 = vpop.f32.mrf.mxu0  ;;  %v8041_v32 = vpop.f32.mrf.mxu1 }
 0x536   :  { %9308 = vst [vmem:[#allocation95_spill] sm:$0xff] %v8039_v36 }
 0x537   :  { %9309 = vst [vmem:[#allocation96_spill] sm:$0xff] %v8041_v32 }
 0x538   :  { %v8065_v58 = vpop.f32.mrf.mxu3  ;;  %v8071_v56 = vpop.f32.mrf.mxu2 }
 0x539   :  { %9320 = vst [vmem:[#allocation107_spill] sm:$0xff] %v8065_v58 }
 0x53d   :  { %v8047_v0 = vpop.f32.mrf.mxu0  ;;  %v8049_v37 = vpop.f32.mrf.mxu1 }
 0x53e   :  { %9312 = vst [vmem:[#allocation99_spill] sm:$0xff] %v8047_v0 }
 0x53f   :  { %9313 = vst [vmem:[#allocation100_spill] sm:$0xff] %v8049_v37 }
 0x540   :  { %v8073_v19 = vpop.f32.mrf.mxu3  ;;  %v3642_v31 = vpop.f32.mrf.mxu2 }
 0x541   :  { %9323 = vst [vmem:[#allocation110_spill] sm:$0xff] %v8073_v19  ;;  %v3553_v19 = vadd.f32 %v7990_v1, %v7994_v34  ;;  %v3513_v1 = vadd.f32 %v7931_v63, %v7934_v45  ;;  %v3533_v45 = vadd.f32 %v7960_v28, %v7964_v2 }
 0x543   :  { %v8119_v63 = vadd.f32 %v8004_v10, %v3513_v1  ;;  %v9334_v10 = vld [vmem:[#allocation101_spill] sm:$0xff] }
 0x545   :  { %v8053_v9 = vpop.f32.mrf.mxu0  ;;  %v8055_v46 = vpop.f32.mrf.mxu1 }
 0x546   :  { %9315 = vst [vmem:[#allocation102_spill] sm:$0xff] %v8053_v9 }
 0x547   :  { %9316 = vst [vmem:[#allocation103_spill] sm:$0xff] %v8055_v46 }
 0x548   :  { %v8079_v21 = vpop.f32.mrf.mxu3  ;;  %v3647_v32 = vpop.f32.mrf.mxu2 }
 0x54d   :  { %v8061_v26 = vpop.f32.mrf.mxu0  ;;  %v8063_v61 = vpop.f32.mrf.mxu1 }
 0x54e   :  { %9318 = vst [vmem:[#allocation105_spill] sm:$0xff] %v8061_v26 }
 0x54f   :  { %9319 = vst [vmem:[#allocation106_spill] sm:$0xff] %v8063_v61 }
 0x550   :  { %v3758_v46 = vpop.f32.mrf.mxu3  ;;  %v3652_v0 = vpop.f32.mrf.mxu2 }
 0x555   :  { %v8067_v27 = vpop.f32.mrf.mxu0  ;;  %v8069_v33 = vpop.f32.mrf.mxu1 }
 0x556   :  { %9321 = vst [vmem:[#allocation108_spill] sm:$0xff] %v8067_v27 }
 0x557   :  { %9322 = vst [vmem:[#allocation109_spill] sm:$0xff] %v8069_v33 }
 0x558   :  { %v3764_v9 = vpop.f32.mrf.mxu3  ;;  %v3657_v26 = vpop.f32.mrf.mxu2 }
 0x559   :  { %v3658_v4 = vadd.f32 %v3657_v26, %v3557_v43  ;;  %v3541_v26 = vadd.f32 %v7972_v51, %v7976_v7 }
 0x55d   :  { %v8075_v50 = vpop.f32.mrf.mxu0  ;;  %v8077_v25 = vpop.f32.mrf.mxu1 }
 0x55e   :  { %9324 = vst [vmem:[#allocation111_spill] sm:$0xff] %v8075_v50 }
 0x55f   :  { %9325 = vst [vmem:[#allocation112_spill] sm:$0xff] %v8077_v25 }
 0x560   :  { %v3770_v48 = vpop.f32.mrf.mxu3  ;;  %v3662_v23 = vpop.f32.mrf.mxu2 }
 0x561   :  { %v3663_v12 = vadd.f32 %v3662_v23, %v3561_v42  ;;  %v3771_v43 = vadd.f32 %v3770_v48, %v3658_v4  ;;  %v9335_v48 = vld [vmem:[#allocation110_spill] sm:$0xff]  ;;  %v9340_v42 = vld [vmem:[#allocation97_spill] sm:$0xff] }
 0x565   :  { %v8081_v62 = vpop.f32.mrf.mxu0  ;;  %v8083_v24 = vpop.f32.mrf.mxu1 }
 0x566   :  { %9326 = vst [vmem:[#allocation113_spill] sm:$0xff] %v8081_v62 }
 0x567   :  { %9327 = vst [vmem:[#allocation114_spill] sm:$0xff] %v8083_v24 }
 0x568   :  { %v3776_v24 = vpop.f32.mrf.mxu3  ;;  %v3667_v47 = vpop.f32.mrf.mxu2 }
 0x569   :  { %v3668_v55 = vadd.f32 %v3667_v47, %v3565_v6 }
 0x56d   :  { %v8085_v37 = vpop.f32.mrf.mxu0  ;;  %v8087_v36 = vpop.f32.mrf.mxu1  ;;  %v9346_v1 = vld [vmem:[#allocation113_spill] sm:$0xff] }
 0x56e   :  { %9328 = vst [vmem:[#allocation115_spill] sm:$0xff] %v8085_v37 }
 0x56f   :  { %9329 = vst [vmem:[#allocation116_spill] sm:$0xff] %v8087_v36 }
 0x570   :  { %v3782_v62 = vpop.f32.mrf.mxu3  ;;  %v3672_v37 = vpop.f32.mrf.mxu2 }
 0x571   :  { %v3783_v13 = vadd.f32 %v3782_v62, %v3668_v55  ;;  %v3648_v62 = vadd.f32 %v3647_v32, %v3549_v41  ;;  %v3638_v41 = vadd.f32 %v8071_v56, %v3541_v26 }
 0x573   :  { %v3759_v51 = vadd.f32 %v3758_v46, %v3648_v62 }
 0x575   :  { %v8089_v20 = vpop.f32.mrf.mxu0  ;;  %v8091_v61 = vpop.f32.mrf.mxu1  ;;  %v9342_v4 = vld [vmem:[#allocation115_spill] sm:$0xff] }
 0x576   :  { %9330 = vst [vmem:[#allocation117_spill] sm:$0xff] %v8089_v20  ;;  %v9347_v62 = vld [vmem:[#allocation116_spill] sm:$0xff] }
 0x577   :  { %9331 = vst [vmem:[#allocation118_spill] sm:$0xff] %v8091_v61  ;;  %v3569_v61 = vadd.f32 %v3568_v3, %v3463_v22  ;;  %v3573_v22 = vadd.f32 %v8024_v57, %v8030_v8  ;;  %v3747_v8 = vadd.f32 %v9335_v48, %v3638_v41 }
 0x578   :  { %v3788_v20 = vpop.f32.mrf.mxu3 }
 0x57d   :  { %v8093_v54 = vpop.f32.mrf.mxu0  ;;  %v8095_v33 = vpop.f32.mrf.mxu1 }
 0x57e   :  { %9332 = vst [vmem:[#allocation119_spill] sm:$0xff] %v8095_v33  ;;  %v3673_v33 = vadd.f32 %v3672_v37, %v3569_v61  ;;  %v3653_v37 = vadd.f32 %v3652_v0, %v3553_v19  ;;  %v3777_v61 = vadd.f32 %v3776_v24, %v3663_v12  ;;  %v3537_v19 = vadd.f32 %v7966_v40, %v7970_v14  ;;  %v9336_v24 = vld [vmem:[#allocation117_spill] sm:$0xff]  ;;  %v9341_v0 = vld [vmem:[#allocation107_spill] sm:$0xff] }
 0x57f   :  { %v3643_v12 = vadd.f32 %v3642_v31, %v3545_v30  ;;  %v8127_v31 = vadd.f32 %v8016_v18, %v3517_v15  ;;  %v3864_v56 = vadd.f32 %v8093_v54, %v3759_v51  ;;  %v3628_v18 = vadd.f32 %v9334_v10, %v3533_v45  ;;  %v9338_v54 = vld [vmem:[#allocation86_spill] sm:$0xff] }
 0x580   :  { %v3789_v3 = vadd.f32 %v3788_v20, %v3673_v33  ;;  %v3677_v33 = vpop.f32.mrf.mxu2  ;;  %v3794_v7 = vpop.f32.mrf.mxu3  ;;  %v9348_v15 = vld [vmem:[#allocation90_spill] sm:$0xff] }
 0x581   :  { %v3678_v55 = vadd.f32 %v3677_v33, %v3573_v22  ;;  %v3753_v40 = vadd.f32 %v8079_v21, %v3643_v12  ;;  %v9349_v12 = vld [vmem:[#allocation98_spill] sm:$0xff] }
 0x582   :  { %v9351_v45 = vld [vmem:[#allocation114_spill] sm:$0xff] }
 0x583   :  { %v3795_v20 = vadd.f32 %v3794_v7, %v3678_v55 }
 0x585   :  { %v3867_v25 = vpop.f32.mrf.mxu0  ;;  %v3956_v27 = vpop.f32.mrf.mxu1 }
 0x58d   :  { %v3871_v50 = vpop.f32.mrf.mxu0  ;;  %v3960_v5 = vpop.f32.mrf.mxu1 }
 0x58e   :  { %v3872_v38 = vadd.f32 %v3871_v50, %v3771_v43  ;;  %v3529_v50 = vadd.f32 %v7954_v39, %v7958_v29  ;;  %v3860_v39 = vadd.f32 %v9336_v24, %v3753_v40 }
 0x590   :  { %v3957_v46 = vadd.f32 %v3956_v27, %v3872_v38  ;;  %v3945_v33 = vadd.f32 %v9347_v62, %v3860_v39  ;;  %v9350_v38 = vld [vmem:[#allocation111_spill] sm:$0xff]  ;;  %v9357_v39 = vld [vmem:[#allocation109_spill] sm:$0xff] }
 0x592   :  { %v8153_v30 = vand.u32 4294901760, %v3957_v46 }
 0x595   :  { %v3875_v36 = vpop.f32.mrf.mxu0  ;;  %v3964_v17 = vpop.f32.mrf.mxu1 }
 0x596   :  { %v3876_v52 = vadd.f32 %v3875_v36, %v3777_v61  ;;  %v9339_v36 = vld [vmem:[#allocation85_spill] sm:$0xff] }
 0x597   :  { %v3521_v32 = vadd.f32 %v9339_v36, %v9338_v54 }
 0x598   :  { %v3961_v44 = vadd.f32 %v3960_v5, %v3876_v52  ;;  %v9333_v5 = vld [vmem:[#allocation87_spill] sm:$0xff] }
 0x599   :  { %v3525_v14 = vadd.f32 %v9333_v5, %v7952_v11  ;;  %v3623_v11 = vadd.f32 %v9340_v42, %v3529_v50 }
 0x59a   :  { %v8142_v21 = vand.u32 4294901760, %v3961_v44 }
 0x59c   :  { %v8172_v52 = vsub.f32 %v3961_v44, %v8142_v21  ;;  %v9352_v44 = vld [vmem:[#allocation94_spill] sm:$0xff] }
 0x59d   :  { %v3879_v58 = vpop.f32.mrf.mxu0  ;;  %v3968_v60 = vpop.f32.mrf.mxu1 }
 0x59e   :  { %v3880_v53 = vadd.f32 %v3879_v58, %v3783_v13  ;;  %v3765_v58 = vadd.f32 %v3764_v9, %v3653_v37  ;;  %v3633_v9 = vadd.f32 %v8059_v16, %v3537_v19  ;;  %v9337_v16 = vld [vmem:[#allocation119_spill] sm:$0xff]  ;;  %v3856_v13 = vadd.f32 %v9342_v4, %v3747_v8  ;;  %v9344_v37 = vld [vmem:[#allocation93_spill] sm:$0xff] }
 0x59f   :  { %v3618_v61 = vadd.f32 %v9344_v37, %v3525_v14  ;;  %v3613_v19 = vadd.f32 %v9348_v15, %v3521_v32  ;;  %v4160_v10 = vand.u32 4294901760, %v8172_v52  ;;  %v9356_v8 = vld [vmem:[#allocation105_spill] sm:$0xff] }
 0x5a0   :  { %v3965_v34 = vadd.f32 %v3964_v17, %v3880_v53  ;;  %v3868_v57 = vadd.f32 %v3867_v25, %v3765_v58  ;;  %v3741_v17 = vadd.f32 %v9341_v0, %v3633_v9  ;;  %v9345_v53 = vld [vmem:[#allocation104_spill] sm:$0xff]  ;;  %v3729_v58 = vadd.f32 %v9349_v12, %v3623_v11  ;;  %v9358_v32 = vld [vmem:[#allocation89_spill] sm:$0xff]  ;;  %v9359_v11 = vld [vmem:[#allocation102_spill] sm:$0xff] }
 0x5a1   :  { %v3941_v41 = vadd.f32 %v9351_v45, %v3856_v13  ;;  %v3723_v50 = vadd.f32 %v9352_v44, %v3618_v61  ;;  %v9353_v9 = vld [vmem:[#allocation108_spill] sm:$0xff]  ;;  %v3711_v42 = vadd.f32 %v9358_v32, %v8127_v31 }
 0x5a2   :  { %v8134_v2 = vand.u32 4294901760, %v3965_v34  ;;  %v3953_v6 = vadd.f32 %v9337_v16, %v3868_v57  ;;  %v3852_v26 = vadd.f32 %v9346_v1, %v3741_v17  ;;  %v3844_v40 = vadd.f32 %v9353_v9, %v3729_v58  ;;  %v9360_v17 = vld [vmem:[#allocation106_spill] sm:$0xff]  ;;  %v9361_v61 = vld [vmem:[#allocation88_spill] sm:$0xff]  ;;  %v9364_v58 = vld [vmem:[#allocation95_spill] sm:$0xff] }
 0x5a3   :  { %v3840_v24 = vadd.f32 %v9356_v8, %v3723_v50  ;;  %v8209_v16 = vand.u32 4294901760, %v3941_v41 }
 0x5a4   :  { %v8164_v43 = vand.u32 4294901760, %v3953_v6  ;;  %v3929_v4 = vadd.f32 %v9360_v17, %v3844_v40 }
 0x5a5   :  { %v3883_v49 = vpop.f32.mrf.mxu0  ;;  %v3972_v29 = vpop.f32.mrf.mxu1 }
 0x5a6   :  { %v3884_v47 = vadd.f32 %v3883_v49, %v3789_v3  ;;  %v9343_v3 = vld [vmem:[#allocation118_spill] sm:$0xff]  ;;  %v8158_v49 = vsub.f32 %v3965_v34, %v8134_v2  ;;  %v8203_v14 = vsub.f32 %v3953_v6, %v8164_v43  ;;  %v8254_v44 = vand.u32 4294901760, %v3929_v4 }
 0x5a7   :  { %v3949_v22 = vadd.f32 %v9343_v3, %v3864_v56 }
 0x5a8   :  { %v3969_v59 = vadd.f32 %v3968_v60, %v3884_v47  ;;  %v3735_v47 = vadd.f32 %v9345_v53, %v3628_v18  ;;  %v4154_v57 = vand.u32 4294901760, %v8158_v49  ;;  %v9355_v18 = vld [vmem:[#allocation91_spill] sm:$0xff]  ;;  %v4172_v31 = vand.u32 4294901760, %v8203_v14 }
 0x5a9   :  { %v8179_v51 = vand.u32 4294901760, %v3949_v22  ;;  %v3717_v48 = vadd.f32 %v9355_v18, %v3613_v19  ;;  %v3705_v53 = vadd.f32 %v9361_v61, %v8119_v63  ;;  %v8249_v63 = vsub.f32 %v3941_v41, %v8209_v16 }
 0x5aa   :  { %v8124_v35 = vand.u32 4294901760, %v3969_v59  ;;  %v3848_v34 = vadd.f32 %v9350_v38, %v3735_v47  ;;  %v4155_v6 = vsub.f32 %v8158_v49, %v4154_v57  ;;  %v9362_v47 = vld [vmem:[#allocation99_spill] sm:$0xff]  ;;  %v4173_v41 = vsub.f32 %v8203_v14, %v4172_v31 }
 0x5ab   :  { %v8218_v54 = vsub.f32 %v3949_v22, %v8179_v51  ;;  %v3836_v0 = vadd.f32 %v9359_v11, %v3717_v48  ;;  %v4161_v22 = vsub.f32 %v8172_v52, %v4160_v10  ;;  %v3832_v1 = vadd.f32 %v9362_v47, %v3711_v42 }
 0x5ac   :  { %v8145_v27 = vsub.f32 %v3969_v59, %v8124_v35  ;;  %v3828_v38 = vadd.f32 %v9364_v58, %v3705_v53  ;;  %v4190_v8 = vand.u32 4294901760, %v8249_v63 }
 0x5ad   :  { %v3887_v28 = vpop.f32.mrf.mxu0  ;;  %v4178_v12 = vand.u32 4294901760, %v8218_v54  ;;  %v4162_v50 = vand.u32 4294901760, %v4161_v22 }
 0x5ae   :  { %v3888_v25 = vadd.f32 %v3887_v28, %v3795_v20  ;;  %v4148_v59 = vand.u32 4294901760, %v8145_v27  ;;  %v8185_v20 = vsub.f32 %v3957_v46, %v8153_v30  ;;  %v9354_v28 = vld [vmem:[#allocation112_spill] sm:$0xff]  ;;  %v4191_v17 = vsub.f32 %v8249_v63, %v4190_v8 }
 0x5af   :  { %v3937_v56 = vadd.f32 %v9354_v28, %v3852_v26  ;;  %v9363_v26 = vld [vmem:[#allocation103_spill] sm:$0xff]  ;;  %v9366_v28 = vld [vmem:[#allocation96_spill] sm:$0xff]  ;;  %v4179_v48 = vsub.f32 %v8218_v54, %v4178_v12 }
 0x5b0   :  { %v3973_v23 = vadd.f32 %v3972_v29, %v3888_v25  ;;  %v8191_v25 = vand.u32 4294901760, %v3945_v33  ;;  %v4149_v5 = vsub.f32 %v8145_v27, %v4148_v59  ;;  %v3933_v29 = vadd.f32 %v9357_v39, %v3848_v34  ;;  %v9365_v34 = vld [vmem:[#allocation100_spill] sm:$0xff] }
 0x5b1   :  { %v4166_v36 = vand.u32 4294901760, %v8185_v20  ;;  %v8225_v13 = vand.u32 4294901760, %v3937_v56  ;;  %v3925_v62 = vadd.f32 %v9363_v26, %v3840_v24  ;;  %v3921_v45 = vadd.f32 %v9365_v34, %v3836_v0  ;;  %v9367_v24 = vld [vmem:[#allocation92_spill] sm:$0xff] }
 0x5b2   :  { %v8155_v60 = vand.u32 4294901760, %v3973_v23  ;;  %v4150_v3 = vand.u32 4294901760, %v4149_v5  ;;  %v8233_v37 = vsub.f32 %v3945_v33, %v8191_v25  ;;  %v8240_v15 = vand.u32 4294901760, %v3933_v29 }
 0x5b3   :  { %v4156_v33 = vand.u32 4294901760, %v4155_v6  ;;  %v4167_v19 = vsub.f32 %v8185_v20, %v4166_v36  ;;  %v8263_v9 = vsub.f32 %v3937_v56, %v8225_v13  ;;  %v8267_v5 = vand.u32 4294901760, %v3925_v62 }
 0x5b4   :  { %v8167_v55 = vsub.f32 %v3973_v23, %v8155_v60  ;;  %3980 = vmatpush.msra.mxu2 %v8155_v60  ;;  %4431 = vmatpush.msra.mxu1 %v8155_v60  ;;  %v4184_v40 = vand.u32 4294901760, %v8233_v37  ;;  %v8276_v56 = vsub.f32 %v3933_v29, %v8240_v15  ;;  %v3913_v39 = vadd.f32 %v9367_v24, %v3828_v38 }
 0x5b5   :  { %v4168_v18 = vand.u32 4294901760, %v4167_v19  ;;  %v4174_v6 = vand.u32 4294901760, %v4173_v41  ;;  %v8289_v29 = vsub.f32 %v3929_v4, %v8254_v44  ;;  %v4196_v42 = vand.u32 4294901760, %v8263_v9 }
 0x5b6   :  { %v4142_v7 = vand.u32 4294901760, %v8167_v55  ;;  %3982 = vmatpush.msra.mxu2 %v8124_v35  ;;  %4303 = vmatpush.msra.mxu0 %v8167_v55  ;;  %v4185_v32 = vsub.f32 %v8233_v37, %v4184_v40  ;;  %v4180_v0 = vand.u32 4294901760, %v4179_v48  ;;  %v4202_v4 = vand.u32 4294901760, %v8276_v56 }
 0x5b7   :  { %4433 = vmatpush.msra.mxu1 %v8124_v35  ;;  %v8304_v22 = vand.u32 4294901760, %v3913_v39  ;;  %v4197_v53 = vsub.f32 %v8263_v9, %v4196_v42  ;;  %v4192_v26 = vand.u32 4294901760, %v4191_v17 }
 0x5b8   :  { %3984 = vmatpush.msra.mxu2 %v8134_v2  ;;  %4306 = vmatpush.msra.mxu0 %v8145_v27  ;;  %v4143_v46 = vsub.f32 %v8167_v55, %v4142_v7  ;;  %v4186_v61 = vand.u32 4294901760, %v4185_v32  ;;  %v9371_v55 = vld [vmem:[#allocation30_spill] sm:$0xff]  ;;  %v9373_v27 = vld [vmem:[#allocation13_spill] sm:$0xff] }
 0x5b9   :  { %4435 = vmatpush.msra.mxu1 %v8134_v2  ;;  %v4198_v58 = vand.u32 4294901760, %v4197_v53  ;;  %v8333_v34 = vsub.f32 %v3913_v39, %v8304_v22  ;;  %v9370_v53 = vld [vmem:[#allocation28_spill] sm:$0xff] }
 0x5ba   :  { %3986 = vmatpush.msra.mxu2 %v8142_v21  ;;  %4309 = vmatpush.msra.mxu0 %v8158_v49  ;;  %v4144_v23 = vand.u32 4294901760, %v4143_v46  ;;  %v3917_v46 = vadd.f32 %v9366_v28, %v3832_v1  ;;  %v4208_v1 = vand.u32 4294901760, %v8289_v29  ;;  %v9374_v49 = vld [vmem:[#allocation29_spill] sm:$0xff] }
 0x5bb   :  { %4437 = vmatpush.msra.mxu1 %v8142_v21  ;;  %v4232_v48 = vand.u32 4294901760, %v8333_v34 }
 0x5bc   :  { %3988 = vmatpush.msra.mxu2 %v8153_v30  ;;  %4145 = vmatpush.msra.mxu3 %v4144_v23  ;;  %v8280_v23 = vand.u32 4294901760, %v3921_v45  ;;  %v8292_v11 = vand.u32 4294901760, %v3917_v46  ;;  %v4209_v38 = vsub.f32 %v8289_v29, %v4208_v1 }
 0x5bd   :  { %4312 = vmatpush.msra.mxu0 %v8172_v52  ;;  %4439 = vmatpush.msra.mxu1 %v8153_v30  ;;  %v9381_v52 = vld [vmem:[#allocation39_spill] sm:$0xff] }
 0x5be   :  { %3990 = vmatpush.msra.mxu2 %v8164_v43  ;;  %4151 = vmatpush.msra.mxu3 %v4150_v3  ;;  %v8301_v3 = vsub.f32 %v3925_v62, %v8267_v5  ;;  %v8313_v47 = vsub.f32 %v3921_v45, %v8280_v23  ;;  %v4203_v62 = vsub.f32 %v8276_v56, %v4202_v4 }
 0x5bf   :  { %4315 = vmatpush.msra.mxu0 %v8185_v20  ;;  %4441 = vmatpush.msra.mxu1 %v8164_v43  ;;  %v9384_v20 = vld [vmem:[#allocation17_spill] sm:$0xff] }
 0x5c0   :  { %3992 = vmatpush.msra.mxu2 %v8179_v51  ;;  %4157 = vmatpush.msra.mxu3 %v4156_v33  ;;  %v8323_v33 = vsub.f32 %v3917_v46, %v8292_v11  ;;  %v4214_v19 = vand.u32 4294901760, %v8301_v3  ;;  %v4220_v45 = vand.u32 4294901760, %v8313_v47  ;;  %v4210_v46 = vand.u32 4294901760, %v4209_v38  ;;  %v9417_v38 = vld [vmem:[#allocation64_spill] sm:$0xff] }
 0x5c1   :  { %4318 = vmatpush.msra.mxu0 %v8203_v14  ;;  %4443 = vmatpush.msra.mxu1 %v8179_v51  ;;  %v9387_v14 = vld [vmem:[#allocation31_spill] sm:$0xff] }
 0x5c2   :  { %3994 = vmatpush.msra.mxu2 %v8191_v25  ;;  %4163 = vmatpush.msra.mxu3 %v4162_v50  ;;  %v4204_v50 = vand.u32 4294901760, %v4203_v62  ;;  %v4215_v41 = vsub.f32 %v8301_v3, %v4214_v19  ;;  %v4226_v28 = vand.u32 4294901760, %v8323_v33  ;;  %v9413_v62 = vld [vmem:[#allocation68_spill] sm:$0xff] }
 0x5c3   :  { %4321 = vmatpush.msra.mxu0 %v8218_v54  ;;  %4445 = vmatpush.msra.mxu1 %v8191_v25  ;;  %v9390_v54 = vld [vmem:[#allocation18_spill] sm:$0xff] }
 0x5c4   :  { %3996 = vmatpush.msra.mxu2 %v8209_v16  ;;  %4169 = vmatpush.msra.mxu3 %v4168_v18  ;;  %v4221_v18 = vsub.f32 %v8313_v47, %v4220_v45  ;;  %v4216_v24 = vand.u32 4294901760, %v4215_v41  ;;  %v4227_v39 = vsub.f32 %v8323_v33, %v4226_v28  ;;  %v9421_v41 = vld [vmem:[#allocation60_spill] sm:$0xff] }
 0x5c5   :  { %4324 = vmatpush.msra.mxu0 %v8233_v37  ;;  %4447 = vmatpush.msra.mxu1 %v8209_v16  ;;  %v9393_v37 = vld [vmem:[#allocation21_spill] sm:$0xff] }
 0x5c6   :  { %3998 = vmatpush.msra.mxu2 %v8225_v13  ;;  %4175 = vmatpush.msra.mxu3 %v4174_v6  ;;  %v9368_v6 = vld [vmem:[#allocation14_spill] sm:$0xff]  ;;  %v4222_v32 = vand.u32 4294901760, %v4221_v18  ;;  %v4228_v17 = vand.u32 4294901760, %v4227_v39  ;;  %v9427_v39 = vld [vmem:[#allocation57_spill] sm:$0xff] }
 0x5c7   :  { %4327 = vmatpush.msra.mxu0 %v8249_v63  ;;  %4449 = vmatpush.msra.mxu1 %v8225_v13  ;;  %v9396_v63 = vld [vmem:[#allocation63_spill] sm:$0xff]  ;;  %v9424_v18 = vld [vmem:[#allocation50_spill] sm:$0xff] }
 0x5c8   :  { %4000 = vmatpush.msra.mxu2 %v8240_v15  ;;  %4181 = vmatpush.msra.mxu3 %v4180_v0  ;;  %v4233_v0 = vsub.f32 %v8333_v34, %v4232_v48 }
 0x5c9   :  { %4330 = vmatpush.msra.mxu0 %v8263_v9  ;;  %4451 = vmatpush.msra.mxu1 %v8240_v15  ;;  %v9399_v9 = vld [vmem:[#allocation67_spill] sm:$0xff] }
 0x5ca   :  { %4002 = vmatpush.msra.mxu2 %v8254_v44  ;;  %4187 = vmatpush.msra.mxu3 %v4186_v61  ;;  %v9369_v61 = vld [vmem:[#allocation27_spill] sm:$0xff] }
 0x5cb   :  { %4333 = vmatpush.msra.mxu0 %v8276_v56  ;;  %4453 = vmatpush.msra.mxu1 %v8254_v44  ;;  %v9402_v56 = vld [vmem:[#allocation74_spill] sm:$0xff] }
 0x5cc   :  { %4004 = vmatpush.msra.mxu2 %v8267_v5  ;;  %4193 = vmatpush.msra.mxu3 %v4192_v26  ;;  %v4234_v26 = vand.u32 4294901760, %v4233_v0  ;;  %v9430_v0 = vld [vmem:[#allocation58_spill] sm:$0xff] }
 0x5cd   :  { %4336 = vmatpush.msra.mxu0 %v8289_v29  ;;  %4455 = vmatpush.msra.mxu1 %v8267_v5  ;;  %v9405_v29 = vld [vmem:[#allocation33_spill] sm:$0xff] }
 0x5ce   :  { %4006 = vmatpush.msra.mxu2 %v8280_v23  ;;  %4199 = vmatpush.msra.mxu3 %v4198_v58  ;;  %v9416_v58 = vld [vmem:[#allocation69_spill] sm:$0xff] }
 0x5cf   :  { %4339 = vmatpush.msra.mxu0 %v8301_v3  ;;  %4457 = vmatpush.msra.mxu1 %v8280_v23  ;;  %v9408_v3 = vld [vmem:[#allocation75_spill] sm:$0xff] }
 0x5d0   :  { %4008 = vmatpush.msra.mxu2 %v8292_v11  ;;  %4205 = vmatpush.msra.mxu3 %v4204_v50  ;;  %v9420_v50 = vld [vmem:[#allocation37_spill] sm:$0xff] }
 0x5d1   :  { %4342 = vmatpush.msra.mxu0 %v8313_v47  ;;  %4459 = vmatpush.msra.mxu1 %v8292_v11  ;;  %v9411_v47 = vld [vmem:[#allocation71_spill] sm:$0xff] }
 0x5d2   :  { %4010 = vmatpush.msra.mxu2 %v8304_v22  ;;  %4211 = vmatpush.msra.mxu3 %v4210_v46  ;;  %v9423_v46 = vld [vmem:[#allocation45_spill] sm:$0xff] }
 0x5d3   :  { %4345 = vmatpush.msra.mxu0 %v8323_v33  ;;  %4461 = vmatpush.msra.mxu1 %v8304_v22  ;;  %v9414_v33 = vld [vmem:[#allocation38_spill] sm:$0xff] }
 0x5d4   :  { %4016 = vmatmul.f32.vlgmr.msra.gmra.mxu2 %v9368_v6  ;;  %4217 = vmatpush.msra.mxu3 %v4216_v24  ;;  %v9426_v24 = vld [vmem:[#allocation53_spill] sm:$0xff]  ;;  %v9428_v6 = vld [vmem:[#allocation11_spill] sm:$0xff] }
 0x5d5   :  { %4562 = vmatpush.msrb.mxu2 %v4142_v7  ;;  %4348 = vmatpush.msra.mxu0 %v8333_v34  ;;  %v9372_v7 = vld [vmem:[#allocation25_spill] sm:$0xff]  ;;  %v9418_v34 = vld [vmem:[#allocation36_spill] sm:$0xff] }
 0x5d6   :  { %4223 = vmatpush.msra.mxu3 %v4222_v32  ;;  %4351 = vmatmul.f32.vlgmr.msra.gmra.mxu0 %v9369_v61  ;;  %v9429_v32 = vld [vmem:[#allocation12_spill] sm:$0xff] }
 0x5d7   :  { %4566 = vmatpush.msrb.mxu2 %v4148_v59  ;;  %4465 = vmatmul.f32.vlgmr.msra.gmra.mxu1 %v9370_v53  ;;  %v9382_v59 = vld [vmem:[#allocation76_spill] sm:$0xff] }
 0x5d8   :  { %4229 = vmatpush.msra.mxu3 %v4228_v17  ;;  %v9431_v17 = vld [vmem:[#allocation61_spill] sm:$0xff] }
 0x5d9   :  { %4570 = vmatpush.msrb.mxu2 %v4154_v57  ;;  %v9385_v57 = vld [vmem:[#allocation23_spill] sm:$0xff] }
 0x5da   :  { %4235 = vmatpush.msra.mxu3 %v4234_v26  ;;  %v8474_v26 = vld [vmem:[%s8886_s10] ss:$0 sm:$0xff] }
 0x5db   :  { %4574 = vmatpush.msrb.mxu2 %v4160_v10  ;;  %4237 = vmatmul.f32.vlgmr.msra.gmra.mxu3 %v9371_v55  ;;  %v9388_v10 = vld [vmem:[#allocation22_spill] sm:$0xff] }
 0x5dc   :  { %4024 = vmatmul.f32.gmra.mxu2 %v9372_v7  ;;  %4689 = vmatpush.msrb.mxu3 %v8155_v60  ;;  %v9375_v60 = vld [vmem:[#allocation70_spill] sm:$0xff] }
 0x5dd   :  { %4578 = vmatpush.msrb.mxu2 %v4166_v36  ;;  %v9391_v36 = vld [vmem:[#allocation73_spill] sm:$0xff] }
 0x5de   :  { %4691 = vmatpush.msrb.mxu3 %v8124_v35  ;;  %4356 = vmatmul.f32.gmra.mxu0 %v9373_v27  ;;  %v9376_v35 = vld [vmem:[#allocation40_spill] sm:$0xff] }
 0x5df   :  { %4582 = vmatpush.msrb.mxu2 %v4172_v31  ;;  %4471 = vmatmul.f32.gmra.mxu1 %v9374_v49  ;;  %v9394_v31 = vld [vmem:[#allocation56_spill] sm:$0xff] }
 0x5e0   :  { %4693 = vmatpush.msrb.mxu3 %v8134_v2  ;;  %v9377_v2 = vld [vmem:[#allocation16_spill] sm:$0xff] }
 0x5e1   :  { %4586 = vmatpush.msrb.mxu2 %v4178_v12  ;;  %v9397_v12 = vld [vmem:[#allocation77_spill] sm:$0xff] }
 0x5e2   :  { %4695 = vmatpush.msrb.mxu3 %v8142_v21  ;;  %v9378_v21 = vld [vmem:[#allocation26_spill] sm:$0xff] }
 0x5e3   :  { %4590 = vmatpush.msrb.mxu2 %v4184_v40  ;;  %4241 = vmatmul.f32.gmra.mxu3 %v9375_v60  ;;  %v9400_v40 = vld [vmem:[#allocation48_spill] sm:$0xff] }
 0x5e4   :  { %4032 = vmatmul.f32.gmra.mxu2 %v9376_v35  ;;  %4697 = vmatpush.msrb.mxu3 %v8153_v30  ;;  %v9379_v30 = vld [vmem:[#allocation15_spill] sm:$0xff] }
 0x5e5   :  { %4594 = vmatpush.msrb.mxu2 %v4190_v8  ;;  %v9403_v8 = vld [vmem:[#allocation34_spill] sm:$0xff] }
 0x5e6   :  { %4699 = vmatpush.msrb.mxu3 %v8164_v43  ;;  %4361 = vmatmul.f32.gmra.mxu0 %v9377_v2  ;;  %v9380_v43 = vld [vmem:[#allocation24_spill] sm:$0xff] }
 0x5e7   :  { %4598 = vmatpush.msrb.mxu2 %v4196_v42  ;;  %4477 = vmatmul.f32.gmra.mxu1 %v9378_v21  ;;  %v9406_v42 = vld [vmem:[#allocation59_spill] sm:$0xff] }
 0x5e8   :  { %4701 = vmatpush.msrb.mxu3 %v8179_v51  ;;  %v9383_v51 = vld [vmem:[#allocation66_spill] sm:$0xff] }
 0x5e9   :  { %4602 = vmatpush.msrb.mxu2 %v4202_v4  ;;  %v9409_v4 = vld [vmem:[#allocation78_spill] sm:$0xff] }
 0x5ea   :  { %4703 = vmatpush.msrb.mxu3 %v8191_v25  ;;  %v9386_v25 = vld [vmem:[#allocation62_spill] sm:$0xff] }
 0x5eb   :  { %4606 = vmatpush.msrb.mxu2 %v4208_v1  ;;  %4245 = vmatmul.f32.gmra.mxu3 %v9379_v30  ;;  %v9412_v1 = vld [vmem:[#allocation72_spill] sm:$0xff] }
 0x5ec   :  { %4040 = vmatmul.f32.gmra.mxu2 %v9380_v43  ;;  %4705 = vmatpush.msrb.mxu3 %v8209_v16  ;;  %v9389_v16 = vld [vmem:[#allocation79_spill] sm:$0xff] }
 0x5ed   :  { %4610 = vmatpush.msrb.mxu2 %v4214_v19  ;;  %v9415_v19 = vld [vmem:[#allocation55_spill] sm:$0xff] }
 0x5ee   :  { %4707 = vmatpush.msrb.mxu3 %v8225_v13  ;;  %4366 = vmatmul.f32.gmra.mxu0 %v9381_v52  ;;  %v9392_v13 = vld [vmem:[#allocation19_spill] sm:$0xff] }
 0x5ef   :  { %4614 = vmatpush.msrb.mxu2 %v4220_v45  ;;  %4483 = vmatmul.f32.gmra.mxu1 %v9382_v59  ;;  %v9419_v45 = vld [vmem:[#allocation49_spill] sm:$0xff] }
 0x5f0   :  { %4709 = vmatpush.msrb.mxu3 %v8240_v15  ;;  %v9395_v15 = vld [vmem:[#allocation32_spill] sm:$0xff] }
 0x5f1   :  { %4618 = vmatpush.msrb.mxu2 %v4226_v28  ;;  %v9422_v28 = vld [vmem:[#allocation41_spill] sm:$0xff] }
 0x5f2   :  { %4711 = vmatpush.msrb.mxu3 %v8254_v44  ;;  %v9398_v44 = vld [vmem:[#allocation20_spill] sm:$0xff] }
 0x5f3   :  { %4622 = vmatpush.msrb.mxu2 %v4232_v48  ;;  %4249 = vmatmul.f32.gmra.mxu3 %v9383_v51  ;;  %v9425_v48 = vld [vmem:[#allocation65_spill] sm:$0xff] }
 0x5f4   :  { %4048 = vmatmul.f32.gmra.mxu2 %v9384_v20  ;;  %4713 = vmatpush.msrb.mxu3 %v8267_v5  ;;  %v9401_v5 = vld [vmem:[#allocation52_spill] sm:$0xff] }
 0x5f6   :  { %4715 = vmatpush.msrb.mxu3 %v8280_v23  ;;  %4371 = vmatmul.f32.gmra.mxu0 %v9385_v57  ;;  %v9404_v23 = vld [vmem:[#allocation35_spill] sm:$0xff] }
 0x5f7   :  { %4489 = vmatmul.f32.gmra.mxu1 %v9386_v25 }
 0x5f8   :  { %4717 = vmatpush.msrb.mxu3 %v8292_v11  ;;  %v9407_v11 = vld [vmem:[#allocation80_spill] sm:$0xff] }
 0x5fa   :  { %4719 = vmatpush.msrb.mxu3 %v8304_v22  ;;  %v9410_v22 = vld [vmem:[#allocation44_spill] sm:$0xff] }
 0x5fb   :  { %4253 = vmatmul.f32.gmra.mxu3 %v9387_v14 }
 0x5fc   :  { %4056 = vmatmul.f32.gmra.mxu2 %v9388_v10 }
 0x5fe   :  { %4376 = vmatmul.f32.gmra.mxu0 %v9389_v16 }
 0x5ff   :  { %4495 = vmatmul.f32.gmra.mxu1 %v9390_v54 }
 0x603   :  { %4257 = vmatmul.f32.gmra.mxu3 %v9391_v36 }
 0x604   :  { %4064 = vmatmul.f32.gmra.mxu2 %v9392_v13 }
 0x606   :  { %4381 = vmatmul.f32.gmra.mxu0 %v9393_v37 }
 0x607   :  { %4501 = vmatmul.f32.gmra.mxu1 %v9394_v31 }
 0x60b   :  { %4261 = vmatmul.f32.gmra.mxu3 %v9395_v15 }
 0x60c   :  { %4072 = vmatmul.f32.gmra.mxu2 %v9396_v63 }
 0x60e   :  { %4386 = vmatmul.f32.gmra.mxu0 %v9397_v12 }
 0x60f   :  { %4507 = vmatmul.f32.gmra.mxu1 %v9398_v44 }
 0x613   :  { %4265 = vmatmul.f32.gmra.mxu3 %v9399_v9 }
 0x614   :  { %4080 = vmatmul.f32.gmra.mxu2 %v9400_v40 }
 0x616   :  { %4391 = vmatmul.f32.gmra.mxu0 %v9401_v5 }
 0x617   :  { %4513 = vmatmul.f32.gmra.mxu1 %v9402_v56 }
 0x61b   :  { %4269 = vmatmul.f32.gmra.mxu3 %v9403_v8 }
 0x61c   :  { %4088 = vmatmul.f32.gmra.mxu2 %v9404_v23 }
 0x61e   :  { %4396 = vmatmul.f32.gmra.mxu0 %v9405_v29 }
 0x61f   :  { %4519 = vmatmul.f32.gmra.mxu1 %v9406_v42 }
 0x623   :  { %4273 = vmatmul.f32.gmra.mxu3 %v9407_v11 }
 0x624   :  { %4096 = vmatmul.f32.gmra.mxu2 %v9408_v3 }
 0x626   :  { %4401 = vmatmul.f32.gmra.mxu0 %v9409_v4 }
 0x627   :  { %4525 = vmatmul.f32.gmra.mxu1 %v9410_v22 }
 0x62b   :  { %4277 = vmatmul.f32.gmra.mxu3 %v9411_v47 }
 0x62c   :  { %4104 = vmatmul.f32.gmra.mxu2 %v9412_v1 }
 0x62e   :  { %4406 = vmatmul.f32.gmra.mxu0 %v9413_v62 }
 0x62f   :  { %4531 = vmatmul.f32.gmra.mxu1 %v9414_v33 }
 0x633   :  { %4281 = vmatmul.f32.gmra.mxu3 %v9415_v19 }
 0x634   :  { %4112 = vmatmul.f32.gmra.mxu2 %v9416_v58 }
 0x636   :  { %4411 = vmatmul.f32.gmra.mxu0 %v9417_v38 }
 0x637   :  { %4537 = vmatmul.f32.gmra.mxu1 %v9418_v34 }
 0x63b   :  { %4285 = vmatmul.f32.gmra.mxu3 %v9419_v45 }
 0x63c   :  { %4120 = vmatmul.f32.gmra.mxu2 %v9420_v50 }
 0x63e   :  { %4416 = vmatmul.f32.gmra.mxu0 %v9421_v41 }
 0x63f   :  { %4543 = vmatmul.f32.gmra.mxu1 %v9422_v28 }
 0x643   :  { %4289 = vmatmul.f32.gmra.mxu3 %v9423_v46 }
 0x644   :  { %4128 = vmatmul.f32.gmra.mxu2 %v9424_v18 }
 0x646   :  { %4421 = vmatmul.f32.gmra.mxu0 %v9425_v48 }
 0x647   :  { %4549 = vmatmul.f32.gmra.mxu1 %v9426_v24 }
 0x64b   :  { %4293 = vmatmul.f32.gmra.mxu3 %v9427_v39 }
 0x64c   :  { %4136 = vmatmul.f32.gmra.mxu2 %v9428_v6 }
 0x64e   :  { %4426 = vmatmul.f32.gmra.mxu0 %v9429_v32 }
 0x64f   :  { %4555 = vmatmul.f32.gmra.mxu1 %v9430_v0 }
 0x653   :  { %4297 = vmatmul.f32.gmra.mxu3 %v9431_v17  ;;  %v4352_v61 = vpop.f32.mrf.mxu0 }
 0x654   :  { %4624 = vmatmul.f32.vlgmr.msrb.gmra.mxu2 %v9371_v55  ;;  %v4466_v53 = vpop.f32.mrf.mxu1 }
 0x657   :  { %v4017_v7 = vpop.f32.mrf.mxu2 }
 0x658   :  { %v4018_v27 = vadd.f32 %v8474_v26, %v4017_v7 }
 0x65b   :  { %4721 = vmatmul.f32.vlgmr.msrb.gmra.mxu3 %v9371_v55  ;;  %v4357_v49 = vpop.f32.mrf.mxu0 }
 0x65c   :  { %4628 = vmatmul.f32.gmra.mxu2 %v9375_v60  ;;  %v4472_v35 = vpop.f32.mrf.mxu1 }
 0x65e   :  { %v4238_v2 = vpop.f32.mrf.mxu3 }
 0x65f   :  { %v4025_v21 = vpop.f32.mrf.mxu2  ;;  %v4239_v43 = vadd.f32 %v4238_v2, %v4018_v27 }
 0x660   :  { %v4026_v59 = vadd.f32 %v8474_v26, %v4025_v21 }
 0x661   :  { %v4353_v52 = vadd.f32 %v4352_v61, %v4239_v43 }
 0x663   :  { %v8480_v20 = vadd.f32 %v4466_v53, %v4353_v52  ;;  %4725 = vmatmul.f32.gmra.mxu3 %v9375_v60  ;;  %v4362_v57 = vpop.f32.mrf.mxu0 }
 0x664   :  { %4632 = vmatmul.f32.gmra.mxu2 %v9379_v30  ;;  %v4478_v25 = vpop.f32.mrf.mxu1 }
 0x666   :  { %v4242_v10 = vpop.f32.mrf.mxu3 }
 0x667   :  { %v4033_v55 = vpop.f32.mrf.mxu2  ;;  %v4243_v16 = vadd.f32 %v4242_v10, %v4026_v59 }
 0x668   :  { %v4034_v13 = vadd.f32 %v8474_v26, %v4033_v55 }
 0x669   :  { %v4358_v54 = vadd.f32 %v4357_v49, %v4243_v16 }
 0x66b   :  { %v8485_v37 = vadd.f32 %v4472_v35, %v4358_v54  ;;  %4729 = vmatmul.f32.gmra.mxu3 %v9379_v30  ;;  %v4367_v31 = vpop.f32.mrf.mxu0 }
 0x66c   :  { %4636 = vmatmul.f32.gmra.mxu2 %v9383_v51  ;;  %v4484_v12 = vpop.f32.mrf.mxu1 }
 0x66e   :  { %v4246_v63 = vpop.f32.mrf.mxu3 }
 0x66f   :  { %v4041_v60 = vpop.f32.mrf.mxu2  ;;  %v4247_v44 = vadd.f32 %v4246_v63, %v4034_v13 }
 0x670   :  { %v4042_v5 = vadd.f32 %v8474_v26, %v4041_v60 }
 0x671   :  { %v4363_v40 = vadd.f32 %v4362_v57, %v4247_v44 }
 0x673   :  { %v8490_v56 = vadd.f32 %v4478_v25, %v4363_v40  ;;  %4733 = vmatmul.f32.gmra.mxu3 %v9383_v51  ;;  %v4372_v29 = vpop.f32.mrf.mxu0 }
 0x674   :  { %4640 = vmatmul.f32.gmra.mxu2 %v9387_v14  ;;  %v4490_v3 = vpop.f32.mrf.mxu1 }
 0x676   :  { %v4250_v23 = vpop.f32.mrf.mxu3 }
 0x677   :  { %v4049_v42 = vpop.f32.mrf.mxu2  ;;  %v4251_v30 = vadd.f32 %v4250_v23, %v4042_v5 }
 0x678   :  { %v4050_v22 = vadd.f32 %v8474_v26, %v4049_v42 }
 0x679   :  { %v4368_v4 = vadd.f32 %v4367_v31, %v4251_v30 }
 0x67b   :  { %v8495_v1 = vadd.f32 %v4484_v12, %v4368_v4  ;;  %4737 = vmatmul.f32.gmra.mxu3 %v9387_v14  ;;  %v4377_v51 = vpop.f32.mrf.mxu0 }
 0x67c   :  { %4644 = vmatmul.f32.gmra.mxu2 %v9391_v36  ;;  %v4496_v34 = vpop.f32.mrf.mxu1 }
 0x67e   :  { %v4254_v62 = vpop.f32.mrf.mxu3 }
 0x67f   :  { %v4057_v33 = vpop.f32.mrf.mxu2  ;;  %v4255_v58 = vadd.f32 %v4254_v62, %v4050_v22 }
 0x680   :  { %v4058_v50 = vadd.f32 %v8474_v26, %v4057_v33 }
 0x681   :  { %v4373_v38 = vadd.f32 %v4372_v29, %v4255_v58 }
 0x683   :  { %v8500_v41 = vadd.f32 %v4490_v3, %v4373_v38  ;;  %4741 = vmatmul.f32.gmra.mxu3 %v9391_v36  ;;  %v4382_v24 = vpop.f32.mrf.mxu0 }
 0x684   :  { %4648 = vmatmul.f32.gmra.mxu2 %v9395_v15  ;;  %v4502_v0 = vpop.f32.mrf.mxu1 }
 0x686   :  { %v4258_v28 = vpop.f32.mrf.mxu3 }
 0x687   :  { %v4065_v18 = vpop.f32.mrf.mxu2  ;;  %v4259_v48 = vadd.f32 %v4258_v28, %v4058_v50 }
 0x688   :  { %v4066_v6 = vadd.f32 %v8474_v26, %v4065_v18 }
 0x689   :  { %v4378_v14 = vadd.f32 %v4377_v51, %v4259_v48 }
 0x68b   :  { %v8505_v32 = vadd.f32 %v4496_v34, %v4378_v14  ;;  %4745 = vmatmul.f32.gmra.mxu3 %v9395_v15  ;;  %v4387_v35 = vpop.f32.mrf.mxu0 }
 0x68c   :  { %4652 = vmatmul.f32.gmra.mxu2 %v9399_v9  ;;  %v4508_v21 = vpop.f32.mrf.mxu1 }
 0x68e   :  { %v4262_v61 = vpop.f32.mrf.mxu3 }
 0x68f   :  { %v4073_v53 = vpop.f32.mrf.mxu2  ;;  %v4263_v7 = vadd.f32 %v4262_v61, %v4066_v6 }
 0x690   :  { %v4074_v27 = vadd.f32 %v8474_v26, %v4073_v53 }
 0x691   :  { %v4383_v36 = vadd.f32 %v4382_v24, %v4263_v7 }
 0x693   :  { %v8510_v49 = vadd.f32 %v4502_v0, %v4383_v36  ;;  %4749 = vmatmul.f32.gmra.mxu3 %v9399_v9  ;;  %v4392_v10 = vpop.f32.mrf.mxu0 }
 0x694   :  { %4656 = vmatmul.f32.gmra.mxu2 %v9403_v8  ;;  %v4514_v16 = vpop.f32.mrf.mxu1 }
 0x696   :  { %v4266_v2 = vpop.f32.mrf.mxu3 }
 0x697   :  { %v4081_v43 = vpop.f32.mrf.mxu2  ;;  %v4267_v15 = vadd.f32 %v4266_v2, %v4074_v27 }
 0x698   :  { %v4082_v59 = vadd.f32 %v8474_v26, %v4081_v43 }
 0x699   :  { %v4388_v52 = vadd.f32 %v4387_v35, %v4267_v15 }
 0x69b   :  { %v8515_v57 = vadd.f32 %v4508_v21, %v4388_v52  ;;  %4753 = vmatmul.f32.gmra.mxu3 %v9403_v8 }
 0x69c   :  { %4660 = vmatmul.f32.gmra.mxu2 %v9407_v11 }
 0x69e   :  { %v4270_v25 = vpop.f32.mrf.mxu3 }
 0x69f   :  { %v4089_v55 = vpop.f32.mrf.mxu2  ;;  %v4271_v9 = vadd.f32 %v4270_v25, %v4082_v59 }
 0x6a0   :  { %v4090_v13 = vadd.f32 %v8474_v26, %v4089_v55 }
 0x6a1   :  { %v4393_v54 = vadd.f32 %v4392_v10, %v4271_v9 }
 0x6a3   :  { %v8520_v31 = vadd.f32 %v4514_v16, %v4393_v54  ;;  %4757 = vmatmul.f32.gmra.mxu3 %v9407_v11 }
 0x6a4   :  { %4664 = vmatmul.f32.gmra.mxu2 %v9411_v47 }
 0x6a6   :  { %v4274_v63 = vpop.f32.mrf.mxu3 }
 0x6a7   :  { %v4097_v12 = vpop.f32.mrf.mxu2  ;;  %v8524_v60 = vadd.f32 %v4274_v63, %v4090_v13 }
 0x6a8   :  { %v4098_v8 = vadd.f32 %v8474_v26, %v4097_v12 }
 0x6ab   :  { %4761 = vmatmul.f32.gmra.mxu3 %v9411_v47 }
 0x6ac   :  { %4668 = vmatmul.f32.gmra.mxu2 %v9415_v19 }
 0x6ae   :  { %v4278_v44 = vpop.f32.mrf.mxu3 }
 0x6af   :  { %v4105_v40 = vpop.f32.mrf.mxu2  ;;  %v8529_v5 = vadd.f32 %v4278_v44, %v4098_v8 }
 0x6b0   :  { %v4106_v23 = vadd.f32 %v8474_v26, %v4105_v40 }
 0x6b3   :  { %4765 = vmatmul.f32.gmra.mxu3 %v9415_v19 }
 0x6b4   :  { %4672 = vmatmul.f32.gmra.mxu2 %v9419_v45 }
 0x6b6   :  { %v4282_v11 = vpop.f32.mrf.mxu3 }
 0x6b7   :  { %v4113_v29 = vpop.f32.mrf.mxu2  ;;  %v8534_v42 = vadd.f32 %v4282_v11, %v4106_v23 }
 0x6b8   :  { %v4114_v30 = vadd.f32 %v8474_v26, %v4113_v29 }
 0x6bb   :  { %4769 = vmatmul.f32.gmra.mxu3 %v9419_v45 }
 0x6bc   :  { %4676 = vmatmul.f32.gmra.mxu2 %v9423_v46 }
 0x6be   :  { %v4286_v47 = vpop.f32.mrf.mxu3 }
 0x6bf   :  { %v4121_v3 = vpop.f32.mrf.mxu2  ;;  %v8539_v4 = vadd.f32 %v4286_v47, %v4114_v30 }
 0x6c0   :  { %v4122_v22 = vadd.f32 %v8474_v26, %v4121_v3 }
 0x6c3   :  { %4773 = vmatmul.f32.gmra.mxu3 %v9423_v46 }
 0x6c4   :  { %4680 = vmatmul.f32.gmra.mxu2 %v9427_v39 }
 0x6c6   :  { %v4290_v19 = vpop.f32.mrf.mxu3 }
 0x6c7   :  { %v4129_v62 = vpop.f32.mrf.mxu2  ;;  %v8544_v33 = vadd.f32 %v4290_v19, %v4122_v22 }
 0x6c8   :  { %v4130_v58 = vadd.f32 %v8474_v26, %v4129_v62 }
 0x6cb   :  { %4777 = vmatmul.f32.gmra.mxu3 %v9427_v39 }
 0x6cc   :  { %4684 = vmatmul.f32.gmra.mxu2 %v9431_v17 }
 0x6ce   :  { %v4294_v45 = vpop.f32.mrf.mxu3 }
 0x6cf   :  { %v4137_v51 = vpop.f32.mrf.mxu2  ;;  %v8549_v38 = vadd.f32 %v4294_v45, %v4130_v58 }
 0x6d0   :  { %v4138_v34 = vadd.f32 %v8474_v26, %v4137_v51 }
 0x6d3   :  { %4781 = vmatmul.f32.gmra.mxu3 %v9431_v17 }
 0x6d6   :  { %v4298_v46 = vpop.f32.mrf.mxu3 }
 0x6d7   :  { %v8553_v50 = vadd.f32 %v4298_v46, %v4138_v34  ;;  %v4625_v28 = vpop.f32.mrf.mxu2 }
 0x6d8   :  { %v4626_v18 = vadd.f32 %v4625_v28, %v8480_v20 }
 0x6de   :  { %v4722_v48 = vpop.f32.mrf.mxu3 }
 0x6df   :  { %v4629_v14 = vpop.f32.mrf.mxu2  ;;  %v8556_v24 = vadd.f32 %v4722_v48, %v4626_v18 }
 0x6e0   :  { %v4630_v39 = vadd.f32 %v4629_v14, %v8485_v37 }
 0x6e6   :  { %v4726_v6 = vpop.f32.mrf.mxu3 }
 0x6e7   :  { %v4633_v0 = vpop.f32.mrf.mxu2  ;;  %v8559_v61 = vadd.f32 %v4726_v6, %v4630_v39 }
 0x6e8   :  { %v4634_v26 = vadd.f32 %v4633_v0, %v8490_v56 }
 0x6ee   :  { %v4730_v53 = vpop.f32.mrf.mxu3 }
 0x6ef   :  { %v4637_v17 = vpop.f32.mrf.mxu2  ;;  %v8562_v7 = vadd.f32 %v4730_v53, %v4634_v26 }
 0x6f0   :  { %v4638_v36 = vadd.f32 %v4637_v17, %v8495_v1  ;;  %v4397_v1 = vpop.f32.mrf.mxu0 }
 0x6f6   :  { %v4734_v27 = vpop.f32.mrf.mxu3 }
 0x6f7   :  { %v4641_v20 = vpop.f32.mrf.mxu2  ;;  %v8565_v35 = vadd.f32 %v4734_v27, %v4638_v36 }
 0x6f8   :  { %v4642_v2 = vadd.f32 %v4641_v20, %v8500_v41  ;;  %v4520_v41 = vpop.f32.mrf.mxu1  ;;  %v4402_v12 = vpop.f32.mrf.mxu0  ;;  %v4398_v20 = vadd.f32 %v4397_v1, %v8524_v60 }
 0x6f9   :  { %v4403_v26 = vadd.f32 %v4402_v12, %v8529_v5 }
 0x6fe   :  { %v4738_v21 = vpop.f32.mrf.mxu3 }
 0x6ff   :  { %v4645_v37 = vpop.f32.mrf.mxu2  ;;  %v8568_v43 = vadd.f32 %v4738_v21, %v4642_v2 }
 0x700   :  { %v4646_v15 = vadd.f32 %v4645_v37, %v8505_v32  ;;  %v4526_v8 = vpop.f32.mrf.mxu1 }
 0x706   :  { %v4742_v52 = vpop.f32.mrf.mxu3 }
 0x707   :  { %v4649_v56 = vpop.f32.mrf.mxu2  ;;  %v8571_v59 = vadd.f32 %v4742_v52, %v4646_v15 }
 0x708   :  { %v4650_v25 = vadd.f32 %v4649_v56, %v8510_v49  ;;  %v4407_v49 = vpop.f32.mrf.mxu0  ;;  %v4532_v29 = vpop.f32.mrf.mxu1 }
 0x709   :  { %v4408_v6 = vadd.f32 %v4407_v49, %v8534_v42  ;;  %v9434_v49 = vld [vmem:[#allocation81_spill] sm:$0xff] }
 0x70b   :  { %v4533_v2 = vadd.f32 %v4532_v29, %v4408_v6 }
 0x70e   :  { %v4746_v10 = vpop.f32.mrf.mxu3 }
 0x70f   :  { %v4653_v55 = vpop.f32.mrf.mxu2  ;;  %v8574_v9 = vadd.f32 %v4746_v10, %v4650_v25  ;;  %v4521_v10 = vadd.f32 %v4520_v41, %v4398_v20  ;;  %v9436_v41 = vld [vmem:[#allocation6_spill] sm:$0xff]  ;;  %v9441_v20 = vld [vmem:[#allocation47_spill] sm:$0xff] }
 0x710   :  { %v4654_v16 = vadd.f32 %v4653_v55, %v8515_v57  ;;  %v4412_v47 = vpop.f32.mrf.mxu0  ;;  %v4538_v22 = vpop.f32.mrf.mxu1 }
 0x711   :  { %v4413_v48 = vadd.f32 %v4412_v47, %v8539_v4 }
 0x713   :  { %v4539_v53 = vadd.f32 %v4538_v22, %v4413_v48 }
 0x716   :  { %v4750_v54 = vpop.f32.mrf.mxu3 }
 0x717   :  { %v4657_v13 = vpop.f32.mrf.mxu2  ;;  %v8577_v63 = vadd.f32 %v4750_v54, %v4654_v16  ;;  %v9432_v16 = vld [vmem:[#allocation82_spill] sm:$0xff] }
 0x718   :  { %v4658_v32 = vadd.f32 %v4657_v13, %v8520_v31  ;;  %v4417_v62 = vpop.f32.mrf.mxu0  ;;  %v4544_v45 = vpop.f32.mrf.mxu1  ;;  %v9433_v13 = vld [vmem:[#allocation83_spill] sm:$0xff] }
 0x719   :  { %v4418_v46 = vadd.f32 %v4417_v62, %v8544_v33 }
 0x71b   :  { %v4545_v0 = vadd.f32 %v4544_v45, %v4418_v46 }
 0x71e   :  { %v4754_v44 = vpop.f32.mrf.mxu3 }
 0x71f   :  { %v4661_v40 = vpop.f32.mrf.mxu2  ;;  %v8580_v23 = vadd.f32 %v4754_v44, %v4658_v32 }
 0x720   :  { %v4422_v34 = vpop.f32.mrf.mxu0  ;;  %v4550_v28 = vpop.f32.mrf.mxu1  ;;  %v4662_v12 = vadd.f32 %v4661_v40, %v4521_v10 }
 0x721   :  { %v4423_v14 = vadd.f32 %v4422_v34, %v8549_v38  ;;  %v4527_v38 = vadd.f32 %v4526_v8, %v4403_v26  ;;  %v9435_v8 = vld [vmem:[#allocation5_spill] sm:$0xff] }
 0x723   :  { %v4551_v17 = vadd.f32 %v4550_v28, %v4423_v14 }
 0x726   :  { %v4758_v11 = vpop.f32.mrf.mxu3 }
 0x727   :  { %v4665_v30 = vpop.f32.mrf.mxu2  ;;  %v4759_v47 = vadd.f32 %v4758_v11, %v4662_v12 }
 0x728   :  { %v4427_v36 = vpop.f32.mrf.mxu0  ;;  %v4556_v52 = vpop.f32.mrf.mxu1  ;;  %v4666_v5 = vadd.f32 %v4665_v30, %v4527_v38 }
 0x729   :  { %v4428_v4 = vadd.f32 %v4427_v36, %v8553_v50 }
 0x72b   :  { %v4557_v60 = vadd.f32 %v4556_v52, %v4428_v4  ;;  %v9442_v4 = vld [vmem:[#allocation9_spill] sm:$0xff] }
 0x72e   :  { %v4762_v3 = vpop.f32.mrf.mxu3 }
 0x72f   :  { %v4669_v57 = vpop.f32.mrf.mxu2  ;;  %v4763_v44 = vadd.f32 %v4762_v3, %v4666_v5  ;;  %v9438_v3 = vld [vmem:[#allocation84_spill] sm:$0xff] }
 0x730   :  { %v4670_v56 = vadd.f32 %v4669_v57, %v4533_v2 }
 0x731   :  { %v4795_v30 = vmul.f32 %v4763_v44, %v9436_v41 }
 0x733   :  { %v4811_v48 = vmax.f32 %v4795_v30, 0.0 }
 0x736   :  { %v4766_v19 = vpop.f32.mrf.mxu3 }
 0x737   :  { %v4673_v58 = vpop.f32.mrf.mxu2  ;;  %v4767_v55 = vadd.f32 %v4766_v19, %v4670_v56 }
 0x738   :  { %v4674_v33 = vadd.f32 %v4673_v58, %v4539_v53 }
 0x739   :  { %v4796_v22 = vmul.f32 %v4767_v55, %v9435_v8 }
 0x73b   :  { %v4812_v46 = vmax.f32 %v4796_v22, 0.0 }
 0x73e   :  { %v4770_v51 = vpop.f32.mrf.mxu3 }
 0x73f   :  { %v4677_v31 = vpop.f32.mrf.mxu2  ;;  %v4771_v42 = vadd.f32 %v4770_v51, %v4674_v33  ;;  %v8620_v33 = vand.u32 4294901760, %v4811_v48 }
 0x740   :  { %v4678_v27 = vadd.f32 %v4677_v31, %v4545_v0  ;;  %v9437_v31 = vld [vmem:[#allocation7_spill] sm:$0xff]  ;;  %v9440_v0 = vld [vmem:[#allocation8_spill] sm:$0xff] }
 0x741   :  { %v4797_v29 = vmul.f32 %v4771_v42, %v9434_v49  ;;  %v4794_v34 = vmul.f32 %v4759_v47, %v9437_v31  ;;  %v4792_v26 = vmul.f32 %v8577_v63, %v9440_v0 }
 0x743   :  { %v4813_v19 = vmax.f32 %v4797_v29, 0.0  ;;  %v4810_v53 = vmax.f32 %v4794_v34, 0.0  ;;  %v9445_v29 = vld [vmem:[#allocation10_spill] sm:$0xff] }
 0x745   :  { %v8602_v14 = vand.u32 4294901760, %v4813_v19  ;;  %v8635_v38 = vand.u32 4294901760, %v4810_v53 }
 0x746   :  { %v4774_v18 = vpop.f32.mrf.mxu3 }
 0x747   :  { %v4681_v39 = vpop.f32.mrf.mxu2  ;;  %v4775_v37 = vadd.f32 %v4774_v18, %v4678_v27  ;;  %v9439_v18 = vld [vmem:[#allocation43_spill] sm:$0xff]  ;;  %v8628_v63 = vsub.f32 %v4813_v19, %v8602_v14  ;;  %v8678_v49 = vsub.f32 %v4810_v53, %v8635_v38 }
 0x748   :  { %v4682_v21 = vadd.f32 %v4681_v39, %v4551_v17  ;;  %v4793_v11 = vmul.f32 %v8580_v23, %v9439_v18  ;;  %v8609_v17 = vand.u32 4294901760, %v4812_v46  ;;  %v8618_v23 = vmul.f32 %v8574_v9, %v9441_v20 }
 0x749   :  { %v4798_v54 = vmul.f32 %v4775_v37, %v9432_v16  ;;  %v4808_v9 = vmax.f32 %v4792_v26, 0.0 }
 0x74a   :  { %v4809_v2 = vmax.f32 %v4793_v11, 0.0  ;;  %v8641_v56 = vsub.f32 %v4812_v46, %v8609_v17  ;;  %v9447_v46 = vld [vmem:[#allocation46_spill] sm:$0xff] }
 0x74b   :  { %v4814_v57 = vmax.f32 %v4798_v54, 0.0  ;;  %v4879_v54 = vand.u32 4294901760, %v8628_v63 }
 0x74c   :  { %v8649_v5 = vand.u32 4294901760, %v4809_v2 }
 0x74d   :  { %v8597_v40 = vand.u32 4294901760, %v4814_v57 }
 0x74e   :  { %v4778_v15 = vpop.f32.mrf.mxu3 }
 0x74f   :  { %v4779_v25 = vadd.f32 %v4778_v15, %v4682_v21  ;;  %v4685_v1 = vpop.f32.mrf.mxu2  ;;  %v8614_v27 = vsub.f32 %v4814_v57, %v8597_v40  ;;  %v8633_v15 = vmul.f32 %v8571_v59, %v9442_v4  ;;  %v4807_v59 = vmax.f32 %v8618_v23, 0.0 }
 0x750   :  { %v4686_v62 = vadd.f32 %v4685_v1, %v4557_v60  ;;  %v8669_v1 = vand.u32 4294901760, %v4808_v9  ;;  %v4880_v57 = vsub.f32 %v8628_v63, %v4879_v54 }
 0x751   :  { %v4799_v32 = vmul.f32 %v4779_v25, %v9433_v13  ;;  %v4873_v42 = vand.u32 4294901760, %v8614_v27  ;;  %v9443_v25 = vld [vmem:[#allocation51_spill] sm:$0xff]  ;;  %v9444_v13 = vld [vmem:[#allocation42_spill] sm:$0xff]  ;;  %v4806_v60 = vmax.f32 %v8633_v15, 0.0  ;;  %v8686_v8 = vand.u32 4294901760, %v4807_v59 }
 0x752   :  { %v8646_v10 = vmul.f32 %v8568_v43, %v9443_v25  ;;  %v8661_v43 = vsub.f32 %v4811_v48, %v8620_v33  ;;  %v8711_v34 = vsub.f32 %v4808_v9, %v8669_v1  ;;  %v4881_v11 = vand.u32 4294901760, %v4880_v57 }
 0x753   :  { %v4815_v50 = vmax.f32 %v4799_v32, 0.0  ;;  %v8666_v32 = vmul.f32 %v8565_v35, %v9444_v13  ;;  %v4874_v44 = vsub.f32 %v8614_v27, %v4873_v42  ;;  %v4885_v35 = vand.u32 4294901760, %v8641_v56  ;;  %v4817_v13 = vld [vmem:[%s8880_s4] sm:$0xff]  ;;  %s5240_s4 = smov [#allocation2]  }
 0x754   :  { %v4805_v47 = vmax.f32 %v8646_v10, 0.0  ;;  %v8702_v19 = vand.u32 4294901760, %v4806_v60  ;;  %s5165_s28 = sshll.u32 %s5240_s4, 4  ;;  %s5166_s28 = int_to_ptr.vmem [resolvable:$true] %s5165_s28 }
 0x755   :  { %v8594_v45 = vand.u32 4294901760, %v4815_v50  ;;  %v4804_v30 = vmax.f32 %v8666_v32, 0.0  ;;  %v4886_v31 = vsub.f32 %v8641_v56, %v4885_v35 }
 0x756   :  { %v4782_v58 = vpop.f32.mrf.mxu3  ;;  %v8719_v18 = vand.u32 4294901760, %v4805_v47  ;;  %v8741_v23 = vsub.f32 %v4806_v60, %v8702_v19 }
 0x757   :  { %v4783_v51 = vadd.f32 %v4782_v58, %v4686_v62  ;;  %v8605_v6 = vsub.f32 %v4815_v50, %v8594_v45  ;;  %v8683_v50 = vmul.f32 %v8562_v7, %v9445_v29  ;;  %v8694_v62 = vsub.f32 %v4809_v2, %v8649_v5  ;;  %v9446_v58 = vld [vmem:[#allocation54_spill] sm:$0xff] }
 0x758   :  { %v4891_v7 = vand.u32 4294901760, %v8661_v43  ;;  %v8699_v41 = vmul.f32 %v8559_v61, %v9446_v58  ;;  %v4897_v61 = vand.u32 4294901760, %v8678_v49  ;;  %v8732_v26 = vand.u32 4294901760, %v4804_v30 }
 0x759   :  { %v4800_v28 = vmul.f32 %v4783_v51, %v9438_v3  ;;  %v4867_v37 = vand.u32 4294901760, %v8605_v6  ;;  %v4875_v51 = vand.u32 4294901760, %v4874_v44  ;;  %v8716_v3 = vmul.f32 %v8556_v24, %v9447_v46 }
 0x75a   :  { %v4892_v48 = vsub.f32 %v8661_v43, %v4891_v7  ;;  %v4903_v24 = vand.u32 4294901760, %v8694_v62  ;;  %v4802_v0 = vmax.f32 %v8699_v41, 0.0  ;;  %v4887_v53 = vand.u32 4294901760, %v4886_v31 }
 0x75b   :  { %v4816_v39 = vmax.f32 %v4800_v28, 0.0  ;;  %v4868_v16 = vsub.f32 %v8605_v6, %v4867_v37  ;;  %v4803_v28 = vmax.f32 %v8683_v50, 0.0  ;;  %v4898_v20 = vsub.f32 %v8678_v49, %v4897_v61 }
 0x75c   :  { %v4909_v2 = vand.u32 4294901760, %v8711_v34  ;;  %v4801_v4 = vmax.f32 %v8716_v3, 0.0  ;;  %v4893_v9 = vand.u32 4294901760, %v4892_v48  ;;  %v4904_v25 = vsub.f32 %v8694_v62, %v4903_v24 }
 0x75d   :  { %v8611_v36 = vand.u32 4294901760, %v4816_v39  ;;  %v4869_v22 = vand.u32 4294901760, %v4868_v16  ;;  %v8745_v15 = vand.u32 4294901760, %v4803_v28  ;;  %v8754_v10 = vsub.f32 %v4805_v47, %v8719_v18 }
 0x75e   :  { %v8762_v16 = vsub.f32 %v4804_v30, %v8732_v26  ;;  %v4899_v32 = vand.u32 4294901760, %v4898_v20  ;;  %v4910_v60 = vsub.f32 %v8711_v34, %v4909_v2  ;;  %v8772_v44 = vand.u32 4294901760, %v4817_v13 }
 0x75f   :  { %v8623_v21 = vsub.f32 %v4816_v39, %v8611_v36  ;;  %4819 = vmatpush.msrb.mxu0 %v8611_v36  ;;  %5015 = vmatpush.msra.mxu3 %v8611_v36  ;;  %v8728_v39 = vsub.f32 %v4807_v59, %v8686_v8  ;;  %v8774_v29 = vand.u32 4294901760, %v4801_v4  ;;  %v8779_v50 = vsub.f32 %v4803_v28, %v8745_v15 }
 0x760   :  { %v4905_v47 = vand.u32 4294901760, %v4904_v25  ;;  %v4927_v57 = vand.u32 4294901760, %v8754_v10  ;;  %v4851_v58 = vsub.f32 %v4817_v13, %v8772_v44  ;;  %v4911_v30 = vand.u32 4294901760, %v4910_v60 }
 0x761   :  { %v4861_v52 = vand.u32 4294901760, %v8623_v21  ;;  %4821 = vmatpush.msrb.mxu0 %v8594_v45  ;;  %4962 = vmatpush.msra.mxu2 %v8623_v21  ;;  %v4915_v59 = vand.u32 4294901760, %v8728_v39  ;;  %v4933_v31 = vand.u32 4294901760, %v8762_v16  ;;  %v4939_v48 = vand.u32 4294901760, %v8779_v50 }
 0x762   :  { %5017 = vmatpush.msra.mxu3 %v8594_v45  ;;  %v4852_v46 = vand.u32 4294901760, %v4851_v58  ;;  %v4928_v28 = vsub.f32 %v8754_v10, %v4927_v57 }
 0x763   :  { %4823 = vmatpush.msrb.mxu0 %v8597_v40  ;;  %4965 = vmatpush.msra.mxu2 %v8605_v6  ;;  %v4862_v55 = vsub.f32 %v8623_v21, %v4861_v52  ;;  %v4934_v20 = vsub.f32 %v8762_v16, %v4933_v31  ;;  %v4940_v25 = vsub.f32 %v8779_v50, %v4939_v48 }
 0x764   :  { %5019 = vmatpush.msra.mxu3 %v8597_v40 }
 0x765   :  { %4825 = vmatpush.msrb.mxu0 %v8602_v14  ;;  %4968 = vmatpush.msra.mxu2 %v8614_v27  ;;  %v4863_v12 = vand.u32 4294901760, %v4862_v55  ;;  %v8757_v55 = vand.u32 4294901760, %v4802_v0  ;;  %v4935_v60 = vand.u32 4294901760, %v4934_v20 }
 0x766   :  { %5021 = vmatpush.msra.mxu3 %v8602_v14 }
 0x767   :  { %4827 = vmatpush.msrb.mxu0 %v8609_v17  ;;  %4864 = vmatpush.msrb.mxu1 %v4863_v12  ;;  %v4921_v12 = vand.u32 4294901760, %v8741_v23  ;;  %v8790_v41 = vsub.f32 %v4802_v0, %v8757_v55  ;;  %v4853_v0 = vsub.f32 %v4851_v58, %v4852_v46 }
 0x768   :  { %4971 = vmatpush.msra.mxu2 %v8628_v63  ;;  %5023 = vmatpush.msra.mxu3 %v8609_v17 }
 0x769   :  { %4829 = vmatpush.msrb.mxu0 %v8620_v33  ;;  %4870 = vmatpush.msrb.mxu1 %v4869_v22  ;;  %v4916_v22 = vsub.f32 %v8728_v39, %v4915_v59 }
 0x76a   :  { %4974 = vmatpush.msra.mxu2 %v8641_v56  ;;  %5025 = vmatpush.msra.mxu3 %v8620_v33 }
 0x76b   :  { %4831 = vmatpush.msrb.mxu0 %v8635_v38  ;;  %4876 = vmatpush.msrb.mxu1 %v4875_v51  ;;  %v4922_v51 = vsub.f32 %v8741_v23, %v4921_v12  ;;  %v4917_v3 = vand.u32 4294901760, %v4916_v22  ;;  %v4941_v22 = vand.u32 4294901760, %v4940_v25 }
 0x76c   :  { %4977 = vmatpush.msra.mxu2 %v8661_v43  ;;  %5027 = vmatpush.msra.mxu3 %v8635_v38 }
 0x76d   :  { %4833 = vmatpush.msrb.mxu0 %v8649_v5  ;;  %4882 = vmatpush.msrb.mxu1 %v4881_v11  ;;  %v8804_v11 = vsub.f32 %v4801_v4, %v8774_v29  ;;  %v4929_v4 = vand.u32 4294901760, %v4928_v28 }
 0x76e   :  { %4980 = vmatpush.msra.mxu2 %v8678_v49  ;;  %5029 = vmatpush.msra.mxu3 %v8649_v5 }
 0x76f   :  { %4835 = vmatpush.msrb.mxu0 %v8669_v1  ;;  %4888 = vmatpush.msrb.mxu1 %v4887_v53  ;;  %v4923_v53 = vand.u32 4294901760, %v4922_v51  ;;  %v4951_v13 = vand.u32 4294901760, %v8804_v11 }
 0x770   :  { %4983 = vmatpush.msra.mxu2 %v8694_v62  ;;  %5031 = vmatpush.msra.mxu3 %v8669_v1 }
 0x771   :  { %4837 = vmatpush.msrb.mxu0 %v8686_v8  ;;  %4894 = vmatpush.msrb.mxu1 %v4893_v9  ;;  %v4945_v9 = vand.u32 4294901760, %v8790_v41 }
 0x772   :  { %4986 = vmatpush.msra.mxu2 %v8711_v34  ;;  %5033 = vmatpush.msra.mxu3 %v8686_v8 }
 0x773   :  { %4839 = vmatpush.msrb.mxu0 %v8702_v19  ;;  %4900 = vmatpush.msrb.mxu1 %v4899_v32  ;;  %v4854_v32 = vand.u32 4294901760, %v4853_v0 }
 0x774   :  { %4989 = vmatpush.msra.mxu2 %v8728_v39  ;;  %5035 = vmatpush.msra.mxu3 %v8702_v19 }
 0x775   :  { %4841 = vmatpush.msrb.mxu0 %v8719_v18  ;;  %4906 = vmatpush.msrb.mxu1 %v4905_v47  ;;  %v4946_v47 = vsub.f32 %v8790_v41, %v4945_v9 }
 0x776   :  { %4992 = vmatpush.msra.mxu2 %v8741_v23  ;;  %5037 = vmatpush.msra.mxu3 %v8719_v18 }
 0x777   :  { %4843 = vmatpush.msrb.mxu0 %v8732_v26  ;;  %4912 = vmatpush.msrb.mxu1 %v4911_v30  ;;  %v4947_v30 = vand.u32 4294901760, %v4946_v47 }
 0x778   :  { %4995 = vmatpush.msra.mxu2 %v8754_v10  ;;  %5039 = vmatpush.msra.mxu3 %v8732_v26 }
 0x779   :  { %4845 = vmatpush.msrb.mxu0 %v8745_v15  ;;  %4918 = vmatpush.msrb.mxu1 %v4917_v3 }
 0x77a   :  { %4998 = vmatpush.msra.mxu2 %v8762_v16  ;;  %5041 = vmatpush.msra.mxu3 %v8745_v15 }
 0x77b   :  { %4847 = vmatpush.msrb.mxu0 %v8757_v55  ;;  %4924 = vmatpush.msrb.mxu1 %v4923_v53 }
 0x77c   :  { %5001 = vmatpush.msra.mxu2 %v8779_v50  ;;  %5043 = vmatpush.msra.mxu3 %v8757_v55  ;;  %v4952_v50 = vsub.f32 %v8804_v11, %v4951_v13 }
 0x77d   :  { %4849 = vmatpush.msrb.mxu0 %v8774_v29  ;;  %4930 = vmatpush.msrb.mxu1 %v4929_v4 }
 0x77e   :  { %5004 = vmatpush.msra.mxu2 %v8790_v41  ;;  %5045 = vmatpush.msra.mxu3 %v8774_v29  ;;  %v4953_v21 = vand.u32 4294901760, %v4952_v50 }
 0x77f   :  { %5056 = vmatpush.msra.mxu0 %v4861_v52  ;;  %4936 = vmatpush.msrb.mxu1 %v4935_v60 }
 0x780   :  { %5007 = vmatpush.msra.mxu2 %v8804_v11  ;;  %4855 = vmatmul.f32.vlgmr.msrb.gmra.mxu0 %v4854_v32 }
 0x781   :  { %5060 = vmatpush.msra.mxu0 %v4867_v37  ;;  %4942 = vmatpush.msrb.mxu1 %v4941_v22 }
 0x782   :  { %5010 = vmatmul.f32.vlgmr.msra.gmra.mxu2 %v4851_v58  ;;  %5049 = vmatmul.f32.vlgmr.msra.gmra.mxu3 %v4852_v46 }
 0x783   :  { %5064 = vmatpush.msra.mxu0 %v4873_v42  ;;  %4948 = vmatpush.msrb.mxu1 %v4947_v30 }
 0x785   :  { %5068 = vmatpush.msra.mxu0 %v4879_v54  ;;  %4954 = vmatpush.msrb.mxu1 %v4953_v21 }
 0x786   :  { %4956 = vmatmul.f32.vlgmr.msrb.gmra.mxu1 %v8772_v44 }
 0x787   :  { %5123 = vmatpush.msra.mxu1 %v8611_v36  ;;  %5072 = vmatpush.msra.mxu0 %v4885_v35 }
 0x789   :  { %5125 = vmatpush.msra.mxu1 %v8594_v45  ;;  %5076 = vmatpush.msra.mxu0 %v4891_v7 }
 0x78b   :  { %5127 = vmatpush.msra.mxu1 %v8597_v40  ;;  %5080 = vmatpush.msra.mxu0 %v4897_v61 }
 0x78d   :  { %5129 = vmatpush.msra.mxu1 %v8602_v14  ;;  %5084 = vmatpush.msra.mxu0 %v4903_v24 }
 0x78f   :  { %5131 = vmatpush.msra.mxu1 %v8609_v17  ;;  %5088 = vmatpush.msra.mxu0 %v4909_v2 }
 0x791   :  { %5133 = vmatpush.msra.mxu1 %v8620_v33  ;;  %5092 = vmatpush.msra.mxu0 %v4915_v59 }
 0x793   :  { %5135 = vmatpush.msra.mxu1 %v8635_v38  ;;  %5096 = vmatpush.msra.mxu0 %v4921_v12 }
 0x795   :  { %5137 = vmatpush.msra.mxu1 %v8649_v5  ;;  %5100 = vmatpush.msra.mxu0 %v4927_v57 }
 0x797   :  { %5139 = vmatpush.msra.mxu1 %v8669_v1  ;;  %5104 = vmatpush.msra.mxu0 %v4933_v31 }
 0x799   :  { %5141 = vmatpush.msra.mxu1 %v8686_v8  ;;  %5108 = vmatpush.msra.mxu0 %v4939_v48 }
 0x79b   :  { %5143 = vmatpush.msra.mxu1 %v8702_v19  ;;  %5112 = vmatpush.msra.mxu0 %v4945_v9 }
 0x79d   :  { %5145 = vmatpush.msra.mxu1 %v8719_v18  ;;  %5116 = vmatpush.msra.mxu0 %v4951_v13 }
 0x79e   :  { %5118 = vmatmul.f32.vlgmr.msra.gmra.mxu0 %v8772_v44 }
 0x79f   :  { %5147 = vmatpush.msra.mxu1 %v8732_v26 }
 0x7a1   :  { %5149 = vmatpush.msra.mxu1 %v8745_v15 }
 0x7a3   :  { %5151 = vmatpush.msra.mxu1 %v8757_v55 }
 0x7a5   :  { %5153 = vmatpush.msra.mxu1 %v8774_v29 }
 0x7a6   :  { %5155 = vmatmul.f32.vlgmr.msra.gmra.mxu1 %v8772_v44 }
 0x7fd   :  { %v4856_v40 = vpop.f32.mrf.mxu0 }
 0x803   :  { %v4957_v45 = vpop.f32.mrf.mxu1 }
 0x804   :  { %v4958_v14 = vadd.f32 %v4957_v45, %v4856_v40 }
 0x805   :  { %v5011_v6 = vpop.f32.mrf.mxu2  ;;  %v5050_v36 = vpop.f32.mrf.mxu3 }
 0x806   :  { %v5012_v17 = vadd.f32 %v5011_v6, %v4958_v14 }
 0x808   :  { %v5051_v27 = vadd.f32 %v5050_v36, %v5012_v17 }
 0x81b   :  { %v5119_v33 = vpop.f32.mrf.mxu0 }
 0x81c   :  { %v5120_v63 = vadd.f32 %v5119_v33, %v5051_v27 }
 0x823   :  { %v5156_v37 = vpop.f32.mrf.mxu1 }
 0x824   :  { %v5157_v38 = vadd.f32 %v5156_v37, %v5120_v63 }
 0x826   :  { %5159 = vst.msk [vmem:[#allocation2] sm:$0xff] %vm1040_vm1, %v5157_v38 }
 0x827   :  { %5170 = dma.vmem_to_hbm [thread:$0]  %s5166_s28, 128, %s5168_s30, [#allocation3]  }
 0x828   :  { %5238 = dma.done.wait [#allocation3], 128  }
 0x829   :  { %5239 = vsyncadd [#allocation3], 4294967168 }
 0x82a   :  { %5175 = vsyncpa [#allocation3], 1 }

</bundles_post_ra>
